<compile_context>
chip_gen: v7x
topology: tpu7x:2x2x1
jax: 0.10.0
libtpu: 0.0.40
codegen_flags: <defaults>
</compile_context>

<pallas_src>
import functools

import jax
import jax.numpy as jnp
from jax.experimental import pallas as pl
from jax.experimental.pallas import tpu as pltpu

LEAKY_SLOPE = 0.1   # nn.LeakyReLU(0.1)
BN_EPS = 1e-5
L2_EPS = 1e-12      # F.normalize eps


# ------------------------------ small helpers ------------------------------

def _round_up(x, m):
    return ((x + m - 1) // m) * m


def _choose_tm(m):
    # bigger M tile for MXU utilization / fewer grid steps; pad M up instead of TM=M.
    return 256 if m >= 256 else _round_up(m, 8)


def _choose_tn(n):
    # tile N so the resident (bf16) weight block stays small (v7x 64 MiB VMEM).
    return 512 if (n > 512 and n % 512 == 0) else n


def _pad_rows(x, mp):
    m = x.shape[0]
    return x if m == mp else jnp.pad(x, ((0, mp - m), (0, 0)))


# ----------------------------- Pallas kernels -----------------------------

def _mm_bias_act_kernel(x_ref, w_ref, b_ref, o_ref, *, slope):
    acc = jnp.dot(x_ref[...], w_ref[...], preferred_element_type=jnp.float32)
    acc = acc + b_ref[...]
    if slope is not None:
        acc = jnp.where(acc >= 0, acc, slope * acc)
    o_ref[...] = acc.astype(o_ref.dtype)


def _mm_bias_res_act_kernel(x_ref, w_ref, b_ref, r_ref, o_ref, *, slope):
    acc = jnp.dot(x_ref[...], w_ref[...], preferred_element_type=jnp.float32)
    acc = acc + b_ref[...] + r_ref[...].astype(jnp.float32)   # out += residual
    if slope is not None:
        acc = jnp.where(acc >= 0, acc, slope * acc)
    o_ref[...] = acc.astype(o_ref.dtype)


def _mm_bias_ds_act_kernel(x_ref, w_ref, b_ref, xr_ref, wd_ref, bd_ref, o_ref, *, slope):
    # conv3 + bn3 + fused downsample(conv1x1+bn) residual + LeakyReLU (shares the x tiles).
    acc = jnp.dot(x_ref[...], w_ref[...], preferred_element_type=jnp.float32) + b_ref[...]
    acc = acc + jnp.dot(xr_ref[...], wd_ref[...], preferred_element_type=jnp.float32) + bd_ref[...]
    if slope is not None:
        acc = jnp.where(acc >= 0, acc, slope * acc)
    o_ref[...] = acc.astype(o_ref.dtype)


def _mix_kernel(a_ref, p_ref, wa_ref, wp_ref, o_ref):
    # fused cat([a, pose_out], C) @ W  ==  a @ Wa + pose_out @ Wp  (no bias, no activation)
    acc = jnp.dot(a_ref[...], wa_ref[...], preferred_element_type=jnp.float32)
    acc = acc + jnp.dot(p_ref[...], wp_ref[...], preferred_element_type=jnp.float32)
    o_ref[...] = acc.astype(o_ref.dtype)


def _conv3x3_kernel(x_ref, w_ref, b_ref, o_ref, *, q_out, w_pad, slope):
    # x_ref: (1, Q_in, Cin) flattened, spatially padded image for one batch (bf16)
    # w_ref: (3, 3, Cin, Cout) bf16, BN scale already folded in
    # output position q = h*(W+2)+w needs input rows q + dh*(W+2) + dw -> 9 shifted matmuls.
    cout = w_ref.shape[-1]
    acc = jnp.zeros((q_out, cout), jnp.float32)
    for dh in range(3):
        for dw in range(3):
            xs = x_ref[0, pl.ds(dh * w_pad + dw, q_out), :]
            acc = acc + jnp.dot(xs, w_ref[dh, dw], preferred_element_type=jnp.float32)
    acc = acc + b_ref[...]
    if slope is not None:
        acc = jnp.where(acc >= 0, acc, slope * acc)
    o_ref[0] = acc.astype(o_ref.dtype)


def _pool_norm_kernel(x_ref, o_ref, *, mode):
    x = x_ref[0].astype(jnp.float32)                     # (HW, C)
    if mode == "max":                                    # AdaptiveMaxPool2d(1)
        pooled = jnp.max(x, axis=0, keepdims=True)
    elif mode == "avg":                                  # AdaptiveAvgPool2d(1)
        pooled = jnp.mean(x, axis=0, keepdims=True)
    else:                                                # lead branch: max + avg
        pooled = jnp.max(x, axis=0, keepdims=True) + jnp.mean(x, axis=0, keepdims=True)
    nrm = jnp.sqrt(jnp.sum(pooled * pooled, axis=-1, keepdims=True))
    o_ref[0] = pooled / jnp.maximum(nrm, L2_EPS)         # F.normalize


def _head_kernel(g_ref, p_ref, l_ref, s1, b1, s2, b2, s3, b3, o_ref, *, C):
    feat1 = g_ref[...] * s1[...] + b1[...]               # self.bottleneck (BN1d eval)
    feat2 = p_ref[...] * s2[...] + b2[...]               # self.part1_bottleneck
    feat3 = l_ref[...] * s3[...] + b3[...]               # self.lead_bottleneck
    o_ref[:, :C] = feat1 + feat2
    o_ref[:, C:] = feat3


# ------------------------------ kernel wrappers -----------------------------

def conv1x1(x, w_mat, bias, *, residual=None, ds=None, slope=None,
            out_dtype=jnp.bfloat16):
    """Fused 1x1-conv matmul + (folded-BN) bias (+residual | +fused downsample) (+LeakyReLU).

    x: (M, K)   w_mat: (K, N) with BN scale pre-folded   bias: (N,) f32
    ds: (x_res (M, Kr), wd (Kr, N), bd (N,)) for the downsample branch.
    """
    M, K = x.shape
    K2, N = w_mat.shape
    assert K == K2
    TM = _choose_tm(M)
    TN = _choose_tn(N)
    Mp = pl.cdiv(M, TM) * TM

    in_specs = [
        pl.BlockSpec((TM, K), lambda i, j: (i, 0)),
        pl.BlockSpec((K, TN), lambda i, j: (0, j)),
        pl.BlockSpec((1, TN), lambda i, j: (0, j)),
    ]
    args = [_pad_rows(x.astype(jnp.bfloat16), Mp),
            w_mat.astype(jnp.bfloat16),
            bias.reshape(1, N).astype(jnp.float32)]

    if ds is not None:
        x_res, wd, bd = ds
        Kr = x_res.shape[1]
        in_specs += [pl.BlockSpec((TM, Kr), lambda i, j: (i, 0)),
                     pl.BlockSpec((Kr, TN), lambda i, j: (0, j)),
                     pl.BlockSpec((1, TN), lambda i, j: (0, j))]
        args += [_pad_rows(x_res.astype(jnp.bfloat16), Mp),
                 wd.astype(jnp.bfloat16),
                 bd.reshape(1, N).astype(jnp.float32)]
        kernel = functools.partial(_mm_bias_ds_act_kernel, slope=slope)
    elif residual is not None:
        in_specs.append(pl.BlockSpec((TM, TN), lambda i, j: (i, j)))
        args.append(_pad_rows(residual.astype(jnp.bfloat16), Mp))
        kernel = functools.partial(_mm_bias_res_act_kernel, slope=slope)
    else:
        kernel = functools.partial(_mm_bias_act_kernel, slope=slope)

    out = pl.pallas_call(
        kernel,
        out_shape=jax.ShapeDtypeStruct((Mp, N), out_dtype),
        grid=(Mp // TM, N // TN),
        in_specs=in_specs,
        out_specs=pl.BlockSpec((TM, TN), lambda i, j: (i, j)),
        compiler_params=pltpu.CompilerParams(
            dimension_semantics=("parallel", "parallel")),
    )(*args)
    return out[:M] if Mp != M else out


def mix_conv(a_flat, p_flat, w_mat):
    """self.mix_conv on cat([a, pose_out], dim=C) without materializing the concat."""
    M, K1 = a_flat.shape
    K2 = p_flat.shape[1]
    N = w_mat.shape[1]
    wa, wp = w_mat[:K1], w_mat[K1:]
    TM = _choose_tm(M)
    TN = _choose_tn(N)
    Mp = pl.cdiv(M, TM) * TM
    out = pl.pallas_call(
        _mix_kernel,
        out_shape=jax.ShapeDtypeStruct((Mp, N), jnp.bfloat16),
        grid=(Mp // TM, N // TN),
        in_specs=[pl.BlockSpec((TM, K1), lambda i, j: (i, 0)),
                  pl.BlockSpec((TM, K2), lambda i, j: (i, 0)),
                  pl.BlockSpec((K1, TN), lambda i, j: (0, j)),
                  pl.BlockSpec((K2, TN), lambda i, j: (0, j))],
        out_specs=pl.BlockSpec((TM, TN), lambda i, j: (i, j)),
        compiler_params=pltpu.CompilerParams(
            dimension_semantics=("parallel", "parallel")),
    )(_pad_rows(a_flat.astype(jnp.bfloat16), Mp),
      _pad_rows(p_flat.astype(jnp.bfloat16), Mp),
      wa.astype(jnp.bfloat16), wp.astype(jnp.bfloat16))
    return out[:M] if Mp != M else out


def conv3x3(x_nhwc, w4, bias, *, slope, out_dtype=jnp.bfloat16):
    """3x3 conv (pad=1, stride=1) + folded-BN bias + LeakyReLU, no HBM im2col.

    The image is zero-padded and flattened to (B, Q_in, Cin); the kernel does 9 shifted
    matmuls on the resident per-batch tile.  Boundary outputs are discarded in the wrapper.
    """
    B, H, W, Cin = x_nhwc.shape
    Cout = w4.shape[-1]
    Wp = W + 2
    Qo = (H + 2) * Wp                     # outputs computed in padded coords
    Qi = (H + 5) * Wp                     # extra bottom pad covers the dh/dw shifts
    xp = jnp.pad(x_nhwc.astype(jnp.bfloat16), ((0, 0), (1, 4), (1, 1), (0, 0)))
    xp = xp.reshape(B, Qi, Cin)

    out = pl.pallas_call(
        functools.partial(_conv3x3_kernel, q_out=Qo, w_pad=Wp, slope=slope),
        out_shape=jax.ShapeDtypeStruct((B, Qo, Cout), out_dtype),
        grid=(B,),
        in_specs=[pl.BlockSpec((1, Qi, Cin), lambda b: (b, 0, 0)),
                  pl.BlockSpec((3, 3, Cin, Cout), lambda b: (0, 0, 0, 0)),
                  pl.BlockSpec((1, Cout), lambda b: (0, 0))],
        out_specs=pl.BlockSpec((1, Qo, Cout), lambda b: (b, 0, 0)),
        compiler_params=pltpu.CompilerParams(dimension_semantics=("parallel",)),
    )(xp, w4.astype(jnp.bfloat16), bias.reshape(1, Cout).astype(jnp.float32))

    out = out.reshape(B, H + 2, Wp, Cout)[:, :H, :W, :]   # keep valid interior
    return out.reshape(B * H * W, Cout)


def pool_norm(x_bhwc_flat, B, HW, C, mode):
    """Adaptive pool over spatial dims + F.normalize, tiled per batch element."""
    x = x_bhwc_flat.reshape(B, HW, C)
    out = pl.pallas_call(
        functools.partial(_pool_norm_kernel, mode=mode),
        out_shape=jax.ShapeDtypeStruct((B, 1, C), jnp.float32),
        grid=(B,),
        in_specs=[pl.BlockSpec((1, HW, C), lambda b: (b, 0, 0))],
        out_specs=pl.BlockSpec((1, 1, C), lambda b: (b, 0, 0)),
        compiler_params=pltpu.CompilerParams(dimension_semantics=("parallel",)),
    )(x)
    return out.reshape(B, C)


def head(global_feat, pose_feat, lead_feat, bn_g, bn_p, bn_l):
    B, C = global_feat.shape
    vecs = []
    for bn in (bn_g, bn_p, bn_l):
        s, b = fold_bn(bn)
        vecs += [s.reshape(1, C), b.reshape(1, C)]
    args = [global_feat, pose_feat, lead_feat] + vecs
    in_specs = [pl.BlockSpec((B, C), lambda i: (0, 0))] * 3 + \
               [pl.BlockSpec((1, C), lambda i: (0, 0))] * 6
    return pl.pallas_call(
        functools.partial(_head_kernel, C=C),
        out_shape=jax.ShapeDtypeStruct((B, 2 * C), jnp.float32),
        grid=(1,),
        in_specs=in_specs,
        out_specs=pl.BlockSpec((B, 2 * C), lambda i: (0, 0)),
    )(*args)


# ------------------------------- JAX glue ---------------------------------

def fold_bn(bn):
    scale = bn["gamma"] / jnp.sqrt(bn["var"] + BN_EPS)
    bias = bn["beta"] - bn["mean"] * scale
    return scale, bias


def conv1x1_to_mat(w):      # (Cout, Cin, 1, 1) -> (Cin, Cout) f32
    return jnp.transpose(w[:, :, 0, 0], (1, 0))


def fold_w1x1(w, scale):    # fold BN scale into the 1x1 conv weight columns
    return conv1x1_to_mat(w).astype(jnp.float32) * scale[None, :]


def fold_w3x3(w, scale):    # (Cout, Cin, 3, 3) -> (3, 3, Cin, Cout), BN scale folded
    w4 = jnp.transpose(w, (2, 3, 1, 0)).astype(jnp.float32)
    return w4 * scale[None, None, None, :]


def bottleneck_forward(x_flat, p, B, H, W):
    """Bottleneck: 1x1->BN->LReLU -> 3x3->BN->LReLU -> 1x1->BN (+residual/downsample) -> LReLU."""
    s1, b1 = fold_bn(p["bn1"])
    out = conv1x1(x_flat, fold_w1x1(p["w1"], s1), b1, slope=LEAKY_SLOPE)

    planes = p["w2"].shape[0]
    s2, b2 = fold_bn(p["bn2"])
    out = conv3x3(out.reshape(B, H, W, planes), fold_w3x3(p["w2"], s2), b2,
                  slope=LEAKY_SLOPE)

    s3, b3 = fold_bn(p["bn3"])
    w3 = fold_w1x1(p["w3"], s3)
    if "wd" in p:   # downsample = Conv1x1 + BN (no activation), fused into the conv3 kernel
        sd, bd = fold_bn(p["bnd"])
        return conv1x1(out, w3, b3, ds=(x_flat, fold_w1x1(p["wd"], sd), bd),
                       slope=LEAKY_SLOPE)
    return conv1x1(out, w3, b3, residual=x_flat, slope=LEAKY_SLOPE)


def run_layer4(x_flat, blocks, B, H, W):
    for p in blocks:
        x_flat = bottleneck_forward(x_flat, p, B, H, W)
    return x_flat


def baseline_forward(a, pose_out, lead, params):
    """Eval-mode Baseline forward downstream of the (unavailable) backbones.

    a, pose_out : (B, H, W, C_mid)  -- self.base(x)[0] and self.pose_se(self.preact(x))
    lead        : (B, H, W, C_full) -- self.base(x)[1]
    returns     : (B, 2*C_full)     -- cat([feat1 + feat2, feat3], dim=1)
    """
    B, H, W, c_mid = a.shape
    c_full = lead.shape[-1]
    M = B * H * W

    # pose_part = mix_conv(cat([a, pose_out], dim=1))  -- concat fused into the kernel.
    pose_part = mix_conv(a.reshape(M, c_mid), pose_out.reshape(M, c_mid),
                         conv1x1_to_mat(params["mix_conv_w"]))
    # TODO(synk): self.global_se (SELayer) definition not provided -> identity.

    global_pose_part = run_layer4(pose_part, params["layer4"], B, H, W)      # (M, c_full) bf16
    bfe_out = run_layer4(pose_part, params["bfe_layer4"], B, H, W)           # (M, c_full) bf16
    # (eval mode: BatchDrop is a no-op)

    pose_part_feat = pool_norm(global_pose_part, B, H * W, c_full, "max")
    global_feat = pool_norm(bfe_out, B, H * W, c_full, "avg")
    lead_feat = pool_norm(lead.reshape(M, c_full), B, H * W, c_full, "max_plus_avg")

    return head(global_feat, pose_part_feat, lead_feat,
                params["bn_global"], params["bn_part1"], params["bn_lead"])


# --------------------------- deterministic init ----------------------------

def init_bn(c):  # PyTorch BatchNorm init / weights_init_kaiming: weight=1, bias=0
    return dict(gamma=jnp.ones((c,), jnp.float32), beta=jnp.zeros((c,), jnp.float32),
                mean=jnp.zeros((c,), jnp.float32), var=jnp.ones((c,), jnp.float32))


def kaiming_conv(key, shape):  # kaiming_normal, a=0, mode='fan_in'
    fan_in = shape[1] * shape[2] * shape[3]
    std = (2.0 / fan_in) ** 0.5
    return std * jax.random.normal(key, shape, jnp.float32)


def init_bottleneck(key, inplanes, planes, downsample):
    exp = 4
    keys = jax.random.split(key, 4)
    p = dict(
        w1=kaiming_conv(keys[0], (planes, inplanes, 1, 1)), bn1=init_bn(planes),
        w2=kaiming_conv(keys[1], (planes, planes, 3, 3)),  bn2=init_bn(planes),
        w3=kaiming_conv(keys[2], (planes * exp, planes, 1, 1)), bn3=init_bn(planes * exp),
    )
    if downsample:
        p["wd"] = kaiming_conv(keys[3], (planes * exp, inplanes, 1, 1))
        p["bnd"] = init_bn(planes * exp)
    return p


def init_params(key, c_mid, planes):
    c_full = planes * 4
    keys = jax.random.split(key, 7)
    return dict(
        mix_conv_w=kaiming_conv(keys[0], (c_mid, 2 * c_mid, 1, 1)),
        layer4=[init_bottleneck(keys[1], c_mid, planes, True),
                init_bottleneck(keys[2], c_full, planes, False),
                init_bottleneck(keys[3], c_full, planes, False)],
        bfe_layer4=[init_bottleneck(keys[4], c_mid, planes, True),
                    init_bottleneck(keys[5], c_full, planes, False),
                    init_bottleneck(keys[6], c_full, planes, False)],
        bn_global=init_bn(c_full),   # self.bottleneck
        bn_part1=init_bn(c_full),    # self.part1_bottleneck
        bn_lead=init_bn(c_full),     # self.lead_bottleneck
    )


if __name__ == "__main__":
    # Small stand-in shapes: C_MID=64 (for 1024), PLANES=32 (for 512), C_FULL=128 (for 2048)
    B, H, W = 2, 8, 8
    C_MID, PLANES = 64, 32
    C_FULL = PLANES * 4

    key = jax.random.PRNGKey(0)
    k_a, k_p, k_l, k_w = jax.random.split(key, 4)
    a = jax.random.normal(k_a, (B, H, W, C_MID), jnp.float32)
    pose_out = jax.random.normal(k_p, (B, H, W, C_MID), jnp.float32)
    lead = jax.random.normal(k_l, (B, H, W, C_FULL), jnp.float32)
    params = init_params(k_w, C_MID, PLANES)

    out = jax.jit(baseline_forward)(a, pose_out, lead, params)
    jax.block_until_ready(out)
    assert out.shape == (B, 2 * C_FULL) and out.dtype == jnp.float32
    assert bool(jnp.all(jnp.isfinite(out)))
    print("KERNEL_OK")
</pallas_src>

<mosaic_0001>
module attributes {stable_mosaic.version = 11 : i64} {
  func.func @_mix_kernel(%arg0: i32, %arg1: i32, %arg2: memref<128x64xbf16, #tpu.memory_space<vmem>>, %arg3: memref<128x64xbf16, #tpu.memory_space<vmem>>, %arg4: memref<64x64xbf16, #tpu.memory_space<vmem>>, %arg5: memref<64x64xbf16, #tpu.memory_space<vmem>>, %arg6: memref<128x64xbf16, #tpu.memory_space<vmem>>) attributes {dimension_semantics = [#tpu.dimension_semantics<parallel>, #tpu.dimension_semantics<parallel>], iteration_bounds = array<i64: 1, 1>, scalar_prefetch = 0 : i64, scratch_operands = 0 : i64, tpu.core_type = #tpu.core_type<tc>, window_params = [{transform_indices = @transform_0, window_bounds = array<i64: 128, 64>}, {transform_indices = @transform_1, window_bounds = array<i64: 128, 64>}, {transform_indices = @transform_2, window_bounds = array<i64: 64, 64>}, {transform_indices = @transform_3, window_bounds = array<i64: 64, 64>}, {transform_indices = @transform_4, window_bounds = array<i64: 128, 64>}]} {
    %c0 = arith.constant 0 : index
    %c0_0 = arith.constant 0 : index
    %0 = vector.load %arg2[%c0, %c0_0] : memref<128x64xbf16, #tpu.memory_space<vmem>>, vector<128x64xbf16>
    %c0_1 = arith.constant 0 : index
    %c0_2 = arith.constant 0 : index
    %1 = vector.load %arg4[%c0_1, %c0_2] : memref<64x64xbf16, #tpu.memory_space<vmem>>, vector<64x64xbf16>
    %cst = arith.constant dense<0.000000e+00> : vector<128x64xf32>
    %2 = tpu.matmul %0, %1, %cst {dimension_numbers = #tpu.dot_dimension_numbers<[1], [0], [0], [1], [0, 0, 1, 1], [], []>} : vector<128x64xbf16>, vector<64x64xbf16>, vector<128x64xf32> -> vector<128x64xf32>
    %c0_3 = arith.constant 0 : index
    %c0_4 = arith.constant 0 : index
    %3 = vector.load %arg3[%c0_3, %c0_4] : memref<128x64xbf16, #tpu.memory_space<vmem>>, vector<128x64xbf16>
    %c0_5 = arith.constant 0 : index
    %c0_6 = arith.constant 0 : index
    %4 = vector.load %arg5[%c0_5, %c0_6] : memref<64x64xbf16, #tpu.memory_space<vmem>>, vector<64x64xbf16>
    %cst_7 = arith.constant dense<0.000000e+00> : vector<128x64xf32>
    %5 = tpu.matmul %3, %4, %cst_7 {dimension_numbers = #tpu.dot_dimension_numbers<[1], [0], [0], [1], [0, 0, 1, 1], [], []>} : vector<128x64xbf16>, vector<64x64xbf16>, vector<128x64xf32> -> vector<128x64xf32>
    %6 = arith.addf %2, %5 : vector<128x64xf32>
    %7 = arith.truncf %6 : vector<128x64xf32> to vector<128x64xbf16>
    %c0_8 = arith.constant 0 : index
    %c0_9 = arith.constant 0 : index
    %8 = vector.load %arg6[%c0_8, %c0_9] : memref<128x64xbf16, #tpu.memory_space<vmem>>, vector<128x64xbf16>
    tpu.vector_store %arg6[%c0_8, %c0_9], %7 {strides = array<i32>} : memref<128x64xbf16, #tpu.memory_space<vmem>>, vector<128x64xbf16>,
    return
  }
  func.func @transform_0(%arg0: i32, %arg1: i32) -> (i32, i32) {
    %c0_i32 = arith.constant 0 : i32
    %c0_i32_0 = arith.constant 0 : i32
    return %arg0, %c0_i32 : i32, i32
  }
  func.func @transform_1(%arg0: i32, %arg1: i32) -> (i32, i32) {
    %c0_i32 = arith.constant 0 : i32
    %c0_i32_0 = arith.constant 0 : i32
    return %arg0, %c0_i32 : i32, i32
  }
  func.func @transform_2(%arg0: i32, %arg1: i32) -> (i32, i32) {
    %c0_i32 = arith.constant 0 : i32
    %c0_i32_0 = arith.constant 0 : i32
    return %c0_i32, %arg1 : i32, i32
  }
  func.func @transform_3(%arg0: i32, %arg1: i32) -> (i32, i32) {
    %c0_i32 = arith.constant 0 : i32
    %c0_i32_0 = arith.constant 0 : i32
    return %c0_i32, %arg1 : i32, i32
  }
  func.func @transform_4(%arg0: i32, %arg1: i32) -> (i32, i32) {
    %c0_i32 = arith.constant 0 : i32
    return %arg0, %arg1 : i32, i32
  }
}

module attributes {stable_mosaic.version = 11 : i64} {
  func.func @_mm_bias_act_kernel(%arg0: i32, %arg1: i32, %arg2: memref<128x64xbf16, #tpu.memory_space<vmem>>, %arg3: memref<64x32xbf16, #tpu.memory_space<vmem>>, %arg4: memref<1x32xf32, #tpu.memory_space<vmem>>, %arg5: memref<128x32xbf16, #tpu.memory_space<vmem>>) attributes {dimension_semantics = [#tpu.dimension_semantics<parallel>, #tpu.dimension_semantics<parallel>], iteration_bounds = array<i64: 1, 1>, scalar_prefetch = 0 : i64, scratch_operands = 0 : i64, tpu.core_type = #tpu.core_type<tc>, window_params = [{transform_indices = @transform_0, window_bounds = array<i64: 128, 64>}, {transform_indices = @transform_1, window_bounds = array<i64: 64, 32>}, {transform_indices = @transform_2, window_bounds = array<i64: 1, 32>}, {transform_indices = @transform_3, window_bounds = array<i64: 128, 32>}]} {
    %c0 = arith.constant 0 : index
    %c0_0 = arith.constant 0 : index
    %0 = vector.load %arg2[%c0, %c0_0] : memref<128x64xbf16, #tpu.memory_space<vmem>>, vector<128x64xbf16>
    %c0_1 = arith.constant 0 : index
    %c0_2 = arith.constant 0 : index
    %1 = vector.load %arg3[%c0_1, %c0_2] : memref<64x32xbf16, #tpu.memory_space<vmem>>, vector<64x32xbf16>
    %cst = arith.constant dense<0.000000e+00> : vector<128x32xf32>
    %2 = tpu.matmul %0, %1, %cst {dimension_numbers = #tpu.dot_dimension_numbers<[1], [0], [0], [1], [0, 0, 1, 1], [], []>} : vector<128x64xbf16>, vector<64x32xbf16>, vector<128x32xf32> -> vector<128x32xf32>
    %c0_3 = arith.constant 0 : index
    %c0_4 = arith.constant 0 : index
    %3 = vector.load %arg4[%c0_3, %c0_4] : memref<1x32xf32, #tpu.memory_space<vmem>>, vector<1x32xf32>
    %4 = vector.broadcast %3 : vector<1x32xf32> to vector<128x32xf32>
    %5 = arith.addf %2, %4 : vector<128x32xf32>
    %cst_5 = arith.constant 0.000000e+00 : f32
    %6 = vector.broadcast %cst_5 : f32 to vector<128x32xf32>
    %7 = arith.cmpf oge, %5, %6 : vector<128x32xf32>
    %cst_6 = arith.constant 1.000000e-01 : f32
    %8 = vector.broadcast %cst_6 : f32 to vector<128x32xf32>
    %9 = arith.mulf %8, %5 : vector<128x32xf32>
    %10 = arith.select %7, %5, %9 : vector<128x32xi1>, vector<128x32xf32>
    %11 = arith.truncf %10 : vector<128x32xf32> to vector<128x32xbf16>
    %c0_7 = arith.constant 0 : index
    %c0_8 = arith.constant 0 : index
    %12 = vector.load %arg5[%c0_7, %c0_8] : memref<128x32xbf16, #tpu.memory_space<vmem>>, vector<128x32xbf16>
    tpu.vector_store %arg5[%c0_7, %c0_8], %11 {strides = array<i32>} : memref<128x32xbf16, #tpu.memory_space<vmem>>, vector<128x32xbf16>,
    return
  }
  func.func @transform_0(%arg0: i32, %arg1: i32) -> (i32, i32) {
    %c0_i32 = arith.constant 0 : i32
    %c0_i32_0 = arith.constant 0 : i32
    return %arg0, %c0_i32 : i32, i32
  }
  func.func @transform_1(%arg0: i32, %arg1: i32) -> (i32, i32) {
    %c0_i32 = arith.constant 0 : i32
    %c0_i32_0 = arith.constant 0 : i32
    return %c0_i32, %arg1 : i32, i32
  }
  func.func @transform_2(%arg0: i32, %arg1: i32) -> (i32, i32) {
    %c0_i32 = arith.constant 0 : i32
    %c0_i32_0 = arith.constant 0 : i32
    return %c0_i32, %arg1 : i32, i32
  }
  func.func @transform_3(%arg0: i32, %arg1: i32) -> (i32, i32) {
    %c0_i32 = arith.constant 0 : i32
    return %arg0, %arg1 : i32, i32
  }
}

module attributes {stable_mosaic.version = 11 : i64} {
  func.func @_conv3x3_kernel(%arg0: i32, %arg1: memref<1x130x32xbf16, #tpu.memory_space<vmem>>, %arg2: memref<3x3x32x32xbf16, #tpu.memory_space<vmem>>, %arg3: memref<1x32xf32, #tpu.memory_space<vmem>>, %arg4: memref<1x100x32xbf16, #tpu.memory_space<vmem>>) attributes {dimension_semantics = [#tpu.dimension_semantics<parallel>], iteration_bounds = array<i64: 2>, scalar_prefetch = 0 : i64, scratch_operands = 0 : i64, tpu.core_type = #tpu.core_type<tc>, window_params = [{transform_indices = @transform_0, window_bounds = array<i64: 1, 130, 32>}, {pipeline_mode = #tpu.pipeline_mode<synchronous>, transform_indices = @transform_1, window_bounds = array<i64: 3, 3, 32, 32>}, {pipeline_mode = #tpu.pipeline_mode<synchronous>, transform_indices = @transform_2, window_bounds = array<i64: 1, 32>}, {transform_indices = @transform_3, window_bounds = array<i64: 1, 100, 32>}]} {
    %cst = arith.constant 0.000000e+00 : f32
    %0 = vector.broadcast %cst : f32 to vector<100x32xf32>
    %c0 = arith.constant 0 : index
    %c0_0 = arith.constant 0 : index
    %c0_1 = arith.constant 0 : index
    %1 = vector.load %arg1[%c0, %c0_0, %c0_1] : memref<1x130x32xbf16, #tpu.memory_space<vmem>>, vector<1x100x32xbf16>
    %2 = vector.shape_cast %1 : vector<1x100x32xbf16> to vector<100x32xbf16>
    %c0_2 = arith.constant 0 : index
    %c0_3 = arith.constant 0 : index
    %c0_4 = arith.constant 0 : index
    %c0_5 = arith.constant 0 : index
    %3 = vector.load %arg2[%c0_2, %c0_3, %c0_4, %c0_5] : memref<3x3x32x32xbf16, #tpu.memory_space<vmem>>, vector<1x1x32x32xbf16>
    %4 = vector.shape_cast %3 : vector<1x1x32x32xbf16> to vector<32x32xbf16>
    %cst_6 = arith.constant dense<0.000000e+00> : vector<100x32xf32>
    %5 = tpu.matmul %2, %4, %cst_6 {dimension_numbers = #tpu.dot_dimension_numbers<[1], [0], [0], [1], [0, 0, 1, 1], [], []>} : vector<100x32xbf16>, vector<32x32xbf16>, vector<100x32xf32> -> vector<100x32xf32>
    %6 = arith.addf %0, %5 : vector<100x32xf32>
    %c0_7 = arith.constant 0 : index
    %c1 = arith.constant 1 : index
    %c0_8 = arith.constant 0 : index
    %7 = vector.load %arg1[%c0_7, %c1, %c0_8] : memref<1x130x32xbf16, #tpu.memory_space<vmem>>, vector<1x100x32xbf16>
    %8 = vector.shape_cast %7 : vector<1x100x32xbf16> to vector<100x32xbf16>
    %c0_9 = arith.constant 0 : index
    %c1_10 = arith.constant 1 : index
    %c0_11 = arith.constant 0 : index
    %c0_12 = arith.constant 0 : index
    %9 = vector.load %arg2[%c0_9, %c1_10, %c0_11, %c0_12] : memref<3x3x32x32xbf16, #tpu.memory_space<vmem>>, vector<1x1x32x32xbf16>
    %10 = vector.shape_cast %9 : vector<1x1x32x32xbf16> to vector<32x32xbf16>
    %cst_13 = arith.constant dense<0.000000e+00> : vector<100x32xf32>
    %11 = tpu.matmul %8, %10, %cst_13 {dimension_numbers = #tpu.dot_dimension_numbers<[1], [0], [0], [1], [0, 0, 1, 1], [], []>} : vector<100x32xbf16>, vector<32x32xbf16>, vector<100x32xf32> -> vector<100x32xf32>
    %12 = arith.addf %6, %11 : vector<100x32xf32>
    %c0_14 = arith.constant 0 : index
    %c2 = arith.constant 2 : index
    %c0_15 = arith.constant 0 : index
    %13 = vector.load %arg1[%c0_14, %c2, %c0_15] : memref<1x130x32xbf16, #tpu.memory_space<vmem>>, vector<1x100x32xbf16>
    %14 = vector.shape_cast %13 : vector<1x100x32xbf16> to vector<100x32xbf16>
    %c0_16 = arith.constant 0 : index
    %c2_17 = arith.constant 2 : index
    %c0_18 = arith.constant 0 : index
    %c0_19 = arith.constant 0 : index
    %15 = vector.load %arg2[%c0_16, %c2_17, %c0_18, %c0_19] : memref<3x3x32x32xbf16, #tpu.memory_space<vmem>>, vector<1x1x32x32xbf16>
    %16 = vector.shape_cast %15 : vector<1x1x32x32xbf16> to vector<32x32xbf16>
    %cst_20 = arith.constant dense<0.000000e+00> : vector<100x32xf32>
    %17 = tpu.matmul %14, %16, %cst_20 {dimension_numbers = #tpu.dot_dimension_numbers<[1], [0], [0], [1], [0, 0, 1, 1], [], []>} : vector<100x32xbf16>, vector<32x32xbf16>, vector<100x32xf32> -> vector<100x32xf32>
    %18 = arith.addf %12, %17 : vector<100x32xf32>
    %c0_21 = arith.constant 0 : index
    %c10 = arith.constant 10 : index
    %c0_22 = arith.constant 0 : index
    %19 = vector.load %arg1[%c0_21, %c10, %c0_22] : memref<1x130x32xbf16, #tpu.memory_space<vmem>>, vector<1x100x32xbf16>
    %20 = vector.shape_cast %19 : vector<1x100x32xbf16> to vector<100x32xbf16>
    %c1_23 = arith.constant 1 : index
    %c0_24 = arith.constant 0 : index
    %c0_25 = arith.constant 0 : index
    %c0_26 = arith.constant 0 : index
    %21 = vector.load %arg2[%c1_23, %c0_24, %c0_25, %c0_26] : memref<3x3x32x32xbf16, #tpu.memory_space<vmem>>, vector<1x1x32x32xbf16>
    %22 = vector.shape_cast %21 : vector<1x1x32x32xbf16> to vector<32x32xbf16>
    %cst_27 = arith.constant dense<0.000000e+00> : vector<100x32xf32>
    %23 = tpu.matmul %20, %22, %cst_27 {dimension_numbers = #tpu.dot_dimension_numbers<[1], [0], [0], [1], [0, 0, 1, 1], [], []>} : vector<100x32xbf16>, vector<32x32xbf16>, vector<100x32xf32> -> vector<100x32xf32>
    %24 = arith.addf %18, %23 : vector<100x32xf32>
    %c0_28 = arith.constant 0 : index
    %c11 = arith.constant 11 : index
    %c0_29 = arith.constant 0 : index
    %25 = vector.load %arg1[%c0_28, %c11, %c0_29] : memref<1x130x32xbf16, #tpu.memory_space<vmem>>, vector<1x100x32xbf16>
    %26 = vector.shape_cast %25 : vector<1x100x32xbf16> to vector<100x32xbf16>
    %c1_30 = arith.constant 1 : index
    %c1_31 = arith.constant 1 : index
    %c0_32 = arith.constant 0 : index
    %c0_33 = arith.constant 0 : index
    %27 = vector.load %arg2[%c1_30, %c1_31, %c0_32, %c0_33] : memref<3x3x32x32xbf16, #tpu.memory_space<vmem>>, vector<1x1x32x32xbf16>
    %28 = vector.shape_cast %27 : vector<1x1x32x32xbf16> to vector<32x32xbf16>
    %cst_34 = arith.constant dense<0.000000e+00> : vector<100x32xf32>
    %29 = tpu.matmul %26, %28, %cst_34 {dimension_numbers = #tpu.dot_dimension_numbers<[1], [0], [0], [1], [0, 0, 1, 1], [], []>} : vector<100x32xbf16>, vector<32x32xbf16>, vector<100x32xf32> -> vector<100x32xf32>
    %30 = arith.addf %24, %29 : vector<100x32xf32>
    %c0_35 = arith.constant 0 : index
    %c12 = arith.constant 12 : index
    %c0_36 = arith.constant 0 : index
    %31 = vector.load %arg1[%c0_35, %c12, %c0_36] : memref<1x130x32xbf16, #tpu.memory_space<vmem>>, vector<1x100x32xbf16>
    %32 = vector.shape_cast %31 : vector<1x100x32xbf16> to vector<100x32xbf16>
    %c1_37 = arith.constant 1 : index
    %c2_38 = arith.constant 2 : index
    %c0_39 = arith.constant 0 : index
    %c0_40 = arith.constant 0 : index
    %33 = vector.load %arg2[%c1_37, %c2_38, %c0_39, %c0_40] : memref<3x3x32x32xbf16, #tpu.memory_space<vmem>>, vector<1x1x32x32xbf16>
    %34 = vector.shape_cast %33 : vector<1x1x32x32xbf16> to vector<32x32xbf16>
    %cst_41 = arith.constant dense<0.000000e+00> : vector<100x32xf32>
    %35 = tpu.matmul %32, %34, %cst_41 {dimension_numbers = #tpu.dot_dimension_numbers<[1], [0], [0], [1], [0, 0, 1, 1], [], []>} : vector<100x32xbf16>, vector<32x32xbf16>, vector<100x32xf32> -> vector<100x32xf32>
    %36 = arith.addf %30, %35 : vector<100x32xf32>
    %c0_42 = arith.constant 0 : index
    %c20 = arith.constant 20 : index
    %c0_43 = arith.constant 0 : index
    %37 = vector.load %arg1[%c0_42, %c20, %c0_43] : memref<1x130x32xbf16, #tpu.memory_space<vmem>>, vector<1x100x32xbf16>
    %38 = vector.shape_cast %37 : vector<1x100x32xbf16> to vector<100x32xbf16>
    %c2_44 = arith.constant 2 : index
    %c0_45 = arith.constant 0 : index
    %c0_46 = arith.constant 0 : index
    %c0_47 = arith.constant 0 : index
    %39 = vector.load %arg2[%c2_44, %c0_45, %c0_46, %c0_47] : memref<3x3x32x32xbf16, #tpu.memory_space<vmem>>, vector<1x1x32x32xbf16>
    %40 = vector.shape_cast %39 : vector<1x1x32x32xbf16> to vector<32x32xbf16>
    %cst_48 = arith.constant dense<0.000000e+00> : vector<100x32xf32>
    %41 = tpu.matmul %38, %40, %cst_48 {dimension_numbers = #tpu.dot_dimension_numbers<[1], [0], [0], [1], [0, 0, 1, 1], [], []>} : vector<100x32xbf16>, vector<32x32xbf16>, vector<100x32xf32> -> vector<100x32xf32>
    %42 = arith.addf %36, %41 : vector<100x32xf32>
    %c0_49 = arith.constant 0 : index
    %c21 = arith.constant 21 : index
    %c0_50 = arith.constant 0 : index
    %43 = vector.load %arg1[%c0_49, %c21, %c0_50] : memref<1x130x32xbf16, #tpu.memory_space<vmem>>, vector<1x100x32xbf16>
    %44 = vector.shape_cast %43 : vector<1x100x32xbf16> to vector<100x32xbf16>
    %c2_51 = arith.constant 2 : index
    %c1_52 = arith.constant 1 : index
    %c0_53 = arith.constant 0 : index
    %c0_54 = arith.constant 0 : index
    %45 = vector.load %arg2[%c2_51, %c1_52, %c0_53, %c0_54] : memref<3x3x32x32xbf16, #tpu.memory_space<vmem>>, vector<1x1x32x32xbf16>
    %46 = vector.shape_cast %45 : vector<1x1x32x32xbf16> to vector<32x32xbf16>
    %cst_55 = arith.constant dense<0.000000e+00> : vector<100x32xf32>
    %47 = tpu.matmul %44, %46, %cst_55 {dimension_numbers = #tpu.dot_dimension_numbers<[1], [0], [0], [1], [0, 0, 1, 1], [], []>} : vector<100x32xbf16>, vector<32x32xbf16>, vector<100x32xf32> -> vector<100x32xf32>
    %48 = arith.addf %42, %47 : vector<100x32xf32>
    %c0_56 = arith.constant 0 : index
    %c22 = arith.constant 22 : index
    %c0_57 = arith.constant 0 : index
    %49 = vector.load %arg1[%c0_56, %c22, %c0_57] : memref<1x130x32xbf16, #tpu.memory_space<vmem>>, vector<1x100x32xbf16>
    %50 = vector.shape_cast %49 : vector<1x100x32xbf16> to vector<100x32xbf16>
    %c2_58 = arith.constant 2 : index
    %c2_59 = arith.constant 2 : index
    %c0_60 = arith.constant 0 : index
    %c0_61 = arith.constant 0 : index
    %51 = vector.load %arg2[%c2_58, %c2_59, %c0_60, %c0_61] : memref<3x3x32x32xbf16, #tpu.memory_space<vmem>>, vector<1x1x32x32xbf16>
    %52 = vector.shape_cast %51 : vector<1x1x32x32xbf16> to vector<32x32xbf16>
    %cst_62 = arith.constant dense<0.000000e+00> : vector<100x32xf32>
    %53 = tpu.matmul %50, %52, %cst_62 {dimension_numbers = #tpu.dot_dimension_numbers<[1], [0], [0], [1], [0, 0, 1, 1], [], []>} : vector<100x32xbf16>, vector<32x32xbf16>, vector<100x32xf32> -> vector<100x32xf32>
    %54 = arith.addf %48, %53 : vector<100x32xf32>
    %c0_63 = arith.constant 0 : index
    %c0_64 = arith.constant 0 : index
    %55 = vector.load %arg3[%c0_63, %c0_64] : memref<1x32xf32, #tpu.memory_space<vmem>>, vector<1x32xf32>
    %56 = vector.broadcast %55 : vector<1x32xf32> to vector<100x32xf32>
    %57 = arith.addf %54, %56 : vector<100x32xf32>
    %cst_65 = arith.constant 0.000000e+00 : f32
    %58 = vector.broadcast %cst_65 : f32 to vector<100x32xf32>
    %59 = arith.cmpf oge, %57, %58 : vector<100x32xf32>
    %cst_66 = arith.constant 1.000000e-01 : f32
    %60 = vector.broadcast %cst_66 : f32 to vector<100x32xf32>
    %61 = arith.mulf %60, %57 : vector<100x32xf32>
    %62 = arith.select %59, %57, %61 : vector<100x32xi1>, vector<100x32xf32>
    %63 = arith.truncf %62 : vector<100x32xf32> to vector<100x32xbf16>
    %c0_67 = arith.constant 0 : index
    %c0_68 = arith.constant 0 : index
    %c0_69 = arith.constant 0 : index
    %64 = vector.load %arg4[%c0_67, %c0_68, %c0_69] : memref<1x100x32xbf16, #tpu.memory_space<vmem>>, vector<1x100x32xbf16>
    %65 = vector.shape_cast %64 : vector<1x100x32xbf16> to vector<100x32xbf16>
    %66 = vector.shape_cast %63 : vector<100x32xbf16> to vector<1x100x32xbf16>
    tpu.vector_store %arg4[%c0_67, %c0_68, %c0_69], %66 {strides = array<i32>} : memref<1x100x32xbf16, #tpu.memory_space<vmem>>, vector<1x100x32xbf16>,
    return
  }
  func.func @transform_0(%arg0: i32) -> (i32, i32, i32) {
    %c0_i32 = arith.constant 0 : i32
    %c0_i32_0 = arith.constant 0 : i32
    %c0_i32_1 = arith.constant 0 : i32
    return %arg0, %c0_i32, %c0_i32_0 : i32, i32, i32
  }
  func.func @transform_1(%arg0: i32) -> (i32, i32, i32, i32) {
    %c0_i32 = arith.constant 0 : i32
    %c0_i32_0 = arith.constant 0 : i32
    %c0_i32_1 = arith.constant 0 : i32
    %c0_i32_2 = arith.constant 0 : i32
    %c0_i32_3 = arith.constant 0 : i32
    return %c0_i32, %c0_i32_0, %c0_i32_1, %c0_i32_2 : i32, i32, i32, i32
  }
  func.func @transform_2(%arg0: i32) -> (i32, i32) {
    %c0_i32 = arith.constant 0 : i32
    %c0_i32_0 = arith.constant 0 : i32
    %c0_i32_1 = arith.constant 0 : i32
    return %c0_i32, %c0_i32_0 : i32, i32
  }
  func.func @transform_3(%arg0: i32) -> (i32, i32, i32) {
    %c0_i32 = arith.constant 0 : i32
    %c0_i32_0 = arith.constant 0 : i32
    %c0_i32_1 = arith.constant 0 : i32
    return %arg0, %c0_i32, %c0_i32_0 : i32, i32, i32
  }
}

module attributes {stable_mosaic.version = 11 : i64} {
  func.func @_mm_bias_ds_act_kernel(%arg0: i32, %arg1: i32, %arg2: memref<128x32xbf16, #tpu.memory_space<vmem>>, %arg3: memref<32x128xbf16, #tpu.memory_space<vmem>>, %arg4: memref<1x128xf32, #tpu.memory_space<vmem>>, %arg5: memref<128x64xbf16, #tpu.memory_space<vmem>>, %arg6: memref<64x128xbf16, #tpu.memory_space<vmem>>, %arg7: memref<1x128xf32, #tpu.memory_space<vmem>>, %arg8: memref<128x128xbf16, #tpu.memory_space<vmem>>) attributes {dimension_semantics = [#tpu.dimension_semantics<parallel>, #tpu.dimension_semantics<parallel>], iteration_bounds = array<i64: 1, 1>, scalar_prefetch = 0 : i64, scratch_operands = 0 : i64, tpu.core_type = #tpu.core_type<tc>, window_params = [{transform_indices = @transform_0, window_bounds = array<i64: 128, 32>}, {transform_indices = @transform_1, window_bounds = array<i64: 32, 128>}, {transform_indices = @transform_2, window_bounds = array<i64: 1, 128>}, {transform_indices = @transform_3, window_bounds = array<i64: 128, 64>}, {transform_indices = @transform_4, window_bounds = array<i64: 64, 128>}, {transform_indices = @transform_5, window_bounds = array<i64: 1, 128>}, {transform_indices = @transform_6, window_bounds = array<i64: 128, 128>}]} {
    %c0 = arith.constant 0 : index
    %c0_0 = arith.constant 0 : index
    %0 = vector.load %arg2[%c0, %c0_0] : memref<128x32xbf16, #tpu.memory_space<vmem>>, vector<128x32xbf16>
    %c0_1 = arith.constant 0 : index
    %c0_2 = arith.constant 0 : index
    %1 = vector.load %arg3[%c0_1, %c0_2] : memref<32x128xbf16, #tpu.memory_space<vmem>>, vector<32x128xbf16>
    %cst = arith.constant dense<0.000000e+00> : vector<128x128xf32>
    %2 = tpu.matmul %0, %1, %cst {dimension_numbers = #tpu.dot_dimension_numbers<[1], [0], [0], [1], [0, 0, 1, 1], [], []>} : vector<128x32xbf16>, vector<32x128xbf16>, vector<128x128xf32> -> vector<128x128xf32>
    %c0_3 = arith.constant 0 : index
    %c0_4 = arith.constant 0 : index
    %3 = vector.load %arg4[%c0_3, %c0_4] : memref<1x128xf32, #tpu.memory_space<vmem>>, vector<1x128xf32>
    %4 = vector.broadcast %3 : vector<1x128xf32> to vector<128x128xf32>
    %5 = arith.addf %2, %4 : vector<128x128xf32>
    %c0_5 = arith.constant 0 : index
    %c0_6 = arith.constant 0 : index
    %6 = vector.load %arg5[%c0_5, %c0_6] : memref<128x64xbf16, #tpu.memory_space<vmem>>, vector<128x64xbf16>
    %c0_7 = arith.constant 0 : index
    %c0_8 = arith.constant 0 : index
    %7 = vector.load %arg6[%c0_7, %c0_8] : memref<64x128xbf16, #tpu.memory_space<vmem>>, vector<64x128xbf16>
    %cst_9 = arith.constant dense<0.000000e+00> : vector<128x128xf32>
    %8 = tpu.matmul %6, %7, %cst_9 {dimension_numbers = #tpu.dot_dimension_numbers<[1], [0], [0], [1], [0, 0, 1, 1], [], []>} : vector<128x64xbf16>, vector<64x128xbf16>, vector<128x128xf32> -> vector<128x128xf32>
    %9 = arith.addf %5, %8 : vector<128x128xf32>
    %c0_10 = arith.constant 0 : index
    %c0_11 = arith.constant 0 : index
    %10 = vector.load %arg7[%c0_10, %c0_11] : memref<1x128xf32, #tpu.memory_space<vmem>>, vector<1x128xf32>
    %11 = vector.broadcast %10 : vector<1x128xf32> to vector<128x128xf32>
    %12 = arith.addf %9, %11 : vector<128x128xf32>
    %cst_12 = arith.constant 0.000000e+00 : f32
    %13 = vector.broadcast %cst_12 : f32 to vector<128x128xf32>
    %14 = arith.cmpf oge, %12, %13 : vector<128x128xf32>
    %cst_13 = arith.constant 1.000000e-01 : f32
    %15 = vector.broadcast %cst_13 : f32 to vector<128x128xf32>
    %16 = arith.mulf %15, %12 : vector<128x128xf32>
    %17 = arith.select %14, %12, %16 : vector<128x128xi1>, vector<128x128xf32>
    %18 = arith.truncf %17 : vector<128x128xf32> to vector<128x128xbf16>
    %c0_14 = arith.constant 0 : index
    %c0_15 = arith.constant 0 : index
    %19 = vector.load %arg8[%c0_14, %c0_15] : memref<128x128xbf16, #tpu.memory_space<vmem>>, vector<128x128xbf16>
    tpu.vector_store %arg8[%c0_14, %c0_15], %18 {strides = array<i32>} : memref<128x128xbf16, #tpu.memory_space<vmem>>, vector<128x128xbf16>,
    return
  }
  func.func @transform_0(%arg0: i32, %arg1: i32) -> (i32, i32) {
    %c0_i32 = arith.constant 0 : i32
    %c0_i32_0 = arith.constant 0 : i32
    return %arg0, %c0_i32 : i32, i32
  }
  func.func @transform_1(%arg0: i32, %arg1: i32) -> (i32, i32) {
    %c0_i32 = arith.constant 0 : i32
    %c0_i32_0 = arith.constant 0 : i32
    return %c0_i32, %arg1 : i32, i32
  }
  func.func @transform_2(%arg0: i32, %arg1: i32) -> (i32, i32) {
    %c0_i32 = arith.constant 0 : i32
    %c0_i32_0 = arith.constant 0 : i32
    return %c0_i32, %arg1 : i32, i32
  }
  func.func @transform_3(%arg0: i32, %arg1: i32) -> (i32, i32) {
    %c0_i32 = arith.constant 0 : i32
    %c0_i32_0 = arith.constant 0 : i32
    return %arg0, %c0_i32 : i32, i32
  }
  func.func @transform_4(%arg0: i32, %arg1: i32) -> (i32, i32) {
    %c0_i32 = arith.constant 0 : i32
    %c0_i32_0 = arith.constant 0 : i32
    return %c0_i32, %arg1 : i32, i32
  }
  func.func @transform_5(%arg0: i32, %arg1: i32) -> (i32, i32) {
    %c0_i32 = arith.constant 0 : i32
    %c0_i32_0 = arith.constant 0 : i32
    return %c0_i32, %arg1 : i32, i32
  }
  func.func @transform_6(%arg0: i32, %arg1: i32) -> (i32, i32) {
    %c0_i32 = arith.constant 0 : i32
    return %arg0, %arg1 : i32, i32
  }
}

module attributes {stable_mosaic.version = 11 : i64} {
  func.func @_mm_bias_act_kernel(%arg0: i32, %arg1: i32, %arg2: memref<128x128xbf16, #tpu.memory_space<vmem>>, %arg3: memref<128x32xbf16, #tpu.memory_space<vmem>>, %arg4: memref<1x32xf32, #tpu.memory_space<vmem>>, %arg5: memref<128x32xbf16, #tpu.memory_space<vmem>>) attributes {dimension_semantics = [#tpu.dimension_semantics<parallel>, #tpu.dimension_semantics<parallel>], iteration_bounds = array<i64: 1, 1>, scalar_prefetch = 0 : i64, scratch_operands = 0 : i64, tpu.core_type = #tpu.core_type<tc>, window_params = [{transform_indices = @transform_0, window_bounds = array<i64: 128, 128>}, {transform_indices = @transform_1, window_bounds = array<i64: 128, 32>}, {transform_indices = @transform_2, window_bounds = array<i64: 1, 32>}, {transform_indices = @transform_3, window_bounds = array<i64: 128, 32>}]} {
    %c0 = arith.constant 0 : index
    %c0_0 = arith.constant 0 : index
    %0 = vector.load %arg2[%c0, %c0_0] : memref<128x128xbf16, #tpu.memory_space<vmem>>, vector<128x128xbf16>
    %c0_1 = arith.constant 0 : index
    %c0_2 = arith.constant 0 : index
    %1 = vector.load %arg3[%c0_1, %c0_2] : memref<128x32xbf16, #tpu.memory_space<vmem>>, vector<128x32xbf16>
    %cst = arith.constant dense<0.000000e+00> : vector<128x32xf32>
    %2 = tpu.matmul %0, %1, %cst {dimension_numbers = #tpu.dot_dimension_numbers<[1], [0], [0], [1], [0, 0, 1, 1], [], []>} : vector<128x128xbf16>, vector<128x32xbf16>, vector<128x32xf32> -> vector<128x32xf32>
    %c0_3 = arith.constant 0 : index
    %c0_4 = arith.constant 0 : index
    %3 = vector.load %arg4[%c0_3, %c0_4] : memref<1x32xf32, #tpu.memory_space<vmem>>, vector<1x32xf32>
    %4 = vector.broadcast %3 : vector<1x32xf32> to vector<128x32xf32>
    %5 = arith.addf %2, %4 : vector<128x32xf32>
    %cst_5 = arith.constant 0.000000e+00 : f32
    %6 = vector.broadcast %cst_5 : f32 to vector<128x32xf32>
    %7 = arith.cmpf oge, %5, %6 : vector<128x32xf32>
    %cst_6 = arith.constant 1.000000e-01 : f32
    %8 = vector.broadcast %cst_6 : f32 to vector<128x32xf32>
    %9 = arith.mulf %8, %5 : vector<128x32xf32>
    %10 = arith.select %7, %5, %9 : vector<128x32xi1>, vector<128x32xf32>
    %11 = arith.truncf %10 : vector<128x32xf32> to vector<128x32xbf16>
    %c0_7 = arith.constant 0 : index
    %c0_8 = arith.constant 0 : index
    %12 = vector.load %arg5[%c0_7, %c0_8] : memref<128x32xbf16, #tpu.memory_space<vmem>>, vector<128x32xbf16>
    tpu.vector_store %arg5[%c0_7, %c0_8], %11 {strides = array<i32>} : memref<128x32xbf16, #tpu.memory_space<vmem>>, vector<128x32xbf16>,
    return
  }
  func.func @transform_0(%arg0: i32, %arg1: i32) -> (i32, i32) {
    %c0_i32 = arith.constant 0 : i32
    %c0_i32_0 = arith.constant 0 : i32
    return %arg0, %c0_i32 : i32, i32
  }
  func.func @transform_1(%arg0: i32, %arg1: i32) -> (i32, i32) {
    %c0_i32 = arith.constant 0 : i32
    %c0_i32_0 = arith.constant 0 : i32
    return %c0_i32, %arg1 : i32, i32
  }
  func.func @transform_2(%arg0: i32, %arg1: i32) -> (i32, i32) {
    %c0_i32 = arith.constant 0 : i32
    %c0_i32_0 = arith.constant 0 : i32
    return %c0_i32, %arg1 : i32, i32
  }
  func.func @transform_3(%arg0: i32, %arg1: i32) -> (i32, i32) {
    %c0_i32 = arith.constant 0 : i32
    return %arg0, %arg1 : i32, i32
  }
}

module attributes {stable_mosaic.version = 11 : i64} {
  func.func @_mm_bias_res_act_kernel(%arg0: i32, %arg1: i32, %arg2: memref<128x32xbf16, #tpu.memory_space<vmem>>, %arg3: memref<32x128xbf16, #tpu.memory_space<vmem>>, %arg4: memref<1x128xf32, #tpu.memory_space<vmem>>, %arg5: memref<128x128xbf16, #tpu.memory_space<vmem>>, %arg6: memref<128x128xbf16, #tpu.memory_space<vmem>>) attributes {dimension_semantics = [#tpu.dimension_semantics<parallel>, #tpu.dimension_semantics<parallel>], iteration_bounds = array<i64: 1, 1>, scalar_prefetch = 0 : i64, scratch_operands = 0 : i64, tpu.core_type = #tpu.core_type<tc>, window_params = [{transform_indices = @transform_0, window_bounds = array<i64: 128, 32>}, {transform_indices = @transform_1, window_bounds = array<i64: 32, 128>}, {transform_indices = @transform_2, window_bounds = array<i64: 1, 128>}, {transform_indices = @transform_3, window_bounds = array<i64: 128, 128>}, {transform_indices = @transform_4, window_bounds = array<i64: 128, 128>}]} {
    %c0 = arith.constant 0 : index
    %c0_0 = arith.constant 0 : index
    %0 = vector.load %arg2[%c0, %c0_0] : memref<128x32xbf16, #tpu.memory_space<vmem>>, vector<128x32xbf16>
    %c0_1 = arith.constant 0 : index
    %c0_2 = arith.constant 0 : index
    %1 = vector.load %arg3[%c0_1, %c0_2] : memref<32x128xbf16, #tpu.memory_space<vmem>>, vector<32x128xbf16>
    %cst = arith.constant dense<0.000000e+00> : vector<128x128xf32>
    %2 = tpu.matmul %0, %1, %cst {dimension_numbers = #tpu.dot_dimension_numbers<[1], [0], [0], [1], [0, 0, 1, 1], [], []>} : vector<128x32xbf16>, vector<32x128xbf16>, vector<128x128xf32> -> vector<128x128xf32>
    %c0_3 = arith.constant 0 : index
    %c0_4 = arith.constant 0 : index
    %3 = vector.load %arg4[%c0_3, %c0_4] : memref<1x128xf32, #tpu.memory_space<vmem>>, vector<1x128xf32>
    %4 = vector.broadcast %3 : vector<1x128xf32> to vector<128x128xf32>
    %5 = arith.addf %2, %4 : vector<128x128xf32>
    %c0_5 = arith.constant 0 : index
    %c0_6 = arith.constant 0 : index
    %6 = vector.load %arg5[%c0_5, %c0_6] : memref<128x128xbf16, #tpu.memory_space<vmem>>, vector<128x128xbf16>
    %7 = arith.extf %6 : vector<128x128xbf16> to vector<128x128xf32>
    %8 = arith.addf %5, %7 : vector<128x128xf32>
    %cst_7 = arith.constant 0.000000e+00 : f32
    %9 = vector.broadcast %cst_7 : f32 to vector<128x128xf32>
    %10 = arith.cmpf oge, %8, %9 : vector<128x128xf32>
    %cst_8 = arith.constant 1.000000e-01 : f32
    %11 = vector.broadcast %cst_8 : f32 to vector<128x128xf32>
    %12 = arith.mulf %11, %8 : vector<128x128xf32>
    %13 = arith.select %10, %8, %12 : vector<128x128xi1>, vector<128x128xf32>
    %14 = arith.truncf %13 : vector<128x128xf32> to vector<128x128xbf16>
    %c0_9 = arith.constant 0 : index
    %c0_10 = arith.constant 0 : index
    %15 = vector.load %arg6[%c0_9, %c0_10] : memref<128x128xbf16, #tpu.memory_space<vmem>>, vector<128x128xbf16>
    tpu.vector_store %arg6[%c0_9, %c0_10], %14 {strides = array<i32>} : memref<128x128xbf16, #tpu.memory_space<vmem>>, vector<128x128xbf16>,
    return
  }
  func.func @transform_0(%arg0: i32, %arg1: i32) -> (i32, i32) {
    %c0_i32 = arith.constant 0 : i32
    %c0_i32_0 = arith.constant 0 : i32
    return %arg0, %c0_i32 : i32, i32
  }
  func.func @transform_1(%arg0: i32, %arg1: i32) -> (i32, i32) {
    %c0_i32 = arith.constant 0 : i32
    %c0_i32_0 = arith.constant 0 : i32
    return %c0_i32, %arg1 : i32, i32
  }
  func.func @transform_2(%arg0: i32, %arg1: i32) -> (i32, i32) {
    %c0_i32 = arith.constant 0 : i32
    %c0_i32_0 = arith.constant 0 : i32
    return %c0_i32, %arg1 : i32, i32
  }
  func.func @transform_3(%arg0: i32, %arg1: i32) -> (i32, i32) {
    %c0_i32 = arith.constant 0 : i32
    return %arg0, %arg1 : i32, i32
  }
  func.func @transform_4(%arg0: i32, %arg1: i32) -> (i32, i32) {
    %c0_i32 = arith.constant 0 : i32
    return %arg0, %arg1 : i32, i32
  }
}

module attributes {stable_mosaic.version = 11 : i64} {
  func.func @_pool_norm_kernel(%arg0: i32, %arg1: memref<1x64x128xbf16, #tpu.memory_space<vmem>>, %arg2: memref<1x1x128xf32, #tpu.memory_space<vmem>>) attributes {dimension_semantics = [#tpu.dimension_semantics<parallel>], iteration_bounds = array<i64: 2>, scalar_prefetch = 0 : i64, scratch_operands = 0 : i64, tpu.core_type = #tpu.core_type<tc>, window_params = [{transform_indices = @transform_0, window_bounds = array<i64: 1, 64, 128>}, {transform_indices = @transform_1, window_bounds = array<i64: 1, 1, 128>}]} {
    %c0 = arith.constant 0 : index
    %c0_0 = arith.constant 0 : index
    %c0_1 = arith.constant 0 : index
    %0 = vector.load %arg1[%c0, %c0_0, %c0_1] : memref<1x64x128xbf16, #tpu.memory_space<vmem>>, vector<1x64x128xbf16>
    %1 = vector.shape_cast %0 : vector<1x64x128xbf16> to vector<64x128xbf16>
    %2 = arith.extf %1 : vector<64x128xbf16> to vector<64x128xf32>
    %cst = arith.constant dense<0xFF800000> : vector<128xf32>
    %3 = vector.multi_reduction <maximumf>, %2, %cst [0] : vector<64x128xf32> to vector<128xf32>
    %4 = vector.shape_cast %3 : vector<128xf32> to vector<1x128xf32>
    %5 = arith.mulf %4, %4 : vector<1x128xf32>
    %cst_2 = arith.constant dense<0.000000e+00> : vector<1xf32>
    %6 = vector.multi_reduction <add>, %5, %cst_2 [1] : vector<1x128xf32> to vector<1xf32>
    %7 = vector.shape_cast %6 : vector<1xf32> to vector<1x1xf32>
    %8 = math.sqrt %7 : vector<1x1xf32>
    %cst_3 = arith.constant 9.99999996E-13 : f32
    %9 = vector.broadcast %cst_3 : f32 to vector<1x1xf32>
    %10 = arith.maximumf %8, %9 : vector<1x1xf32>
    %11 = vector.broadcast %10 : vector<1x1xf32> to vector<1x128xf32>
    %12 = arith.divf %4, %11 : vector<1x128xf32>
    %c0_4 = arith.constant 0 : index
    %c0_5 = arith.constant 0 : index
    %c0_6 = arith.constant 0 : index
    %13 = vector.load %arg2[%c0_4, %c0_5, %c0_6] : memref<1x1x128xf32, #tpu.memory_space<vmem>>, vector<1x1x128xf32>
    %14 = vector.shape_cast %13 : vector<1x1x128xf32> to vector<1x128xf32>
    %15 = vector.shape_cast %12 : vector<1x128xf32> to vector<1x1x128xf32>
    tpu.vector_store %arg2[%c0_4, %c0_5, %c0_6], %15 {strides = array<i32>} : memref<1x1x128xf32, #tpu.memory_space<vmem>>, vector<1x1x128xf32>,
    return
  }
  func.func @transform_0(%arg0: i32) -> (i32, i32, i32) {
    %c0_i32 = arith.constant 0 : i32
    %c0_i32_0 = arith.constant 0 : i32
    %c0_i32_1 = arith.constant 0 : i32
    return %arg0, %c0_i32, %c0_i32_0 : i32, i32, i32
  }
  func.func @transform_1(%arg0: i32) -> (i32, i32, i32) {
    %c0_i32 = arith.constant 0 : i32
    %c0_i32_0 = arith.constant 0 : i32
    %c0_i32_1 = arith.constant 0 : i32
    return %arg0, %c0_i32, %c0_i32_0 : i32, i32, i32
  }
}

module attributes {stable_mosaic.version = 11 : i64} {
  func.func @_pool_norm_kernel(%arg0: i32, %arg1: memref<1x64x128xbf16, #tpu.memory_space<vmem>>, %arg2: memref<1x1x128xf32, #tpu.memory_space<vmem>>) attributes {dimension_semantics = [#tpu.dimension_semantics<parallel>], iteration_bounds = array<i64: 2>, scalar_prefetch = 0 : i64, scratch_operands = 0 : i64, tpu.core_type = #tpu.core_type<tc>, window_params = [{transform_indices = @transform_0, window_bounds = array<i64: 1, 64, 128>}, {transform_indices = @transform_1, window_bounds = array<i64: 1, 1, 128>}]} {
    %c0 = arith.constant 0 : index
    %c0_0 = arith.constant 0 : index
    %c0_1 = arith.constant 0 : index
    %0 = vector.load %arg1[%c0, %c0_0, %c0_1] : memref<1x64x128xbf16, #tpu.memory_space<vmem>>, vector<1x64x128xbf16>
    %1 = vector.shape_cast %0 : vector<1x64x128xbf16> to vector<64x128xbf16>
    %2 = arith.extf %1 : vector<64x128xbf16> to vector<64x128xf32>
    %cst = arith.constant dense<0.000000e+00> : vector<128xf32>
    %3 = vector.multi_reduction <add>, %2, %cst [0] : vector<64x128xf32> to vector<128xf32>
    %4 = vector.shape_cast %3 : vector<128xf32> to vector<1x128xf32>
    %cst_2 = arith.constant 6.400000e+01 : f32
    %5 = vector.broadcast %cst_2 : f32 to vector<1x128xf32>
    %6 = arith.divf %4, %5 : vector<1x128xf32>
    %7 = arith.mulf %6, %6 : vector<1x128xf32>
    %cst_3 = arith.constant dense<0.000000e+00> : vector<1xf32>
    %8 = vector.multi_reduction <add>, %7, %cst_3 [1] : vector<1x128xf32> to vector<1xf32>
    %9 = vector.shape_cast %8 : vector<1xf32> to vector<1x1xf32>
    %10 = math.sqrt %9 : vector<1x1xf32>
    %cst_4 = arith.constant 9.99999996E-13 : f32
    %11 = vector.broadcast %cst_4 : f32 to vector<1x1xf32>
    %12 = arith.maximumf %10, %11 : vector<1x1xf32>
    %13 = vector.broadcast %12 : vector<1x1xf32> to vector<1x128xf32>
    %14 = arith.divf %6, %13 : vector<1x128xf32>
    %c0_5 = arith.constant 0 : index
    %c0_6 = arith.constant 0 : index
    %c0_7 = arith.constant 0 : index
    %15 = vector.load %arg2[%c0_5, %c0_6, %c0_7] : memref<1x1x128xf32, #tpu.memory_space<vmem>>, vector<1x1x128xf32>
    %16 = vector.shape_cast %15 : vector<1x1x128xf32> to vector<1x128xf32>
    %17 = vector.shape_cast %14 : vector<1x128xf32> to vector<1x1x128xf32>
    tpu.vector_store %arg2[%c0_5, %c0_6, %c0_7], %17 {strides = array<i32>} : memref<1x1x128xf32, #tpu.memory_space<vmem>>, vector<1x1x128xf32>,
    return
  }
  func.func @transform_0(%arg0: i32) -> (i32, i32, i32) {
    %c0_i32 = arith.constant 0 : i32
    %c0_i32_0 = arith.constant 0 : i32
    %c0_i32_1 = arith.constant 0 : i32
    return %arg0, %c0_i32, %c0_i32_0 : i32, i32, i32
  }
  func.func @transform_1(%arg0: i32) -> (i32, i32, i32) {
    %c0_i32 = arith.constant 0 : i32
    %c0_i32_0 = arith.constant 0 : i32
    %c0_i32_1 = arith.constant 0 : i32
    return %arg0, %c0_i32, %c0_i32_0 : i32, i32, i32
  }
}

module attributes {stable_mosaic.version = 11 : i64} {
  func.func @_pool_norm_kernel(%arg0: i32, %arg1: memref<1x64x128xf32, #tpu.memory_space<vmem>>, %arg2: memref<1x1x128xf32, #tpu.memory_space<vmem>>) attributes {dimension_semantics = [#tpu.dimension_semantics<parallel>], iteration_bounds = array<i64: 2>, scalar_prefetch = 0 : i64, scratch_operands = 0 : i64, tpu.core_type = #tpu.core_type<tc>, window_params = [{transform_indices = @transform_0, window_bounds = array<i64: 1, 64, 128>}, {transform_indices = @transform_1, window_bounds = array<i64: 1, 1, 128>}]} {
    %c0 = arith.constant 0 : index
    %c0_0 = arith.constant 0 : index
    %c0_1 = arith.constant 0 : index
    %0 = vector.load %arg1[%c0, %c0_0, %c0_1] : memref<1x64x128xf32, #tpu.memory_space<vmem>>, vector<1x64x128xf32>
    %1 = vector.shape_cast %0 : vector<1x64x128xf32> to vector<64x128xf32>
    %cst = arith.constant dense<0xFF800000> : vector<128xf32>
    %2 = vector.multi_reduction <maximumf>, %1, %cst [0] : vector<64x128xf32> to vector<128xf32>
    %3 = vector.shape_cast %2 : vector<128xf32> to vector<1x128xf32>
    %cst_2 = arith.constant dense<0.000000e+00> : vector<128xf32>
    %4 = vector.multi_reduction <add>, %1, %cst_2 [0] : vector<64x128xf32> to vector<128xf32>
    %5 = vector.shape_cast %4 : vector<128xf32> to vector<1x128xf32>
    %cst_3 = arith.constant 6.400000e+01 : f32
    %6 = vector.broadcast %cst_3 : f32 to vector<1x128xf32>
    %7 = arith.divf %5, %6 : vector<1x128xf32>
    %8 = arith.addf %3, %7 : vector<1x128xf32>
    %9 = arith.mulf %8, %8 : vector<1x128xf32>
    %cst_4 = arith.constant dense<0.000000e+00> : vector<1xf32>
    %10 = vector.multi_reduction <add>, %9, %cst_4 [1] : vector<1x128xf32> to vector<1xf32>
    %11 = vector.shape_cast %10 : vector<1xf32> to vector<1x1xf32>
    %12 = math.sqrt %11 : vector<1x1xf32>
    %cst_5 = arith.constant 9.99999996E-13 : f32
    %13 = vector.broadcast %cst_5 : f32 to vector<1x1xf32>
    %14 = arith.maximumf %12, %13 : vector<1x1xf32>
    %15 = vector.broadcast %14 : vector<1x1xf32> to vector<1x128xf32>
    %16 = arith.divf %8, %15 : vector<1x128xf32>
    %c0_6 = arith.constant 0 : index
    %c0_7 = arith.constant 0 : index
    %c0_8 = arith.constant 0 : index
    %17 = vector.load %arg2[%c0_6, %c0_7, %c0_8] : memref<1x1x128xf32, #tpu.memory_space<vmem>>, vector<1x1x128xf32>
    %18 = vector.shape_cast %17 : vector<1x1x128xf32> to vector<1x128xf32>
    %19 = vector.shape_cast %16 : vector<1x128xf32> to vector<1x1x128xf32>
    tpu.vector_store %arg2[%c0_6, %c0_7, %c0_8], %19 {strides = array<i32>} : memref<1x1x128xf32, #tpu.memory_space<vmem>>, vector<1x1x128xf32>,
    return
  }
  func.func @transform_0(%arg0: i32) -> (i32, i32, i32) {
    %c0_i32 = arith.constant 0 : i32
    %c0_i32_0 = arith.constant 0 : i32
    %c0_i32_1 = arith.constant 0 : i32
    return %arg0, %c0_i32, %c0_i32_0 : i32, i32, i32
  }
  func.func @transform_1(%arg0: i32) -> (i32, i32, i32) {
    %c0_i32 = arith.constant 0 : i32
    %c0_i32_0 = arith.constant 0 : i32
    %c0_i32_1 = arith.constant 0 : i32
    return %arg0, %c0_i32, %c0_i32_0 : i32, i32, i32
  }
}

module attributes {stable_mosaic.version = 11 : i64} {
  func.func @_head_kernel(%arg0: i32, %arg1: memref<2x128xf32, #tpu.memory_space<vmem>>, %arg2: memref<2x128xf32, #tpu.memory_space<vmem>>, %arg3: memref<2x128xf32, #tpu.memory_space<vmem>>, %arg4: memref<1x128xf32, #tpu.memory_space<vmem>>, %arg5: memref<1x128xf32, #tpu.memory_space<vmem>>, %arg6: memref<1x128xf32, #tpu.memory_space<vmem>>, %arg7: memref<1x128xf32, #tpu.memory_space<vmem>>, %arg8: memref<1x128xf32, #tpu.memory_space<vmem>>, %arg9: memref<1x128xf32, #tpu.memory_space<vmem>>, %arg10: memref<2x256xf32, #tpu.memory_space<vmem>>) attributes {dimension_semantics = [#tpu.dimension_semantics<arbitrary>], iteration_bounds = array<i64: 1>, scalar_prefetch = 0 : i64, scratch_operands = 0 : i64, tpu.core_type = #tpu.core_type<tc>, window_params = [{pipeline_mode = #tpu.pipeline_mode<synchronous>, transform_indices = @transform_0, window_bounds = array<i64: 2, 128>}, {pipeline_mode = #tpu.pipeline_mode<synchronous>, transform_indices = @transform_1, window_bounds = array<i64: 2, 128>}, {pipeline_mode = #tpu.pipeline_mode<synchronous>, transform_indices = @transform_2, window_bounds = array<i64: 2, 128>}, {pipeline_mode = #tpu.pipeline_mode<synchronous>, transform_indices = @transform_3, window_bounds = array<i64: 1, 128>}, {pipeline_mode = #tpu.pipeline_mode<synchronous>, transform_indices = @transform_4, window_bounds = array<i64: 1, 128>}, {pipeline_mode = #tpu.pipeline_mode<synchronous>, transform_indices = @transform_5, window_bounds = array<i64: 1, 128>}, {pipeline_mode = #tpu.pipeline_mode<synchronous>, transform_indices = @transform_6, window_bounds = array<i64: 1, 128>}, {pipeline_mode = #tpu.pipeline_mode<synchronous>, transform_indices = @transform_7, window_bounds = array<i64: 1, 128>}, {pipeline_mode = #tpu.pipeline_mode<synchronous>, transform_indices = @transform_8, window_bounds = array<i64: 1, 128>}, {pipeline_mode = #tpu.pipeline_mode<synchronous>, transform_indices = @transform_9, window_bounds = array<i64: 2, 256>}]} {
    %c0 = arith.constant 0 : index
    %c0_0 = arith.constant 0 : index
    %0 = vector.load %arg1[%c0, %c0_0] : memref<2x128xf32, #tpu.memory_space<vmem>>, vector<2x128xf32>
    %c0_1 = arith.constant 0 : index
    %c0_2 = arith.constant 0 : index
    %1 = vector.load %arg4[%c0_1, %c0_2] : memref<1x128xf32, #tpu.memory_space<vmem>>, vector<1x128xf32>
    %2 = vector.broadcast %1 : vector<1x128xf32> to vector<2x128xf32>
    %3 = arith.mulf %0, %2 : vector<2x128xf32>
    %c0_3 = arith.constant 0 : index
    %c0_4 = arith.constant 0 : index
    %4 = vector.load %arg5[%c0_3, %c0_4] : memref<1x128xf32, #tpu.memory_space<vmem>>, vector<1x128xf32>
    %5 = vector.broadcast %4 : vector<1x128xf32> to vector<2x128xf32>
    %6 = arith.addf %3, %5 : vector<2x128xf32>
    %c0_5 = arith.constant 0 : index
    %c0_6 = arith.constant 0 : index
    %7 = vector.load %arg2[%c0_5, %c0_6] : memref<2x128xf32, #tpu.memory_space<vmem>>, vector<2x128xf32>
    %c0_7 = arith.constant 0 : index
    %c0_8 = arith.constant 0 : index
    %8 = vector.load %arg6[%c0_7, %c0_8] : memref<1x128xf32, #tpu.memory_space<vmem>>, vector<1x128xf32>
    %9 = vector.broadcast %8 : vector<1x128xf32> to vector<2x128xf32>
    %10 = arith.mulf %7, %9 : vector<2x128xf32>
    %c0_9 = arith.constant 0 : index
    %c0_10 = arith.constant 0 : index
    %11 = vector.load %arg7[%c0_9, %c0_10] : memref<1x128xf32, #tpu.memory_space<vmem>>, vector<1x128xf32>
    %12 = vector.broadcast %11 : vector<1x128xf32> to vector<2x128xf32>
    %13 = arith.addf %10, %12 : vector<2x128xf32>
    %c0_11 = arith.constant 0 : index
    %c0_12 = arith.constant 0 : index
    %14 = vector.load %arg3[%c0_11, %c0_12] : memref<2x128xf32, #tpu.memory_space<vmem>>, vector<2x128xf32>
    %c0_13 = arith.constant 0 : index
    %c0_14 = arith.constant 0 : index
    %15 = vector.load %arg8[%c0_13, %c0_14] : memref<1x128xf32, #tpu.memory_space<vmem>>, vector<1x128xf32>
    %16 = vector.broadcast %15 : vector<1x128xf32> to vector<2x128xf32>
    %17 = arith.mulf %14, %16 : vector<2x128xf32>
    %c0_15 = arith.constant 0 : index
    %c0_16 = arith.constant 0 : index
    %18 = vector.load %arg9[%c0_15, %c0_16] : memref<1x128xf32, #tpu.memory_space<vmem>>, vector<1x128xf32>
    %19 = vector.broadcast %18 : vector<1x128xf32> to vector<2x128xf32>
    %20 = arith.addf %17, %19 : vector<2x128xf32>
    %21 = arith.addf %6, %13 : vector<2x128xf32>
    %c0_17 = arith.constant 0 : index
    %c0_18 = arith.constant 0 : index
    %22 = vector.load %arg10[%c0_17, %c0_18] : memref<2x256xf32, #tpu.memory_space<vmem>>, vector<2x128xf32>
    tpu.vector_store %arg10[%c0_17, %c0_18], %21 {strides = array<i32>} : memref<2x256xf32, #tpu.memory_space<vmem>>, vector<2x128xf32>,
    %c0_19 = arith.constant 0 : index
    %c128 = arith.constant 128 : index
    %23 = vector.load %arg10[%c0_19, %c128] : memref<2x256xf32, #tpu.memory_space<vmem>>, vector<2x128xf32>
    tpu.vector_store %arg10[%c0_19, %c128], %20 {strides = array<i32>} : memref<2x256xf32, #tpu.memory_space<vmem>>, vector<2x128xf32>,
    return
  }
  func.func @transform_0(%arg0: i32) -> (i32, i32) {
    %c0_i32 = arith.constant 0 : i32
    %c0_i32_0 = arith.constant 0 : i32
    %c0_i32_1 = arith.constant 0 : i32
    return %c0_i32, %c0_i32_0 : i32, i32
  }
  func.func @transform_1(%arg0: i32) -> (i32, i32) {
    %c0_i32 = arith.constant 0 : i32
    %c0_i32_0 = arith.constant 0 : i32
    %c0_i32_1 = arith.constant 0 : i32
    return %c0_i32, %c0_i32_0 : i32, i32
  }
  func.func @transform_2(%arg0: i32) -> (i32, i32) {
    %c0_i32 = arith.constant 0 : i32
    %c0_i32_0 = arith.constant 0 : i32
    %c0_i32_1 = arith.constant 0 : i32
    return %c0_i32, %c0_i32_0 : i32, i32
  }
  func.func @transform_3(%arg0: i32) -> (i32, i32) {
    %c0_i32 = arith.constant 0 : i32
    %c0_i32_0 = arith.constant 0 : i32
    %c0_i32_1 = arith.constant 0 : i32
    return %c0_i32, %c0_i32_0 : i32, i32
  }
  func.func @transform_4(%arg0: i32) -> (i32, i32) {
    %c0_i32 = arith.constant 0 : i32
    %c0_i32_0 = arith.constant 0 : i32
    %c0_i32_1 = arith.constant 0 : i32
    return %c0_i32, %c0_i32_0 : i32, i32
  }
  func.func @transform_5(%arg0: i32) -> (i32, i32) {
    %c0_i32 = arith.constant 0 : i32
    %c0_i32_0 = arith.constant 0 : i32
    %c0_i32_1 = arith.constant 0 : i32
    return %c0_i32, %c0_i32_0 : i32, i32
  }
  func.func @transform_6(%arg0: i32) -> (i32, i32) {
    %c0_i32 = arith.constant 0 : i32
    %c0_i32_0 = arith.constant 0 : i32
    %c0_i32_1 = arith.constant 0 : i32
    return %c0_i32, %c0_i32_0 : i32, i32
  }
  func.func @transform_7(%arg0: i32) -> (i32, i32) {
    %c0_i32 = arith.constant 0 : i32
    %c0_i32_0 = arith.constant 0 : i32
    %c0_i32_1 = arith.constant 0 : i32
    return %c0_i32, %c0_i32_0 : i32, i32
  }
  func.func @transform_8(%arg0: i32) -> (i32, i32) {
    %c0_i32 = arith.constant 0 : i32
    %c0_i32_0 = arith.constant 0 : i32
    %c0_i32_1 = arith.constant 0 : i32
    return %c0_i32, %c0_i32_0 : i32, i32
  }
  func.func @transform_9(%arg0: i32) -> (i32, i32) {
    %c0_i32 = arith.constant 0 : i32
    %c0_i32_0 = arith.constant 0 : i32
    %c0_i32_1 = arith.constant 0 : i32
    return %c0_i32, %c0_i32_0 : i32, i32
  }
}

</mosaic_0001>

<bundles_post_ra>
// kernel: baseline_forward.24
= control target key start
LH: loop header
LB: loop body
LE: loop exit
PB: predicated region body
PF: predicated region fallthrough
CT: control target
= control target key end

     0   :  { %vm110_vm0 = vcmask 523264   ;;  %vm344_vm1 = vcmask 257024   ;;  %s623_s1 = inlined_call_operand.vmem [shape: bf16[64,32], index: 1, kind: input, shape index: {}]   ;;  %s624_s0 = inlined_call_operand.vmem [shape: bf16[128,64], index: 0, kind: input, shape index: {}]   ;;  %s625_s2 = inlined_call_operand.vmem [shape: f32[1,32], index: 2, kind: input, shape index: {}]   ;;  %s626_s3 = inlined_call_operand.vmem [shape: bf16[128,32], index: 3, kind: output, shape index: {}]  }
   0x1   :  { %v462_v0 = vld [vmem:[%s623_s1] sm:$0xff]   ;;  %v463_v1 = vld [vmem:[%s623_s1 + $0x8] sm:$0xff]   ;;  %v464_v2 = vld [vmem:[%s623_s1 + $0x10] sm:$0xff]  }
   0x2   :  { %430 = vmatprep.subr.bf16.mxu0 %v462_v0  ;;  %454 = vmatprep.subr.bf16.mxu1 %v462_v0  ;;  %v466_v3 = vld [vmem:[%s624_s0] sm:$0xff]   ;;  %v465_v5 = vld [vmem:[%s623_s1 + $0x18] sm:$0xff]   ;;  %v468_v6 = vld [vmem:[%s624_s0 + $0x8] sm:$0xff]  }
   0x3   :  { %431 = vmatpush3.bf16.msra.mxu0 %v462_v0  ;;  %458 = vmatpush3.bf16.msra.mxu1 %v462_v0  ;;  %v467_v4 = vld [vmem:[%s624_s0 + $0x20] sm:$0xff]   ;;  %v469_v7 = vld [vmem:[%s624_s0 + $0x28] sm:$0xff]   ;;  %v470_v8 = vld [vmem:[%s624_s0 + $0x10] sm:$0xff]  }
   0x4   :  { %432 = vmatprep.subr.bf16.mxu0 %v463_v1  ;;  %455 = vmatprep.subr.bf16.mxu1 %v463_v1  ;;  %v471_v9 = vld [vmem:[%s624_s0 + $0x30] sm:$0xff]   ;;  %v472_v10 = vld [vmem:[%s624_s0 + $0x18] sm:$0xff]   ;;  %v541_v12 = vld [vmem:[%s625_s2] ss:$0 sm:$0xff] }
   0x5   :  { %438 = vmatprep.mubr.msk.bf16.mxu0 %vm110_vm0, %v466_v3  ;;  %446 = vmatprep.mubr.msk.bf16.mxu1 %vm110_vm0, %v467_v4  ;;  %v473_v11 = vld [vmem:[%s624_s0 + $0x38] sm:$0xff]  }
   0x7   :  { %433 = vmatpush3.bf16.msra.mxu0 %v463_v1  ;;  %459 = vmatpush3.bf16.msra.mxu1 %v463_v1 }
   0x8   :  { %434 = vmatprep.subr.bf16.mxu0 %v464_v2  ;;  %456 = vmatprep.subr.bf16.mxu1 %v464_v2 }
   0xb   :  { %435 = vmatpush3.bf16.msra.mxu0 %v464_v2  ;;  %460 = vmatpush3.bf16.msra.mxu1 %v464_v2 }
   0xc   :  { %436 = vmatprep.subr.bf16.mxu0 %v465_v5  ;;  %457 = vmatprep.subr.bf16.mxu1 %v465_v5 }
   0xf   :  { %437 = vmatpush3.bf16.msra.mxu0 %v465_v5  ;;  %461 = vmatpush3.bf16.msra.mxu1 %v465_v5 }
  0x12   :  { %439 = vmatmul.mubr.msk.bf16.vlgmr.msra.gmra.mrb[0].mxu0 %vm110_vm0, %v468_v6  ;;  %447 = vmatmul.mubr.msk.bf16.vlgmr.msra.gmra.mrb[0].mxu1 %vm110_vm0, %v469_v7 }
  0x13   :  { %442 = vmatprep.mubr.msk.bf16.mxu0 %vm110_vm0, %v470_v8  ;;  %450 = vmatprep.mubr.msk.bf16.mxu1 %vm110_vm0, %v471_v9 }
  0x1a   :  { %443 = vmatmul.mubr.msk.bf16.gmra.mrb[4].mxu0 %vm110_vm0, %v472_v10  ;;  %451 = vmatmul.mubr.msk.bf16.gmra.mrb[4].mxu1 %vm110_vm0, %v473_v11 }
  0xe5   :  { %v440_v13 = vpop.f32.mrb[0].mxu0  ;;  %v448_v14 = vpop.f32.mrb[0].mxu1 }
  0xe6   :  { %v178_v15 = vadd.f32 %v440_v13, %v541_v12  ;;  %v210_v16 = vadd.f32 %v448_v14, %v541_v12  ;;  %v169_v17 = vpop.f32.mrb[1].mxu0  ;;  %v201_v18 = vpop.f32.mrb[1].mxu1 }
  0xe7   :  { %v170_v19 = vadd.f32 %v541_v12, %v169_v17  ;;  %v202_v20 = vadd.f32 %v541_v12, %v201_v18  ;;  %v441_v21 = vpop.f32.mrb[2].mxu0  ;;  %v449_v22 = vpop.f32.mrb[2].mxu1 }
  0xe8   :  { %vm234_vm2 = vcmp.ge.f32.partialorder %v178_v15, 0.0  ;;  %v250_v23 = vmul.f32 0.1, %v178_v15  ;;  %vm242_vm3 = vcmp.ge.f32.partialorder %v210_v16, 0.0  ;;  %v258_v24 = vmul.f32 0.1, %v210_v16 }
  0xe9   :  { %vm232_vm4 = vcmp.ge.f32.partialorder %v170_v19, 0.0  ;;  %v248_v25 = vmul.f32 0.1, %v170_v19  ;;  %vm240_vm5 = vcmp.ge.f32.partialorder %v202_v20, 0.0  ;;  %v256_v26 = vmul.f32 0.1, %v202_v20 }
  0xea   :  { %v266_v27 = vsel %vm234_vm2, %v178_v15, %v250_v23  ;;  %v274_v28 = vsel %vm242_vm3, %v210_v16, %v258_v24  ;;  %v181_v29 = vadd.f32 %v441_v21, %v541_v12  ;;  %v213_v30 = vadd.f32 %v449_v22, %v541_v12  ;;  %v172_v31 = vpop.f32.mrb[3].mxu0  ;;  %v204_v32 = vpop.f32.mrb[3].mxu1 }
  0xeb   :  { %v404_v33 = vpack.c.bf16 %v266_v27, %v266_v27  ;;  %v412_v34 = vpack.c.bf16 %v274_v28, %v274_v28  ;;  %v264_v35 = vsel %vm232_vm4, %v170_v19, %v248_v25  ;;  %v272_v36 = vsel %vm240_vm5, %v202_v20, %v256_v26 }
  0xec   :  { %v402_v37 = vpack.c.bf16 %v264_v35, %v264_v35  ;;  %v410_v38 = vpack.c.bf16 %v272_v36, %v272_v36  ;;  %vm235_vm6 = vcmp.ge.f32.partialorder %v181_v29, 0.0  ;;  %v251_v39 = vmul.f32 0.1, %v181_v29 }
  0xed   :  { %347 = vst.msk [vmem:[%s626_s3 + $0x8] sm:$0xf] %vm344_vm1, %v404_v33  ;;  %355 = vst.msk [vmem:[%s626_s3 + $0x28] sm:$0xf] %vm344_vm1, %v412_v34  ;;  %vm243_vm7 = vcmp.ge.f32.partialorder %v213_v30, 0.0  ;;  %v173_v41 = vadd.f32 %v541_v12, %v172_v31  ;;  %v205_v42 = vadd.f32 %v541_v12, %v204_v32  ;;  %v444_v43 = vpop.f32.mrb[4].mxu0 }
  0xee   :  { %v259_v40 = vmul.f32 0.1, %v213_v30  ;;  %v452_v44 = vpop.f32.mrb[4].mxu1  ;;  %345 = vst.msk [vmem:[%s626_s3] sm:$0xf] %vm344_vm1, %v402_v37  ;;  %v267_v45 = vsel %vm235_vm6, %v181_v29, %v251_v39  ;;  %v194_v46 = vadd.f32 %v444_v43, %v541_v12  ;;  %v185_v48 = vpop.f32.mrb[5].mxu0 }
  0xef   :  { %353 = vst.msk [vmem:[%s626_s3 + $0x20] sm:$0xf] %vm344_vm1, %v410_v38  ;;  %v226_v47 = vadd.f32 %v452_v44, %v541_v12  ;;  %v217_v49 = vpop.f32.mrb[5].mxu1  ;;  %v405_v50 = vpack.c.bf16 %v267_v45, %v267_v45  ;;  %vm233_vm8 = vcmp.ge.f32.partialorder %v173_v41, 0.0  ;;  %v249_v52 = vmul.f32 0.1, %v173_v41 }
  0xf0   :  { %v275_v51 = vsel %vm243_vm7, %v213_v30, %v259_v40  ;;  %v445_v53 = vpop.f32.mrb[6].mxu0  ;;  %v453_v54 = vpop.f32.mrb[6].mxu1  ;;  %vm241_vm9 = vcmp.ge.f32.partialorder %v205_v42, 0.0  ;;  %v257_v56 = vmul.f32 0.1, %v205_v42  ;;  %vm238_vm10 = vcmp.ge.f32.partialorder %v194_v46, 0.0 }
  0xf1   :  { %v413_v55 = vpack.c.bf16 %v275_v51, %v275_v51  ;;  %v188_v57 = vpop.f32.mrb[7].mxu0  ;;  %v220_v58 = vpop.f32.mrb[7].mxu1  ;;  %348 = vst.msk [vmem:[%s626_s3 + $0xc] sm:$0xf] %vm344_vm1, %v405_v50  ;;  %v265_v59 = vsel %vm233_vm8, %v173_v41, %v249_v52  ;;  %v254_v60 = vmul.f32 0.1, %v194_v46  ;;  %v186_v0 = vadd.f32 %v541_v12, %v185_v48 }
  0xf2   :  { %vm246_vm11 = vcmp.ge.f32.partialorder %v226_v47, 0.0  ;;  %v262_v61 = vmul.f32 0.1, %v226_v47  ;;  %v403_v62 = vpack.c.bf16 %v265_v59, %v265_v59  ;;  %v273_v63 = vsel %vm241_vm9, %v205_v42, %v257_v56 }
  0xf3   :  { %356 = vst.msk [vmem:[%s626_s3 + $0x2c] sm:$0xf] %vm344_vm1, %v413_v55  ;;  %v218_v1 = vadd.f32 %v541_v12, %v217_v49  ;;  %v411_v2 = vpack.c.bf16 %v273_v63, %v273_v63  ;;  %v270_v3 = vsel %vm238_vm10, %v194_v46, %v254_v60  ;;  %v197_v5 = vadd.f32 %v445_v53, %v541_v12 }
  0xf4   :  { %v278_v4 = vsel %vm246_vm11, %v226_v47, %v262_v61  ;;  %346 = vst.msk [vmem:[%s626_s3 + $0x4] sm:$0xf] %vm344_vm1, %v403_v62  ;;  %v408_v6 = vpack.c.bf16 %v270_v3, %v270_v3  ;;  %vm236_vm12 = vcmp.ge.f32.partialorder %v186_v0, 0.0  ;;  %v252_v8 = vmul.f32 0.1, %v186_v0 }
  0xf5   :  { %v416_v7 = vpack.c.bf16 %v278_v4, %v278_v4  ;;  %354 = vst.msk [vmem:[%s626_s3 + $0x24] sm:$0xf] %vm344_vm1, %v411_v2  ;;  %vm244_vm13 = vcmp.ge.f32.partialorder %v218_v1, 0.0  ;;  %v260_v9 = vmul.f32 0.1, %v218_v1  ;;  %vm239_vm14 = vcmp.ge.f32.partialorder %v197_v5, 0.0 }
  0xf6   :  { %v255_v10 = vmul.f32 0.1, %v197_v5  ;;  %351 = vst.msk [vmem:[%s626_s3 + $0x18] sm:$0xf] %vm344_vm1, %v408_v6  ;;  %v268_v11 = vsel %vm236_vm12, %v186_v0, %v252_v8  ;;  %v229_v13 = vadd.f32 %v453_v54, %v541_v12  ;;  %v189_v14 = vadd.f32 %v541_v12, %v188_v57 }
  0xf7   :  { %359 = vst.msk [vmem:[%s626_s3 + $0x38] sm:$0xf] %vm344_vm1, %v416_v7  ;;  %v221_v15 = vadd.f32 %v541_v12, %v220_v58  ;;  %v406_v16 = vpack.c.bf16 %v268_v11, %v268_v11  ;;  %v276_v17 = vsel %vm244_vm13, %v218_v1, %v260_v9 }
  0xf8   :  { %v271_v18 = vsel %vm239_vm14, %v197_v5, %v255_v10  ;;  %v414_v19 = vpack.c.bf16 %v276_v17, %v276_v17  ;;  %vm247_vm15 = vcmp.ge.f32.partialorder %v229_v13, 0.0  ;;  %v263_v21 = vmul.f32 0.1, %v229_v13 }
  0xf9   :  { %v409_v20 = vpack.c.bf16 %v271_v18, %v271_v18  ;;  %349 = vst.msk [vmem:[%s626_s3 + $0x10] sm:$0xf] %vm344_vm1, %v406_v16  ;;  %vm237_vm0 = vcmp.ge.f32.partialorder %v189_v14, 0.0  ;;  %v253_v22 = vmul.f32 0.1, %v189_v14  ;;  %vm245_vm2 = vcmp.ge.f32.partialorder %v221_v15, 0.0 }
  0xfa   :  { %v261_v23 = vmul.f32 0.1, %v221_v15  ;;  %357 = vst.msk [vmem:[%s626_s3 + $0x30] sm:$0xf] %vm344_vm1, %v414_v19  ;;  %v279_v12 = vsel %vm247_vm15, %v229_v13, %v263_v21 }
  0xfb   :  { %352 = vst.msk [vmem:[%s626_s3 + $0x1c] sm:$0xf] %vm344_vm1, %v409_v20  ;;  %v417_v24 = vpack.c.bf16 %v279_v12, %v279_v12  ;;  %v269_v25 = vsel %vm237_vm0, %v189_v14, %v253_v22 }
  0xfc   :  { %v277_v26 = vsel %vm245_vm2, %v221_v15, %v261_v23  ;;  %v407_v27 = vpack.c.bf16 %v269_v25, %v269_v25 }
  0xfd   :  { %v415_v28 = vpack.c.bf16 %v277_v26, %v277_v26  ;;  %360 = vst.msk [vmem:[%s626_s3 + $0x3c] sm:$0xf] %vm344_vm1, %v417_v24 }
  0xfe   :  { %350 = vst.msk [vmem:[%s626_s3 + $0x14] sm:$0xf] %vm344_vm1, %v407_v27 }
  0xff   :  { %358 = vst.msk [vmem:[%s626_s3 + $0x34] sm:$0xf] %vm344_vm1, %v415_v28 }

// kernel: baseline_forward.23
= control target key start
LH: loop header
LB: loop body
LE: loop exit
PB: predicated region body
PF: predicated region fallthrough
CT: control target
= control target key end

     0   :  { %vm130_vm0 = vcmask 523264   ;;  %vm501_vm1 = vcmask 519168   ;;  %s883_s3 = inlined_call_operand.vmem [shape: bf16[64,64], index: 3, kind: input, shape index: {}]   ;;  %s884_s2 = inlined_call_operand.vmem [shape: bf16[64,64], index: 2, kind: input, shape index: {}]   ;;  %s885_s1 = inlined_call_operand.vmem [shape: bf16[128,64], index: 1, kind: input, shape index: {}]   ;;  %s886_s0 = inlined_call_operand.vmem [shape: bf16[128,64], index: 0, kind: input, shape index: {}]   ;;  %s887_s4 = inlined_call_operand.vmem [shape: bf16[128,64], index: 4, kind: output, shape index: {}]  }
   0x1   :  { %v682_v0 = vld [vmem:[%s883_s3] sm:$0xff]   ;;  %v684_v2 = vld [vmem:[%s883_s3 + $0x8] sm:$0xff]   ;;  %v686_v4 = vld [vmem:[%s883_s3 + $0x10] sm:$0xff]  }
   0x2   :  { %v683_v1 = vld [vmem:[%s884_s2] sm:$0xff]   ;;  %618 = vmatprep.subr.bf16.mxu1 %v682_v0  ;;  %v685_v3 = vld [vmem:[%s884_s2 + $0x8] sm:$0xff]   ;;  %v687_v5 = vld [vmem:[%s884_s2 + $0x10] sm:$0xff]  }
   0x3   :  { %642 = vmatprep.subr.bf16.mxu0 %v683_v1  ;;  %619 = vmatpush3.bf16.msra.mxu1 %v682_v0  ;;  %v688_v6 = vld [vmem:[%s883_s3 + $0x18] sm:$0xff]   ;;  %v690_v8 = vld [vmem:[%s885_s1] sm:$0xff]   ;;  %v692_v10 = vld [vmem:[%s885_s1 + $0x8] sm:$0xff]  }
   0x4   :  { %643 = vmatpush3.bf16.msra.mxu0 %v683_v1  ;;  %620 = vmatprep.subr.bf16.mxu1 %v684_v2  ;;  %v689_v7 = vld [vmem:[%s884_s2 + $0x18] sm:$0xff]   ;;  %v691_v9 = vld [vmem:[%s886_s0] sm:$0xff]   ;;  %v693_v11 = vld [vmem:[%s886_s0 + $0x8] sm:$0xff]  }
   0x5   :  { %644 = vmatprep.subr.bf16.mxu0 %v685_v3  ;;  %626 = vmatprep.mubr.msk.bf16.mxu1 %vm130_vm0, %v690_v8  ;;  %v694_v12 = vld [vmem:[%s885_s1 + $0x10] sm:$0xff]   ;;  %v696_v14 = vld [vmem:[%s885_s1 + $0x18] sm:$0xff]   ;;  %v698_v16 = vld [vmem:[%s885_s1 + $0x20] sm:$0xff]  }
   0x6   :  { %650 = vmatprep.mubr.msk.bf16.mxu0 %vm130_vm0, %v691_v9  ;;  %v695_v13 = vld [vmem:[%s886_s0 + $0x10] sm:$0xff]   ;;  %v697_v15 = vld [vmem:[%s886_s0 + $0x18] sm:$0xff]   ;;  %v699_v17 = vld [vmem:[%s886_s0 + $0x20] sm:$0xff]  }
   0x7   :  { %621 = vmatpush3.bf16.msra.mxu1 %v684_v2  ;;  %v700_v18 = vld [vmem:[%s885_s1 + $0x28] sm:$0xff]   ;;  %v702_v20 = vld [vmem:[%s885_s1 + $0x30] sm:$0xff]   ;;  %v704_v22 = vld [vmem:[%s885_s1 + $0x38] sm:$0xff]  }
   0x8   :  { %645 = vmatpush3.bf16.msra.mxu0 %v685_v3  ;;  %622 = vmatprep.subr.bf16.mxu1 %v686_v4  ;;  %v701_v19 = vld [vmem:[%s886_s0 + $0x28] sm:$0xff]   ;;  %v703_v21 = vld [vmem:[%s886_s0 + $0x30] sm:$0xff]   ;;  %v705_v23 = vld [vmem:[%s886_s0 + $0x38] sm:$0xff]  }
   0x9   :  { %646 = vmatprep.subr.bf16.mxu0 %v687_v5 }
   0xb   :  { %623 = vmatpush3.bf16.msra.mxu1 %v686_v4 }
   0xc   :  { %647 = vmatpush3.bf16.msra.mxu0 %v687_v5  ;;  %624 = vmatprep.subr.bf16.mxu1 %v688_v6 }
   0xd   :  { %648 = vmatprep.subr.bf16.mxu0 %v689_v7 }
   0xf   :  { %625 = vmatpush3.bf16.msra.mxu1 %v688_v6 }
  0x10   :  { %649 = vmatpush3.bf16.msra.mxu0 %v689_v7 }
  0x12   :  { %627 = vmatmul.mubr.msk.bf16.vlgmr.msra.gmra.mrb[0].mxu1 %vm130_vm0, %v692_v10 }
  0x13   :  { %651 = vmatmul.mubr.msk.bf16.vlgmr.msra.gmra.mrb[0].mxu0 %vm130_vm0, %v693_v11  ;;  %630 = vmatprep.mubr.msk.bf16.mxu1 %vm130_vm0, %v694_v12 }
  0x14   :  { %654 = vmatprep.mubr.msk.bf16.mxu0 %vm130_vm0, %v695_v13 }
  0x1a   :  { %631 = vmatmul.mubr.msk.bf16.gmra.mrb[4].mxu1 %vm130_vm0, %v696_v14 }
  0x1b   :  { %655 = vmatmul.mubr.msk.bf16.gmra.mrb[4].mxu0 %vm130_vm0, %v697_v15  ;;  %634 = vmatprep.mubr.msk.bf16.mxu1 %vm130_vm0, %v698_v16 }
  0x1c   :  { %658 = vmatprep.mubr.msk.bf16.mxu0 %vm130_vm0, %v699_v17 }
  0x22   :  { %635 = vmatmul.mubr.msk.bf16.gmra.mrb[8].mxu1 %vm130_vm0, %v700_v18 }
  0x23   :  { %659 = vmatmul.mubr.msk.bf16.gmra.mrb[8].mxu0 %vm130_vm0, %v701_v19  ;;  %638 = vmatprep.mubr.msk.bf16.mxu1 %vm130_vm0, %v702_v20 }
  0x24   :  { %662 = vmatprep.mubr.msk.bf16.mxu0 %vm130_vm0, %v703_v21 }
  0x2a   :  { %639 = vmatmul.mubr.msk.bf16.gmra.mrb[12].mxu1 %vm130_vm0, %v704_v22 }
  0x2b   :  { %663 = vmatmul.mubr.msk.bf16.gmra.mrb[12].mxu0 %vm130_vm0, %v705_v23 }
  0xe5   :  { %v628_v24 = vpop.f32.mrb[0].mxu1 }
  0xe6   :  { %v652_v25 = vpop.f32.mrb[0].mxu0  ;;  %v189_v26 = vpop.f32.mrb[1].mxu1 }
  0xe7   :  { %v383_v27 = vadd.f32 %v652_v25, %v628_v24  ;;  %v374_v28 = vpop.f32.mrb[1].mxu0  ;;  %v629_v29 = vpop.f32.mrb[2].mxu1 }
  0xe8   :  { %v375_v30 = vadd.f32 %v374_v28, %v189_v26  ;;  %v653_v31 = vpop.f32.mrb[2].mxu0  ;;  %v192_v32 = vpop.f32.mrb[3].mxu1 }
  0xe9   :  { %v580_v33 = vpack.c.bf16 %v383_v27, %v383_v27  ;;  %v386_v34 = vadd.f32 %v653_v31, %v629_v29  ;;  %v377_v35 = vpop.f32.mrb[3].mxu0 }
  0xea   :  { %v578_v36 = vpack.c.bf16 %v375_v30, %v375_v30  ;;  %v378_v37 = vadd.f32 %v377_v35, %v192_v32 }
  0xeb   :  { %504 = vst.msk [vmem:[%s887_s4 + $0x8] sm:$0xf] %vm501_vm1, %v580_v33  ;;  %v581_v38 = vpack.c.bf16 %v386_v34, %v386_v34 }
  0xec   :  { %502 = vst.msk [vmem:[%s887_s4] sm:$0xf] %vm501_vm1, %v578_v36  ;;  %v579_v39 = vpack.c.bf16 %v378_v37, %v378_v37 }
  0xed   :  { %505 = vst.msk [vmem:[%s887_s4 + $0xc] sm:$0xf] %vm501_vm1, %v581_v38  ;;  %v632_v40 = vpop.f32.mrb[4].mxu1 }
  0xee   :  { %503 = vst.msk [vmem:[%s887_s4 + $0x4] sm:$0xf] %vm501_vm1, %v579_v39  ;;  %v656_v41 = vpop.f32.mrb[4].mxu0  ;;  %v205_v42 = vpop.f32.mrb[5].mxu1 }
  0xef   :  { %v399_v43 = vadd.f32 %v656_v41, %v632_v40  ;;  %v390_v44 = vpop.f32.mrb[5].mxu0  ;;  %v633_v45 = vpop.f32.mrb[6].mxu1 }
  0xf0   :  { %v391_v46 = vadd.f32 %v390_v44, %v205_v42  ;;  %v657_v47 = vpop.f32.mrb[6].mxu0  ;;  %v208_v48 = vpop.f32.mrb[7].mxu1 }
  0xf1   :  { %v584_v49 = vpack.c.bf16 %v399_v43, %v399_v43  ;;  %v402_v50 = vadd.f32 %v657_v47, %v633_v45  ;;  %v393_v51 = vpop.f32.mrb[7].mxu0 }
  0xf2   :  { %v582_v52 = vpack.c.bf16 %v391_v46, %v391_v46  ;;  %v394_v53 = vadd.f32 %v393_v51, %v208_v48 }
  0xf3   :  { %508 = vst.msk [vmem:[%s887_s4 + $0x18] sm:$0xf] %vm501_vm1, %v584_v49  ;;  %v585_v54 = vpack.c.bf16 %v402_v50, %v402_v50 }
  0xf4   :  { %506 = vst.msk [vmem:[%s887_s4 + $0x10] sm:$0xf] %vm501_vm1, %v582_v52  ;;  %v583_v55 = vpack.c.bf16 %v394_v53, %v394_v53 }
  0xf5   :  { %509 = vst.msk [vmem:[%s887_s4 + $0x1c] sm:$0xf] %vm501_vm1, %v585_v54  ;;  %v636_v56 = vpop.f32.mrb[8].mxu1 }
  0xf6   :  { %507 = vst.msk [vmem:[%s887_s4 + $0x14] sm:$0xf] %vm501_vm1, %v583_v55  ;;  %v660_v57 = vpop.f32.mrb[8].mxu0  ;;  %v221_v58 = vpop.f32.mrb[9].mxu1 }
  0xf7   :  { %v415_v59 = vadd.f32 %v660_v57, %v636_v56  ;;  %v406_v60 = vpop.f32.mrb[9].mxu0  ;;  %v637_v61 = vpop.f32.mrb[10].mxu1 }
  0xf8   :  { %v407_v62 = vadd.f32 %v406_v60, %v221_v58  ;;  %v661_v63 = vpop.f32.mrb[10].mxu0  ;;  %v224_v0 = vpop.f32.mrb[11].mxu1 }
  0xf9   :  { %v588_v1 = vpack.c.bf16 %v415_v59, %v415_v59  ;;  %v418_v2 = vadd.f32 %v661_v63, %v637_v61  ;;  %v409_v3 = vpop.f32.mrb[11].mxu0 }
  0xfa   :  { %v586_v4 = vpack.c.bf16 %v407_v62, %v407_v62  ;;  %v410_v5 = vadd.f32 %v409_v3, %v224_v0 }
  0xfb   :  { %512 = vst.msk [vmem:[%s887_s4 + $0x28] sm:$0xf] %vm501_vm1, %v588_v1  ;;  %v589_v6 = vpack.c.bf16 %v418_v2, %v418_v2 }
  0xfc   :  { %510 = vst.msk [vmem:[%s887_s4 + $0x20] sm:$0xf] %vm501_vm1, %v586_v4  ;;  %v587_v7 = vpack.c.bf16 %v410_v5, %v410_v5 }
  0xfd   :  { %513 = vst.msk [vmem:[%s887_s4 + $0x2c] sm:$0xf] %vm501_vm1, %v589_v6  ;;  %v640_v8 = vpop.f32.mrb[12].mxu1 }
  0xfe   :  { %511 = vst.msk [vmem:[%s887_s4 + $0x24] sm:$0xf] %vm501_vm1, %v587_v7  ;;  %v664_v9 = vpop.f32.mrb[12].mxu0  ;;  %v237_v10 = vpop.f32.mrb[13].mxu1 }
  0xff   :  { %v431_v11 = vadd.f32 %v664_v9, %v640_v8  ;;  %v422_v12 = vpop.f32.mrb[13].mxu0  ;;  %v641_v13 = vpop.f32.mrb[14].mxu1 }
 0x100   :  { %v423_v14 = vadd.f32 %v422_v12, %v237_v10  ;;  %v665_v15 = vpop.f32.mrb[14].mxu0  ;;  %v240_v16 = vpop.f32.mrb[15].mxu1 }
 0x101   :  { %v592_v17 = vpack.c.bf16 %v431_v11, %v431_v11  ;;  %v434_v18 = vadd.f32 %v665_v15, %v641_v13  ;;  %v425_v19 = vpop.f32.mrb[15].mxu0 }
 0x102   :  { %v590_v20 = vpack.c.bf16 %v423_v14, %v423_v14  ;;  %v426_v21 = vadd.f32 %v425_v19, %v240_v16 }
 0x103   :  { %516 = vst.msk [vmem:[%s887_s4 + $0x38] sm:$0xf] %vm501_vm1, %v592_v17  ;;  %v593_v22 = vpack.c.bf16 %v434_v18, %v434_v18 }
 0x104   :  { %514 = vst.msk [vmem:[%s887_s4 + $0x30] sm:$0xf] %vm501_vm1, %v590_v20  ;;  %v591_v23 = vpack.c.bf16 %v426_v21, %v426_v21 }
 0x105   :  { %517 = vst.msk [vmem:[%s887_s4 + $0x3c] sm:$0xf] %vm501_vm1, %v593_v22 }
 0x106   :  { %515 = vst.msk [vmem:[%s887_s4 + $0x34] sm:$0xf] %vm501_vm1, %v591_v23 }

// kernel: baseline_forward.27
= control target key start
LH: loop header
LB: loop body
LE: loop exit
PB: predicated region body
PF: predicated region fallthrough
CT: control target
= control target key end

     0   :  { %vm359_vm0 = vcmask 257024   ;;  %s662_s1 = inlined_call_operand.vmem [shape: bf16[128,32], index: 1, kind: input, shape index: {}]   ;;  %s663_s0 = inlined_call_operand.vmem [shape: bf16[128,128], index: 0, kind: input, shape index: {}]   ;;  %s664_s2 = inlined_call_operand.vmem [shape: f32[1,32], index: 2, kind: input, shape index: {}]   ;;  %s665_s3 = inlined_call_operand.vmem [shape: bf16[128,32], index: 3, kind: output, shape index: {}]  }
   0x1   :  { %v493_v0 = vld [vmem:[%s662_s1] sm:$0xff]   ;;  %v494_v1 = vld [vmem:[%s662_s1 + $0x8] sm:$0xff]   ;;  %v495_v2 = vld [vmem:[%s662_s1 + $0x10] sm:$0xff]  }
   0x2   :  { %445 = vmatprep.subr.bf16.mxu0 %v493_v0  ;;  %477 = vmatprep.subr.bf16.mxu1 %v493_v0  ;;  %v496_v3 = vld [vmem:[%s662_s1 + $0x18] sm:$0xff]   ;;  %v501_v4 = vld [vmem:[%s663_s0] sm:$0xff]   ;;  %v498_v7 = vld [vmem:[%s662_s1 + $0x28] sm:$0xff]  }
   0x3   :  { %446 = vmatpush3.bf16.msra.mxu0 %v493_v0  ;;  %485 = vmatpush3.bf16.msra.mxu1 %v493_v0  ;;  %v502_v5 = vld [vmem:[%s663_s0 + $0x20] sm:$0xff]   ;;  %v499_v8 = vld [vmem:[%s662_s1 + $0x30] sm:$0xff]   ;;  %v500_v9 = vld [vmem:[%s662_s1 + $0x38] sm:$0xff]  }
   0x4   :  { %447 = vmatprep.subr.bf16.mxu0 %v494_v1  ;;  %478 = vmatprep.subr.bf16.mxu1 %v494_v1  ;;  %v497_v6 = vld [vmem:[%s662_s1 + $0x20] sm:$0xff]   ;;  %v503_v10 = vld [vmem:[%s663_s0 + $0x8] sm:$0xff]   ;;  %v505_v12 = vld [vmem:[%s663_s0 + $0x10] sm:$0xff]  }
   0x5   :  { %461 = vmatprep.mubr.bf16.mxu0 %v501_v4  ;;  %469 = vmatprep.mubr.bf16.mxu1 %v502_v5  ;;  %v504_v11 = vld [vmem:[%s663_s0 + $0x28] sm:$0xff]   ;;  %v506_v13 = vld [vmem:[%s663_s0 + $0x30] sm:$0xff]   ;;  %v507_v14 = vld [vmem:[%s663_s0 + $0x18] sm:$0xff]  }
   0x6   :  { %v508_v15 = vld [vmem:[%s663_s0 + $0x38] sm:$0xff]   ;;  %v580_v16 = vld [vmem:[%s664_s2] ss:$0 sm:$0xff] }
   0x7   :  { %448 = vmatpush3.bf16.msra.mxu0 %v494_v1  ;;  %486 = vmatpush3.bf16.msra.mxu1 %v494_v1 }
   0x8   :  { %449 = vmatprep.subr.bf16.mxu0 %v495_v2  ;;  %479 = vmatprep.subr.bf16.mxu1 %v495_v2 }
   0xb   :  { %450 = vmatpush3.bf16.msra.mxu0 %v495_v2  ;;  %487 = vmatpush3.bf16.msra.mxu1 %v495_v2 }
   0xc   :  { %451 = vmatprep.subr.bf16.mxu0 %v496_v3  ;;  %480 = vmatprep.subr.bf16.mxu1 %v496_v3 }
   0xf   :  { %452 = vmatpush3.bf16.msra.mxu0 %v496_v3  ;;  %488 = vmatpush3.bf16.msra.mxu1 %v496_v3 }
  0x10   :  { %453 = vmatprep.subr.bf16.mxu0 %v497_v6  ;;  %481 = vmatprep.subr.bf16.mxu1 %v497_v6 }
  0x13   :  { %454 = vmatpush3.bf16.msra.mxu0 %v497_v6  ;;  %489 = vmatpush3.bf16.msra.mxu1 %v497_v6 }
  0x14   :  { %455 = vmatprep.subr.bf16.mxu0 %v498_v7  ;;  %482 = vmatprep.subr.bf16.mxu1 %v498_v7 }
  0x17   :  { %456 = vmatpush3.bf16.msra.mxu0 %v498_v7  ;;  %490 = vmatpush3.bf16.msra.mxu1 %v498_v7 }
  0x18   :  { %457 = vmatprep.subr.bf16.mxu0 %v499_v8  ;;  %483 = vmatprep.subr.bf16.mxu1 %v499_v8 }
  0x1b   :  { %458 = vmatpush3.bf16.msra.mxu0 %v499_v8  ;;  %491 = vmatpush3.bf16.msra.mxu1 %v499_v8 }
  0x1c   :  { %459 = vmatprep.subr.bf16.mxu0 %v500_v9  ;;  %484 = vmatprep.subr.bf16.mxu1 %v500_v9 }
  0x1f   :  { %460 = vmatpush3.bf16.msra.mxu0 %v500_v9  ;;  %492 = vmatpush3.bf16.msra.mxu1 %v500_v9 }
  0x22   :  { %462 = vmatmul.mubr.bf16.vlgmr.msra.gmra.mrb[0].mxu0 %v503_v10  ;;  %470 = vmatmul.mubr.bf16.vlgmr.msra.gmra.mrb[0].mxu1 %v504_v11 }
  0x23   :  { %465 = vmatprep.mubr.bf16.mxu0 %v505_v12  ;;  %473 = vmatprep.mubr.bf16.mxu1 %v506_v13 }
  0x2a   :  { %466 = vmatmul.mubr.bf16.gmra.mrb[4].mxu0 %v507_v14  ;;  %474 = vmatmul.mubr.bf16.gmra.mrb[4].mxu1 %v508_v15 }
  0xf5   :  { %v463_v17 = vpop.f32.mrb[0].mxu0  ;;  %v471_v18 = vpop.f32.mrb[0].mxu1 }
  0xf6   :  { %v193_v19 = vadd.f32 %v463_v17, %v580_v16  ;;  %v225_v20 = vadd.f32 %v471_v18, %v580_v16  ;;  %v184_v21 = vpop.f32.mrb[1].mxu0  ;;  %v216_v22 = vpop.f32.mrb[1].mxu1 }
  0xf7   :  { %v185_v23 = vadd.f32 %v580_v16, %v184_v21  ;;  %v217_v24 = vadd.f32 %v580_v16, %v216_v22  ;;  %v464_v25 = vpop.f32.mrb[2].mxu0  ;;  %v472_v26 = vpop.f32.mrb[2].mxu1 }
  0xf8   :  { %vm249_vm1 = vcmp.ge.f32.partialorder %v193_v19, 0.0  ;;  %v265_v27 = vmul.f32 0.1, %v193_v19  ;;  %vm257_vm2 = vcmp.ge.f32.partialorder %v225_v20, 0.0  ;;  %v273_v28 = vmul.f32 0.1, %v225_v20 }
  0xf9   :  { %vm247_vm3 = vcmp.ge.f32.partialorder %v185_v23, 0.0  ;;  %v263_v29 = vmul.f32 0.1, %v185_v23  ;;  %vm255_vm4 = vcmp.ge.f32.partialorder %v217_v24, 0.0  ;;  %v271_v30 = vmul.f32 0.1, %v217_v24 }
  0xfa   :  { %v281_v31 = vsel %vm249_vm1, %v193_v19, %v265_v27  ;;  %v289_v32 = vsel %vm257_vm2, %v225_v20, %v273_v28  ;;  %v196_v33 = vadd.f32 %v464_v25, %v580_v16  ;;  %v228_v34 = vadd.f32 %v472_v26, %v580_v16  ;;  %v187_v35 = vpop.f32.mrb[3].mxu0  ;;  %v219_v36 = vpop.f32.mrb[3].mxu1 }
  0xfb   :  { %v415_v37 = vpack.c.bf16 %v281_v31, %v281_v31  ;;  %v423_v38 = vpack.c.bf16 %v289_v32, %v289_v32  ;;  %v279_v39 = vsel %vm247_vm3, %v185_v23, %v263_v29  ;;  %v287_v40 = vsel %vm255_vm4, %v217_v24, %v271_v30 }
  0xfc   :  { %v413_v41 = vpack.c.bf16 %v279_v39, %v279_v39  ;;  %v421_v42 = vpack.c.bf16 %v287_v40, %v287_v40  ;;  %vm250_vm5 = vcmp.ge.f32.partialorder %v196_v33, 0.0  ;;  %v266_v43 = vmul.f32 0.1, %v196_v33 }
  0xfd   :  { %362 = vst.msk [vmem:[%s665_s3 + $0x8] sm:$0xf] %vm359_vm0, %v415_v37  ;;  %370 = vst.msk [vmem:[%s665_s3 + $0x28] sm:$0xf] %vm359_vm0, %v423_v38  ;;  %vm258_vm6 = vcmp.ge.f32.partialorder %v228_v34, 0.0  ;;  %v188_v45 = vadd.f32 %v580_v16, %v187_v35  ;;  %v220_v46 = vadd.f32 %v580_v16, %v219_v36  ;;  %v467_v47 = vpop.f32.mrb[4].mxu0 }
  0xfe   :  { %v274_v44 = vmul.f32 0.1, %v228_v34  ;;  %v475_v48 = vpop.f32.mrb[4].mxu1  ;;  %360 = vst.msk [vmem:[%s665_s3] sm:$0xf] %vm359_vm0, %v413_v41  ;;  %v282_v49 = vsel %vm250_vm5, %v196_v33, %v266_v43  ;;  %v209_v50 = vadd.f32 %v467_v47, %v580_v16  ;;  %v200_v52 = vpop.f32.mrb[5].mxu0 }
  0xff   :  { %368 = vst.msk [vmem:[%s665_s3 + $0x20] sm:$0xf] %vm359_vm0, %v421_v42  ;;  %v241_v51 = vadd.f32 %v475_v48, %v580_v16  ;;  %v232_v53 = vpop.f32.mrb[5].mxu1  ;;  %v416_v54 = vpack.c.bf16 %v282_v49, %v282_v49  ;;  %vm248_vm7 = vcmp.ge.f32.partialorder %v188_v45, 0.0  ;;  %v264_v56 = vmul.f32 0.1, %v188_v45 }
 0x100   :  { %v290_v55 = vsel %vm258_vm6, %v228_v34, %v274_v44  ;;  %v468_v57 = vpop.f32.mrb[6].mxu0  ;;  %v476_v58 = vpop.f32.mrb[6].mxu1  ;;  %vm256_vm8 = vcmp.ge.f32.partialorder %v220_v46, 0.0  ;;  %v272_v60 = vmul.f32 0.1, %v220_v46  ;;  %vm253_vm9 = vcmp.ge.f32.partialorder %v209_v50, 0.0 }
 0x101   :  { %v424_v59 = vpack.c.bf16 %v290_v55, %v290_v55  ;;  %v203_v61 = vpop.f32.mrb[7].mxu0  ;;  %v235_v62 = vpop.f32.mrb[7].mxu1  ;;  %363 = vst.msk [vmem:[%s665_s3 + $0xc] sm:$0xf] %vm359_vm0, %v416_v54  ;;  %v280_v63 = vsel %vm248_vm7, %v188_v45, %v264_v56  ;;  %v269_v0 = vmul.f32 0.1, %v209_v50  ;;  %v201_v4 = vadd.f32 %v580_v16, %v200_v52 }
 0x102   :  { %vm261_vm10 = vcmp.ge.f32.partialorder %v241_v51, 0.0  ;;  %v277_v1 = vmul.f32 0.1, %v241_v51  ;;  %v414_v2 = vpack.c.bf16 %v280_v63, %v280_v63  ;;  %v288_v3 = vsel %vm256_vm8, %v220_v46, %v272_v60 }
 0x103   :  { %371 = vst.msk [vmem:[%s665_s3 + $0x2c] sm:$0xf] %vm359_vm0, %v424_v59  ;;  %v233_v5 = vadd.f32 %v580_v16, %v232_v53  ;;  %v422_v6 = vpack.c.bf16 %v288_v3, %v288_v3  ;;  %v285_v7 = vsel %vm253_vm9, %v209_v50, %v269_v0  ;;  %v212_v9 = vadd.f32 %v468_v57, %v580_v16 }
 0x104   :  { %v293_v8 = vsel %vm261_vm10, %v241_v51, %v277_v1  ;;  %361 = vst.msk [vmem:[%s665_s3 + $0x4] sm:$0xf] %vm359_vm0, %v414_v2  ;;  %v419_v10 = vpack.c.bf16 %v285_v7, %v285_v7  ;;  %vm251_vm11 = vcmp.ge.f32.partialorder %v201_v4, 0.0  ;;  %v267_v12 = vmul.f32 0.1, %v201_v4 }
 0x105   :  { %v427_v11 = vpack.c.bf16 %v293_v8, %v293_v8  ;;  %369 = vst.msk [vmem:[%s665_s3 + $0x24] sm:$0xf] %vm359_vm0, %v422_v6  ;;  %vm259_vm12 = vcmp.ge.f32.partialorder %v233_v5, 0.0  ;;  %v275_v13 = vmul.f32 0.1, %v233_v5  ;;  %vm254_vm13 = vcmp.ge.f32.partialorder %v212_v9, 0.0 }
 0x106   :  { %v270_v14 = vmul.f32 0.1, %v212_v9  ;;  %366 = vst.msk [vmem:[%s665_s3 + $0x18] sm:$0xf] %vm359_vm0, %v419_v10  ;;  %v283_v15 = vsel %vm251_vm11, %v201_v4, %v267_v12  ;;  %v244_v17 = vadd.f32 %v476_v58, %v580_v16  ;;  %v204_v18 = vadd.f32 %v580_v16, %v203_v61 }
 0x107   :  { %374 = vst.msk [vmem:[%s665_s3 + $0x38] sm:$0xf] %vm359_vm0, %v427_v11  ;;  %v236_v19 = vadd.f32 %v580_v16, %v235_v62  ;;  %v417_v20 = vpack.c.bf16 %v283_v15, %v283_v15  ;;  %v291_v21 = vsel %vm259_vm12, %v233_v5, %v275_v13 }
 0x108   :  { %v286_v22 = vsel %vm254_vm13, %v212_v9, %v270_v14  ;;  %v425_v23 = vpack.c.bf16 %v291_v21, %v291_v21  ;;  %vm262_vm14 = vcmp.ge.f32.partialorder %v244_v17, 0.0  ;;  %v278_v25 = vmul.f32 0.1, %v244_v17 }
 0x109   :  { %v420_v24 = vpack.c.bf16 %v286_v22, %v286_v22  ;;  %364 = vst.msk [vmem:[%s665_s3 + $0x10] sm:$0xf] %vm359_vm0, %v417_v20  ;;  %vm252_vm15 = vcmp.ge.f32.partialorder %v204_v18, 0.0  ;;  %v268_v26 = vmul.f32 0.1, %v204_v18  ;;  %vm260_vm1 = vcmp.ge.f32.partialorder %v236_v19, 0.0 }
 0x10a   :  { %v276_v27 = vmul.f32 0.1, %v236_v19  ;;  %372 = vst.msk [vmem:[%s665_s3 + $0x30] sm:$0xf] %vm359_vm0, %v425_v23  ;;  %v294_v16 = vsel %vm262_vm14, %v244_v17, %v278_v25 }
 0x10b   :  { %367 = vst.msk [vmem:[%s665_s3 + $0x1c] sm:$0xf] %vm359_vm0, %v420_v24  ;;  %v428_v28 = vpack.c.bf16 %v294_v16, %v294_v16  ;;  %v284_v29 = vsel %vm252_vm15, %v204_v18, %v268_v26 }
 0x10c   :  { %v292_v30 = vsel %vm260_vm1, %v236_v19, %v276_v27  ;;  %v418_v31 = vpack.c.bf16 %v284_v29, %v284_v29 }
 0x10d   :  { %v426_v32 = vpack.c.bf16 %v292_v30, %v292_v30  ;;  %375 = vst.msk [vmem:[%s665_s3 + $0x3c] sm:$0xf] %vm359_vm0, %v428_v28 }
 0x10e   :  { %365 = vst.msk [vmem:[%s665_s3 + $0x14] sm:$0xf] %vm359_vm0, %v418_v31 }
 0x10f   :  { %373 = vst.msk [vmem:[%s665_s3 + $0x34] sm:$0xf] %vm359_vm0, %v426_v32 }

// kernel: baseline_forward.26
= control target key start
LH: loop header
LB: loop body
LE: loop exit
PB: predicated region body
PF: predicated region fallthrough
CT: control target
= control target key end

     0   :  { %vm103_vm0 = vcmask 261120   ;;  %vm313_vm1 = vcmask 523264   ;;  %s1028_s4 = inlined_call_operand.vmem [shape: bf16[64,128], index: 4, kind: input, shape index: {}]   ;;  %s1029_s1 = inlined_call_operand.vmem [shape: bf16[32,128], index: 1, kind: input, shape index: {}]   ;;  %s1030_s0 = inlined_call_operand.vmem [shape: bf16[128,32], index: 0, kind: input, shape index: {}]   ;;  %s1031_s3 = inlined_call_operand.vmem [shape: bf16[128,64], index: 3, kind: input, shape index: {}]   ;;  %s1032_s2 = inlined_call_operand.vmem [shape: f32[1,128], index: 2, kind: input, shape index: {}]   ;;  %s1033_s5 = inlined_call_operand.vmem [shape: f32[1,128], index: 5, kind: input, shape index: {}]   ;;  %s1034_s6 = inlined_call_operand.vmem [shape: bf16[128,128], index: 6, kind: output, shape index: {}]  }
   0x1   :  { %v823_v0 = vld [vmem:[%s1028_s4] sm:$0xff]   ;;  %v825_v2 = vld [vmem:[%s1028_s4 + $0x8] sm:$0xff]   ;;  %v827_v4 = vld [vmem:[%s1028_s4 + $0x10] sm:$0xff]  }
   0x2   :  { %v824_v1 = vld [vmem:[%s1029_s1] sm:$0xff]   ;;  %767 = vmatprep.subr.bf16.mxu0 %v823_v0  ;;  %v826_v3 = vld [vmem:[%s1029_s1 + $0x8] sm:$0xff]   ;;  %v830_v7 = vld [vmem:[%s1028_s4 + $0x18] sm:$0xff]  }
   0x3   :  { %768 = vmatpush3.bf16.msra.mxu0 %v823_v0  ;;  %747 = vmatprep.subr.bf16.mxu1 %v824_v1  ;;  %v828_v5 = vld [vmem:[%s1030_s0] sm:$0xff]   ;;  %v829_v6 = vld [vmem:[%s1030_s0 + $0x8] sm:$0xff]   ;;  %v833_v9 = vld [vmem:[%s1030_s0 + $0x10] sm:$0xff]  }
   0x4   :  { %748 = vmatpush3.bf16.msra.mxu1 %v824_v1  ;;  %769 = vmatprep.subr.bf16.mxu0 %v825_v2  ;;  %v831_v8 = vld [vmem:[%s1031_s3] sm:$0xff]   ;;  %v832_v10 = vld [vmem:[%s1031_s3 + $0x8] sm:$0xff]   ;;  %v834_v11 = vld [vmem:[%s1030_s0 + $0x18] sm:$0xff]  }
   0x5   :  { %749 = vmatprep.subr.bf16.mxu1 %v826_v3  ;;  %751 = vmatprep.mubr.msk.bf16.mxu1 %vm103_vm0, %v828_v5  ;;  %v835_v12 = vld [vmem:[%s1031_s3 + $0x10] sm:$0xff]   ;;  %v837_v13 = vld [vmem:[%s1030_s0 + $0x20] sm:$0xff]   ;;  %v836_v14 = vld [vmem:[%s1031_s3 + $0x18] sm:$0xff]  }
   0x6   :  { %775 = vmatprep.mubr.msk.bf16.mxu0 %vm313_vm1, %v831_v8  ;;  %v838_v15 = vld [vmem:[%s1030_s0 + $0x28] sm:$0xff]   ;;  %v839_v16 = vld [vmem:[%s1031_s3 + $0x20] sm:$0xff]   ;;  %v841_v17 = vld [vmem:[%s1030_s0 + $0x30] sm:$0xff]  }
   0x7   :  { %770 = vmatpush3.bf16.msra.mxu0 %v825_v2  ;;  %v840_v18 = vld [vmem:[%s1031_s3 + $0x28] sm:$0xff]   ;;  %v842_v19 = vld [vmem:[%s1030_s0 + $0x38] sm:$0xff]   ;;  %v843_v20 = vld [vmem:[%s1031_s3 + $0x30] sm:$0xff]  }
   0x8   :  { %750 = vmatpush3.bf16.msra.mxu1 %v826_v3  ;;  %771 = vmatprep.subr.bf16.mxu0 %v827_v4  ;;  %v844_v21 = vld [vmem:[%s1031_s3 + $0x38] sm:$0xff]   ;;  %v965_v23 = vld [vmem:[%s1032_s2] ss:$0 sm:$0xff] }
   0x9   :  { %v972_v30 = vld [vmem:[%s1033_s5] ss:$0 sm:$0xff] }
   0xb   :  { %772 = vmatpush3.bf16.msra.mxu0 %v827_v4  ;;  %752 = vmatmul.mubr.msk.bf16.vlgmr.msra.gmra.mrb[0].mxu1 %vm103_vm0, %v829_v6 }
   0xc   :  { %773 = vmatprep.subr.bf16.mxu0 %v830_v7  ;;  %755 = vmatprep.mubr.msk.bf16.mxu1 %vm103_vm0, %v833_v9 }
   0xf   :  { %774 = vmatpush3.bf16.msra.mxu0 %v830_v7 }
  0x12   :  { %776 = vmatmul.mubr.msk.bf16.vlgmr.msra.gmra.mrb[0].mxu0 %vm313_vm1, %v832_v10 }
  0x13   :  { %756 = vmatmul.mubr.msk.bf16.gmra.mrb[4].mxu1 %vm103_vm0, %v834_v11  ;;  %779 = vmatprep.mubr.msk.bf16.mxu0 %vm313_vm1, %v835_v12 }
  0x14   :  { %759 = vmatprep.mubr.msk.bf16.mxu1 %vm103_vm0, %v837_v13 }
  0x1a   :  { %780 = vmatmul.mubr.msk.bf16.gmra.mrb[4].mxu0 %vm313_vm1, %v836_v14 }
  0x1b   :  { %760 = vmatmul.mubr.msk.bf16.gmra.mrb[8].mxu1 %vm103_vm0, %v838_v15  ;;  %783 = vmatprep.mubr.msk.bf16.mxu0 %vm313_vm1, %v839_v16 }
  0x1c   :  { %763 = vmatprep.mubr.msk.bf16.mxu1 %vm103_vm0, %v841_v17 }
  0x22   :  { %784 = vmatmul.mubr.msk.bf16.gmra.mrb[8].mxu0 %vm313_vm1, %v840_v18 }
  0x23   :  { %764 = vmatmul.mubr.msk.bf16.gmra.mrb[12].mxu1 %vm103_vm0, %v842_v19  ;;  %787 = vmatprep.mubr.msk.bf16.mxu0 %vm313_vm1, %v843_v20 }
  0x2a   :  { %788 = vmatmul.mubr.msk.bf16.gmra.mrb[12].mxu0 %vm313_vm1, %v844_v21 }
  0xde   :  { %v753_v22 = vpop.f32.mrb[0].mxu1 }
  0xdf   :  { %v162_v24 = vpop.f32.mrb[1].mxu1  ;;  %v171_v27 = vadd.f32 %v753_v22, %v965_v23 }
  0xe0   :  { %v754_v25 = vpop.f32.mrb[2].mxu1  ;;  %v163_v28 = vadd.f32 %v965_v23, %v162_v24 }
  0xe1   :  { %v165_v26 = vpop.f32.mrb[3].mxu1  ;;  %v174_v31 = vadd.f32 %v754_v25, %v965_v23 }
  0xe2   :  { %v166_v35 = vadd.f32 %v965_v23, %v165_v26 }
  0xe5   :  { %v777_v29 = vpop.f32.mrb[0].mxu0 }
  0xe6   :  { %v437_v32 = vadd.f32 %v777_v29, %v171_v27  ;;  %v372_v33 = vpop.f32.mrb[1].mxu0  ;;  %v757_v34 = vpop.f32.mrb[4].mxu1 }
  0xe7   :  { %v435_v36 = vadd.f32 %v372_v33, %v163_v28  ;;  %v778_v37 = vpop.f32.mrb[2].mxu0  ;;  %v178_v38 = vpop.f32.mrb[5].mxu1  ;;  %v187_v48 = vadd.f32 %v757_v34, %v965_v23 }
  0xe8   :  { %v460_v39 = vadd.f32 %v972_v30, %v437_v32  ;;  %v438_v40 = vadd.f32 %v778_v37, %v174_v31  ;;  %v375_v41 = vpop.f32.mrb[3].mxu0  ;;  %v758_v42 = vpop.f32.mrb[6].mxu1  ;;  %v179_v51 = vadd.f32 %v965_v23, %v178_v38 }
  0xe9   :  { %v458_v43 = vadd.f32 %v972_v30, %v435_v36  ;;  %v436_v44 = vadd.f32 %v375_v41, %v166_v35  ;;  %v181_v45 = vpop.f32.mrb[7].mxu1  ;;  %v190_v54 = vadd.f32 %v758_v42, %v965_v23 }
  0xea   :  { %v492_v46 = vmul.f32 0.1, %v460_v39  ;;  %v461_v47 = vadd.f32 %v972_v30, %v438_v40  ;;  %vm476_vm2 = vcmp.ge.f32.partialorder %v460_v39, 0.0  ;;  %v182_v58 = vadd.f32 %v965_v23, %v181_v45 }
  0xeb   :  { %v490_v49 = vmul.f32 0.1, %v458_v43  ;;  %v459_v50 = vadd.f32 %v972_v30, %v436_v44  ;;  %vm474_vm3 = vcmp.ge.f32.partialorder %v458_v43, 0.0 }
  0xec   :  { %vm477_vm4 = vcmp.ge.f32.partialorder %v461_v47, 0.0  ;;  %v493_v52 = vmul.f32 0.1, %v461_v47  ;;  %v508_v56 = vsel %vm476_vm2, %v460_v39, %v492_v46 }
  0xed   :  { %vm475_vm5 = vcmp.ge.f32.partialorder %v459_v50, 0.0  ;;  %v491_v53 = vmul.f32 0.1, %v459_v50  ;;  %v781_v55 = vpop.f32.mrb[4].mxu0  ;;  %v506_v62 = vsel %vm474_vm3, %v458_v43, %v490_v49 }
  0xee   :  { %v509_v57 = vsel %vm477_vm4, %v461_v47, %v493_v52  ;;  %v441_v59 = vadd.f32 %v781_v55, %v187_v48  ;;  %v388_v60 = vpop.f32.mrb[5].mxu0  ;;  %v761_v61 = vpop.f32.mrb[8].mxu1 }
  0xef   :  { %v686_v63 = vpack.c.bf16 %v509_v57, %v508_v56  ;;  %v507_v0 = vsel %vm475_vm5, %v459_v50, %v491_v53  ;;  %v439_v1 = vadd.f32 %v388_v60, %v179_v51  ;;  %v782_v2 = vpop.f32.mrb[6].mxu0  ;;  %v194_v3 = vpop.f32.mrb[9].mxu1  ;;  %v203_v14 = vadd.f32 %v761_v61, %v965_v23 }
  0xf0   :  { %v681_v4 = vpack.c.bf16 %v507_v0, %v506_v62  ;;  %v464_v5 = vadd.f32 %v972_v30, %v441_v59  ;;  %v442_v6 = vadd.f32 %v782_v2, %v190_v54  ;;  %v391_v7 = vpop.f32.mrb[7].mxu0  ;;  %v762_v8 = vpop.f32.mrb[10].mxu1  ;;  %v195_v17 = vadd.f32 %v965_v23, %v194_v3 }
  0xf1   :  { %718 = vst [vmem:[%s1034_s6 + $0x8] sm:$0xff] %v686_v63   ;;  %v462_v9 = vadd.f32 %v972_v30, %v439_v1  ;;  %v440_v10 = vadd.f32 %v391_v7, %v182_v58  ;;  %v197_v11 = vpop.f32.mrb[11].mxu1  ;;  %v206_v20 = vadd.f32 %v762_v8, %v965_v23 }
  0xf2   :  { %682 = vst [vmem:[%s1034_s6] sm:$0xff] %v681_v4   ;;  %v496_v12 = vmul.f32 0.1, %v464_v5  ;;  %v465_v13 = vadd.f32 %v972_v30, %v442_v6  ;;  %vm480_vm6 = vcmp.ge.f32.partialorder %v464_v5, 0.0  ;;  %v198_v25 = vadd.f32 %v965_v23, %v197_v11 }
  0xf3   :  { %v494_v15 = vmul.f32 0.1, %v462_v9  ;;  %v463_v16 = vadd.f32 %v972_v30, %v440_v10  ;;  %vm478_vm7 = vcmp.ge.f32.partialorder %v462_v9, 0.0 }
  0xf4   :  { %vm481_vm8 = vcmp.ge.f32.partialorder %v465_v13, 0.0  ;;  %v497_v18 = vmul.f32 0.1, %v465_v13  ;;  %v512_v22 = vsel %vm480_vm6, %v464_v5, %v496_v12 }
  0xf5   :  { %vm479_vm9 = vcmp.ge.f32.partialorder %v463_v16, 0.0  ;;  %v495_v19 = vmul.f32 0.1, %v463_v16  ;;  %v785_v21 = vpop.f32.mrb[8].mxu0  ;;  %v510_v29 = vsel %vm478_vm7, %v462_v9, %v494_v15 }
  0xf6   :  { %v513_v24 = vsel %vm481_vm8, %v465_v13, %v497_v18  ;;  %v445_v26 = vadd.f32 %v785_v21, %v203_v14  ;;  %v404_v27 = vpop.f32.mrb[9].mxu0  ;;  %v765_v28 = vpop.f32.mrb[12].mxu1 }
  0xf7   :  { %v696_v31 = vpack.c.bf16 %v513_v24, %v512_v22  ;;  %v511_v32 = vsel %vm479_vm9, %v463_v16, %v495_v19  ;;  %v443_v33 = vadd.f32 %v404_v27, %v195_v17  ;;  %v786_v34 = vpop.f32.mrb[10].mxu0  ;;  %v210_v35 = vpop.f32.mrb[13].mxu1  ;;  %v219_v46 = vadd.f32 %v765_v28, %v965_v23 }
  0xf8   :  { %v691_v36 = vpack.c.bf16 %v511_v32, %v510_v29  ;;  %v468_v37 = vadd.f32 %v972_v30, %v445_v26  ;;  %v446_v38 = vadd.f32 %v786_v34, %v206_v20  ;;  %v407_v39 = vpop.f32.mrb[11].mxu0  ;;  %v766_v40 = vpop.f32.mrb[14].mxu1  ;;  %v211_v49 = vadd.f32 %v965_v23, %v210_v35 }
  0xf9   :  { %720 = vst [vmem:[%s1034_s6 + $0x18] sm:$0xff] %v696_v31   ;;  %v466_v41 = vadd.f32 %v972_v30, %v443_v33  ;;  %v444_v42 = vadd.f32 %v407_v39, %v198_v25  ;;  %v213_v43 = vpop.f32.mrb[15].mxu1  ;;  %v222_v52 = vadd.f32 %v766_v40, %v965_v23 }
  0xfa   :  { %719 = vst [vmem:[%s1034_s6 + $0x10] sm:$0xff] %v691_v36   ;;  %v500_v44 = vmul.f32 0.1, %v468_v37  ;;  %v469_v45 = vadd.f32 %v972_v30, %v446_v38  ;;  %vm484_vm10 = vcmp.ge.f32.partialorder %v468_v37, 0.0  ;;  %v214_v56 = vadd.f32 %v965_v23, %v213_v43 }
  0xfb   :  { %v498_v47 = vmul.f32 0.1, %v466_v41  ;;  %v467_v48 = vadd.f32 %v972_v30, %v444_v42  ;;  %vm482_vm11 = vcmp.ge.f32.partialorder %v466_v41, 0.0 }
  0xfc   :  { %vm485_vm12 = vcmp.ge.f32.partialorder %v469_v45, 0.0  ;;  %v501_v50 = vmul.f32 0.1, %v469_v45  ;;  %v516_v54 = vsel %vm484_vm10, %v468_v37, %v500_v44 }
  0xfd   :  { %vm483_vm13 = vcmp.ge.f32.partialorder %v467_v48, 0.0  ;;  %v499_v51 = vmul.f32 0.1, %v467_v48  ;;  %v789_v53 = vpop.f32.mrb[12].mxu0  ;;  %v514_v59 = vsel %vm482_vm11, %v466_v41, %v498_v47 }
  0xfe   :  { %v517_v55 = vsel %vm485_vm12, %v469_v45, %v501_v50  ;;  %v449_v57 = vadd.f32 %v789_v53, %v219_v46  ;;  %v420_v58 = vpop.f32.mrb[13].mxu0 }
  0xff   :  { %v706_v60 = vpack.c.bf16 %v517_v55, %v516_v54  ;;  %v515_v61 = vsel %vm483_vm13, %v467_v48, %v499_v51  ;;  %v447_v62 = vadd.f32 %v420_v58, %v211_v49  ;;  %v790_v63 = vpop.f32.mrb[14].mxu0 }
 0x100   :  { %v701_v0 = vpack.c.bf16 %v515_v61, %v514_v59  ;;  %v472_v1 = vadd.f32 %v972_v30, %v449_v57  ;;  %v450_v2 = vadd.f32 %v790_v63, %v222_v52  ;;  %v423_v3 = vpop.f32.mrb[15].mxu0 }
 0x101   :  { %722 = vst [vmem:[%s1034_s6 + $0x28] sm:$0xff] %v706_v60   ;;  %v470_v4 = vadd.f32 %v972_v30, %v447_v62  ;;  %v448_v5 = vadd.f32 %v423_v3, %v214_v56 }
 0x102   :  { %721 = vst [vmem:[%s1034_s6 + $0x20] sm:$0xff] %v701_v0   ;;  %v504_v23 = vmul.f32 0.1, %v472_v1  ;;  %v473_v6 = vadd.f32 %v972_v30, %v450_v2  ;;  %vm488_vm14 = vcmp.ge.f32.partialorder %v472_v1, 0.0 }
 0x103   :  { %v502_v7 = vmul.f32 0.1, %v470_v4  ;;  %v471_v8 = vadd.f32 %v972_v30, %v448_v5  ;;  %vm486_vm15 = vcmp.ge.f32.partialorder %v470_v4, 0.0 }
 0x104   :  { %vm489_vm0 = vcmp.ge.f32.partialorder %v473_v6, 0.0  ;;  %v505_v9 = vmul.f32 0.1, %v473_v6  ;;  %v520_v11 = vsel %vm488_vm14, %v472_v1, %v504_v23 }
 0x105   :  { %vm487_vm1 = vcmp.ge.f32.partialorder %v471_v8, 0.0  ;;  %v503_v10 = vmul.f32 0.1, %v471_v8  ;;  %v518_v13 = vsel %vm486_vm15, %v470_v4, %v502_v7 }
 0x106   :  { %v521_v12 = vsel %vm489_vm0, %v473_v6, %v505_v9 }
 0x107   :  { %v716_v14 = vpack.c.bf16 %v521_v12, %v520_v11  ;;  %v519_v15 = vsel %vm487_vm1, %v471_v8, %v503_v10 }
 0x108   :  { %v711_v16 = vpack.c.bf16 %v519_v15, %v518_v13 }
 0x109   :  { %724 = vst [vmem:[%s1034_s6 + $0x38] sm:$0xff] %v716_v14  }
 0x10a   :  { %723 = vst [vmem:[%s1034_s6 + $0x30] sm:$0xff] %v711_v16  }

// kernel: baseline_forward.29
= control target key start
LH: loop header
LB: loop body
LE: loop exit
PB: predicated region body
PF: predicated region fallthrough
CT: control target
= control target key end

     0   :  { %vm97_vm0 = vcmask 261120   ;;  %s742_s1 = inlined_call_operand.vmem [shape: bf16[32,128], index: 1, kind: input, shape index: {}]   ;;  %s743_s0 = inlined_call_operand.vmem [shape: bf16[128,32], index: 0, kind: input, shape index: {}]   ;;  %s744_s3 = inlined_call_operand.vmem [shape: bf16[128,128], index: 3, kind: input, shape index: {}]   ;;  %s745_s2 = inlined_call_operand.vmem [shape: f32[1,128], index: 2, kind: input, shape index: {}]   ;;  %s746_s4 = inlined_call_operand.vmem [shape: bf16[128,128], index: 4, kind: output, shape index: {}]  }
   0x1   :  { %v570_v0 = vld [vmem:[%s742_s1] sm:$0xff]   ;;  %v571_v1 = vld [vmem:[%s742_s1 + $0x8] sm:$0xff]   ;;  %v576_v6 = vld [vmem:[%s743_s0 + $0x10] sm:$0xff]  }
   0x2   :  { %546 = vmatprep.subr.bf16.mxu0 %v570_v0  ;;  %566 = vmatprep.subr.bf16.mxu1 %v570_v0  ;;  %v572_v2 = vld [vmem:[%s743_s0] sm:$0xff]   ;;  %v574_v4 = vld [vmem:[%s743_s0 + $0x8] sm:$0xff]   ;;  %v577_v7 = vld [vmem:[%s743_s0 + $0x30] sm:$0xff]  }
   0x3   :  { %547 = vmatpush3.bf16.msra.mxu0 %v570_v0  ;;  %568 = vmatpush3.bf16.msra.mxu1 %v570_v0  ;;  %v573_v3 = vld [vmem:[%s743_s0 + $0x20] sm:$0xff]   ;;  %v575_v5 = vld [vmem:[%s743_s0 + $0x28] sm:$0xff]   ;;  %v578_v8 = vld [vmem:[%s743_s0 + $0x18] sm:$0xff]  }
   0x4   :  { %548 = vmatprep.subr.bf16.mxu0 %v571_v1  ;;  %567 = vmatprep.subr.bf16.mxu1 %v571_v1  ;;  %v579_v9 = vld [vmem:[%s743_s0 + $0x38] sm:$0xff]   ;;  %v522_v10 = vld [vmem:[%s744_s3 + $0x8] sm:$0xff]   ;;  %v451_v12 = vld [vmem:[%s744_s3] sm:$0xff]  }
   0x5   :  { %550 = vmatprep.mubr.msk.bf16.mxu0 %vm97_vm0, %v572_v2  ;;  %558 = vmatprep.mubr.msk.bf16.mxu1 %vm97_vm0, %v573_v3  ;;  %v526_v11 = vld [vmem:[%s744_s3 + $0x28] sm:$0xff]   ;;  %v525_v13 = vld [vmem:[%s744_s3 + $0x20] sm:$0xff]   ;;  %v658_v14 = vld [vmem:[%s744_s3 + $0x18] sm:$0xff]   ;;  %v456_v18 = vunpack.c.l.bf16 %v522_v10  ;;  %v452_v20 = vunpack.c.l.bf16 %v451_v12  ;;  %v457_v23 = vunpack.c.h.bf16 %v522_v10  ;;  %v453_v25 = vunpack.c.h.bf16 %v451_v12 }
   0x6   :  { %v663_v15 = vld [vmem:[%s744_s3 + $0x38] sm:$0xff]   ;;  %v668_v16 = vld [vmem:[%s744_s3 + $0x10] sm:$0xff]   ;;  %v673_v17 = vld [vmem:[%s745_s2] ss:$0 sm:$0xff]  ;;  %v472_v19 = vunpack.c.l.bf16 %v526_v11  ;;  %v468_v22 = vunpack.c.l.bf16 %v525_v13  ;;  %v473_v24 = vunpack.c.h.bf16 %v526_v11  ;;  %v469_v28 = vunpack.c.h.bf16 %v525_v13 }
   0x7   :  { %549 = vmatpush3.bf16.msra.mxu0 %v571_v1  ;;  %569 = vmatpush3.bf16.msra.mxu1 %v571_v1  ;;  %v678_v21 = vld [vmem:[%s744_s3 + $0x30] sm:$0xff]   ;;  %v464_v29 = vunpack.c.l.bf16 %v658_v14  ;;  %v480_v30 = vunpack.c.l.bf16 %v663_v15  ;;  %v460_v31 = vunpack.c.l.bf16 %v668_v16  ;;  %v465_v37 = vunpack.c.h.bf16 %v658_v14 }
   0x8   :  { %v476_v36 = vunpack.c.l.bf16 %v678_v21  ;;  %v481_v42 = vunpack.c.h.bf16 %v663_v15  ;;  %v461_v43 = vunpack.c.h.bf16 %v668_v16 }
   0xa   :  { %551 = vmatmul.mubr.msk.bf16.vlgmr.msra.gmra.mrb[0].mxu0 %vm97_vm0, %v574_v4  ;;  %559 = vmatmul.mubr.msk.bf16.vlgmr.msra.gmra.mrb[0].mxu1 %vm97_vm0, %v575_v5 }
   0xb   :  { %554 = vmatprep.mubr.msk.bf16.mxu0 %vm97_vm0, %v576_v6  ;;  %562 = vmatprep.mubr.msk.bf16.mxu1 %vm97_vm0, %v577_v7 }
  0x12   :  { %555 = vmatmul.mubr.msk.bf16.gmra.mrb[4].mxu0 %vm97_vm0, %v578_v8  ;;  %563 = vmatmul.mubr.msk.bf16.gmra.mrb[4].mxu1 %vm97_vm0, %v579_v9 }
  0xdd   :  { %v552_v26 = vpop.f32.mrb[0].mxu0  ;;  %v560_v27 = vpop.f32.mrb[0].mxu1 }
  0xde   :  { %v165_v32 = vadd.f32 %v552_v26, %v673_v17  ;;  %v197_v33 = vadd.f32 %v560_v27, %v673_v17  ;;  %v156_v34 = vpop.f32.mrb[1].mxu0  ;;  %v188_v35 = vpop.f32.mrb[1].mxu1 }
  0xdf   :  { %v157_v38 = vadd.f32 %v673_v17, %v156_v34  ;;  %v189_v39 = vadd.f32 %v673_v17, %v188_v35  ;;  %v553_v40 = vpop.f32.mrb[2].mxu0  ;;  %v561_v41 = vpop.f32.mrb[2].mxu1 }
  0xe0   :  { %v253_v44 = vadd.f32 %v456_v18, %v165_v32  ;;  %v261_v45 = vadd.f32 %v472_v19, %v197_v33  ;;  %v168_v46 = vadd.f32 %v553_v40, %v673_v17  ;;  %v200_v47 = vadd.f32 %v561_v41, %v673_v17  ;;  %v159_v48 = vpop.f32.mrb[3].mxu0  ;;  %v191_v49 = vpop.f32.mrb[3].mxu1 }
  0xe1   :  { %v251_v50 = vadd.f32 %v452_v20, %v157_v38  ;;  %v259_v51 = vadd.f32 %v468_v22, %v189_v39  ;;  %v160_v52 = vadd.f32 %v673_v17, %v159_v48  ;;  %v192_v53 = vadd.f32 %v673_v17, %v191_v49 }
  0xe2   :  { %vm269_vm1 = vcmp.ge.f32.partialorder %v253_v44, 0.0  ;;  %v285_v54 = vmul.f32 0.1, %v253_v44  ;;  %vm277_vm2 = vcmp.ge.f32.partialorder %v261_v45, 0.0  ;;  %v293_v55 = vmul.f32 0.1, %v261_v45 }
  0xe3   :  { %vm267_vm3 = vcmp.ge.f32.partialorder %v251_v50, 0.0  ;;  %v283_v56 = vmul.f32 0.1, %v251_v50  ;;  %vm275_vm4 = vcmp.ge.f32.partialorder %v259_v51, 0.0  ;;  %v291_v57 = vmul.f32 0.1, %v259_v51 }
  0xe4   :  { %v301_v58 = vsel %vm269_vm1, %v253_v44, %v285_v54  ;;  %v309_v59 = vsel %vm277_vm2, %v261_v45, %v293_v55  ;;  %v254_v60 = vadd.f32 %v457_v23, %v168_v46  ;;  %v262_v61 = vadd.f32 %v473_v24, %v200_v47 }
  0xe5   :  { %v299_v62 = vsel %vm267_vm3, %v251_v50, %v283_v56  ;;  %v307_v63 = vsel %vm275_vm4, %v259_v51, %v291_v57  ;;  %v252_v0 = vadd.f32 %v453_v25, %v160_v52  ;;  %v260_v1 = vadd.f32 %v469_v28, %v192_v53  ;;  %v556_v2 = vpop.f32.mrb[4].mxu0  ;;  %v564_v3 = vpop.f32.mrb[4].mxu1 }
  0xe6   :  { %vm270_vm5 = vcmp.ge.f32.partialorder %v254_v60, 0.0  ;;  %v286_v4 = vmul.f32 0.1, %v254_v60  ;;  %vm278_vm6 = vcmp.ge.f32.partialorder %v262_v61, 0.0  ;;  %v294_v5 = vmul.f32 0.1, %v262_v61 }
  0xe7   :  { %vm268_vm7 = vcmp.ge.f32.partialorder %v252_v0, 0.0  ;;  %v284_v6 = vmul.f32 0.1, %v252_v0  ;;  %vm276_vm8 = vcmp.ge.f32.partialorder %v260_v1, 0.0  ;;  %v292_v7 = vmul.f32 0.1, %v260_v1 }
  0xe8   :  { %v302_v8 = vsel %vm270_vm5, %v254_v60, %v286_v4  ;;  %v310_v9 = vsel %vm278_vm6, %v262_v61, %v294_v5  ;;  %v181_v10 = vadd.f32 %v556_v2, %v673_v17  ;;  %v213_v11 = vadd.f32 %v564_v3, %v673_v17  ;;  %v172_v12 = vpop.f32.mrb[5].mxu0  ;;  %v204_v13 = vpop.f32.mrb[5].mxu1 }
  0xe9   :  { %v490_v18 = vpack.c.bf16 %v302_v8, %v301_v58  ;;  %v510_v19 = vpack.c.bf16 %v310_v9, %v309_v59  ;;  %v300_v20 = vsel %vm268_vm7, %v252_v0, %v284_v6  ;;  %v308_v22 = vsel %vm276_vm8, %v260_v1, %v292_v7  ;;  %v557_v23 = vpop.f32.mrb[6].mxu0  ;;  %v565_v24 = vpop.f32.mrb[6].mxu1 }
  0xea   :  { %v485_v25 = vpack.c.bf16 %v300_v20, %v299_v62  ;;  %v505_v26 = vpack.c.bf16 %v308_v22, %v307_v63  ;;  %v257_v27 = vadd.f32 %v464_v29, %v181_v10  ;;  %v265_v28 = vadd.f32 %v480_v30, %v213_v11  ;;  %v175_v32 = vpop.f32.mrb[7].mxu0  ;;  %v207_v33 = vpop.f32.mrb[7].mxu1 }
  0xeb   :  { %529 = vst [vmem:[%s746_s4 + $0x8] sm:$0xff] %v490_v18   ;;  %533 = vst [vmem:[%s746_s4 + $0x28] sm:$0xff] %v510_v19   ;;  %v173_v34 = vadd.f32 %v673_v17, %v172_v12  ;;  %v205_v35 = vadd.f32 %v673_v17, %v204_v13  ;;  %v184_v38 = vadd.f32 %v557_v23, %v673_v17  ;;  %v477_v45 = vunpack.c.h.bf16 %v678_v21 }
  0xec   :  { %v216_v29 = vadd.f32 %v565_v24, %v673_v17  ;;  %486 = vst [vmem:[%s746_s4] sm:$0xff] %v485_v25   ;;  %532 = vst [vmem:[%s746_s4 + $0x20] sm:$0xff] %v505_v26   ;;  %vm273_vm9 = vcmp.ge.f32.partialorder %v257_v27, 0.0  ;;  %v289_v30 = vmul.f32 0.1, %v257_v27  ;;  %vm281_vm10 = vcmp.ge.f32.partialorder %v265_v28, 0.0 }
  0xed   :  { %v297_v39 = vmul.f32 0.1, %v265_v28  ;;  %v255_v40 = vadd.f32 %v460_v31, %v173_v34  ;;  %v258_v41 = vadd.f32 %v465_v37, %v184_v38  ;;  %v263_v46 = vadd.f32 %v476_v36, %v205_v35 }
  0xee   :  { %v266_v44 = vadd.f32 %v481_v42, %v216_v29  ;;  %v176_v47 = vadd.f32 %v673_v17, %v175_v32  ;;  %v208_v48 = vadd.f32 %v673_v17, %v207_v33  ;;  %v305_v49 = vsel %vm273_vm9, %v257_v27, %v289_v30 }
  0xef   :  { %v313_v50 = vsel %vm281_vm10, %v265_v28, %v297_v39  ;;  %vm274_vm11 = vcmp.ge.f32.partialorder %v258_v41, 0.0  ;;  %v290_v51 = vmul.f32 0.1, %v258_v41  ;;  %vm271_vm13 = vcmp.ge.f32.partialorder %v255_v40, 0.0 }
  0xf0   :  { %vm282_vm12 = vcmp.ge.f32.partialorder %v266_v44, 0.0  ;;  %v298_v31 = vmul.f32 0.1, %v266_v44  ;;  %v287_v14 = vmul.f32 0.1, %v255_v40  ;;  %v256_v15 = vadd.f32 %v461_v43, %v176_v47 }
  0xf1   :  { %v264_v37 = vadd.f32 %v477_v45, %v208_v48  ;;  %vm279_vm14 = vcmp.ge.f32.partialorder %v263_v46, 0.0  ;;  %v295_v42 = vmul.f32 0.1, %v263_v46  ;;  %v306_v21 = vsel %vm274_vm11, %v258_v41, %v290_v51 }
  0xf2   :  { %v314_v36 = vsel %vm282_vm12, %v266_v44, %v298_v31  ;;  %v500_v52 = vpack.c.bf16 %v306_v21, %v305_v49  ;;  %vm272_vm15 = vcmp.ge.f32.partialorder %v256_v15, 0.0  ;;  %v288_v17 = vmul.f32 0.1, %v256_v15 }
  0xf3   :  { %v520_v53 = vpack.c.bf16 %v314_v36, %v313_v50  ;;  %vm280_vm0 = vcmp.ge.f32.partialorder %v264_v37, 0.0  ;;  %v296_v54 = vmul.f32 0.1, %v264_v37  ;;  %v303_v55 = vsel %vm271_vm13, %v255_v40, %v287_v14 }
  0xf4   :  { %531 = vst [vmem:[%s746_s4 + $0x18] sm:$0xff] %v500_v52   ;;  %v304_v16 = vsel %vm272_vm15, %v256_v15, %v288_v17  ;;  %v311_v43 = vsel %vm279_vm14, %v263_v46, %v295_v42 }
  0xf5   :  { %535 = vst [vmem:[%s746_s4 + $0x38] sm:$0xff] %v520_v53   ;;  %v495_v56 = vpack.c.bf16 %v304_v16, %v303_v55  ;;  %v312_v57 = vsel %vm280_vm0, %v264_v37, %v296_v54 }
  0xf6   :  { %v515_v58 = vpack.c.bf16 %v312_v57, %v311_v43 }
  0xf7   :  { %530 = vst [vmem:[%s746_s4 + $0x10] sm:$0xff] %v495_v56  }
  0xf8   :  { %534 = vst [vmem:[%s746_s4 + $0x30] sm:$0xff] %v515_v58  }

// kernel: baseline_forward.25
= control target key start
LH: loop header
LB: loop body
LE: loop exit
PB: predicated region body
PF: predicated region fallthrough
CT: control target
= control target key end

     0   :  { %s2678_s12 = smov 0   ;;  %s3331_s0 = inlined_call_operand.vmem [shape: bf16[2,130,32], index: 0, kind: input, shape index: {}]   ;;  %s3332_s1 = inlined_call_operand.vmem [shape: bf16[3,3,32,32], index: 1, kind: input, shape index: {}]   ;;  %s3333_s2 = inlined_call_operand.vmem [shape: f32[1,32], index: 2, kind: input, shape index: {}]   ;;  %s3334_s3 = inlined_call_operand.vmem [shape: bf16[2,100,32], index: 3, kind: output, shape index: {}]  }
   0x1 LB: > { %s2030_s13 = sadd.s32 4294967295, %s2654_s12   ;;  %p2034_p0 = scmp.ge.s32.totalorder %s2654_s12, 1  ;;  %s2654_s12 = sphi %s2678_s12, %s13_s12  }
   0x2   : > { %p137_p1 = scmp.lt.s32.totalorder %s2654_s12, 3 }
   0x4   : > { %p138_p2 = pnand %p2034_p0, %p137_p1 }
   0x5   : > { %v2597_v0 = vld [vmem:[%s3332_s1 + $0x10] sm:$0xff] (!%p138_p2)   ;;  %v2656_v1 = vmov (!%p138_p2), 0.0   ;;  %v2598_v2 = vld [vmem:[%s3332_s1 + $0x18] sm:$0xff] (!%p138_p2)   ;;  %p161_p3 = scmp.lt.s32.totalorder (!%p138_p2), %s2030_s13, 1  ;;  %vm2657_vm0 = vmmov (!%p138_p2), 0   ;;  %vm296_vm2 = vcmask (!%p138_p2), 261120  }
   0x6   : > { %141 = sbr.rel (%p138_p2) target bundleno = 497 (0x1f1), region = 32  ;;  %2293 = vmatprep.subr.bf16.mxu0 (!%p138_p2), %v2656_v1  ;;  %2581 = vmatprep.subr.bf16.mxu1 (!%p138_p2), %v2656_v1  ;;  %vm228_vm1 = vsmask.f32 (!%p138_p2), 7424  ;;  %v2603_v18 = vld [vmem:[%s3332_s1 + $0x20] sm:$0xff] (!%p138_p2)   ;;  %v2608_v34 = vld [vmem:[%s3332_s1 + $0x28] sm:$0xff] (!%p138_p2)   ;;  %v2610_v52 = vld [vmem:[%s3332_s1 + $0x30] sm:$0xff] (!%p138_p2)  }
   0x7   : > { %2294 = vmatpush3.bf16.msra.mxu0 (!%p138_p2), %v2597_v0  ;;  %2583 = vmatpush3.bf16.msra.mxu1 (!%p138_p2), %v2597_v0  ;;  %v2604_v27 = vld [vmem:[%s3332_s1] sm:$0xff] (!%p138_p2)   ;;  %v2609_v37 = vld [vmem:[%s3332_s1 + $0x8] sm:$0xff] (!%p138_p2)   ;;  %vm533_vm3 = vcmask (!%p138_p2), 1046528   ;;  %v2613_v56 = vld [vmem:[%s3332_s1 + $0x38] sm:$0xff] (!%p138_p2)   ;;  %vm888_vm4 = vsmask.f32 (!%p138_p2), 6400 }
   0x8   : > { %2295 = vmatprep.subr.bf16.mxu0 (!%p138_p2), %v2656_v1  ;;  %2582 = vmatprep.subr.bf16.mxu1 (!%p138_p2), %v2656_v1  ;;  %v2612_v55 = vld [vmem:[%s3332_s1 + $0x40] sm:$0xff] (!%p138_p2)   ;;  %v2614_v59 = vld [vmem:[%s3332_s1 + $0x48] sm:$0xff] (!%p138_p2)   ;;  %vm1094_vm5 = vcmask (!%p138_p2), 1045504   ;;  %vm1494_vm6 = vsmask.f32 (!%p138_p2), 5376  ;;  %vm1700_vm7 = vcmask (!%p138_p2), 1044480  }
   0x9   : > { %2297 = vmatprep.mubr.msk.bf16.mxu0 (!%p138_p2), %vm2657_vm0, %v2656_v1  ;;  %2313 = vmatprep.mubr.msk.bf16.mxu1 (!%p138_p2), %vm2657_vm0, %v2656_v1  ;;  %vm1960_vm9 = vcmask (!%p138_p2), 257024  }
   0xb   : > { %2296 = vmatpush3.bf16.msra.mxu0 (!%p138_p2), %v2598_v2  ;;  %2584 = vmatpush3.bf16.msra.mxu1 (!%p138_p2), %v2598_v2 }
   0xc   : > { %2357 = vmatprep.subr.bf16.mxu0 (!%p138_p2), %v2656_v1  ;;  %2325 = vmatprep.subr.bf16.mxu1 (!%p138_p2), %v2656_v1 }
   0xd   : > { %s3336_s13 = smov (!%p161_p3, %s2030_s13), 1 }
   0xe   : > { %s2585_s18 = smul.u32 68, %s3336_s13 }
   0xf   : > { %s2586_s4 = smul.u32 52, %s3336_s13 }
  0x10   : > { %s2708_s21 = scalar_lea.vmem %s3331_s0, %s2585_s18 }
  0x11   : > { %v172_v3 = vld [vmem:[%s2708_s21] sm:$0xf]  ;;  %v2712_v4 = vld [vmem:[%s2708_s21 + $0x4] sm:$0xf]  ;;  %v2718_v6 = vld [vmem:[%s2708_s21 + $0x8] sm:$0xff]   ;;  %s3281_s7 = scalar_lea.vmem %s3334_s3, %s2586_s4 }
  0x12   : > { %v2715_v5 = vcombine.low %v172_v3, %v2712_v4  ;;  %v237_v9 = vshll.u32 %v2718_v6, 16  ;;  %v2724_v10 = vld [vmem:[%s2708_s21 + $0x20] sm:$0xff]   ;;  %v2727_v11 = vld [vmem:[%s2708_s21 + $0x28] sm:$0xff]   ;;  %v2730_v12 = vld [vmem:[%s2708_s21 + $0x10] sm:$0xff]   ;;  %v241_v19 = vshrl.u32 %v2718_v6, 16  ;;  %v535_v54 = vrot.slane %v2718_v6, 1 }
  0x13   : > { %v261_v15 = vshll.u32 %v2724_v10, 16  ;;  %v265_v16 = vshrl.u32 %v2724_v10, 16  ;;  %v269_v17 = vshll.u32 %v2727_v11, 16  ;;  %v2740_v20 = vld [vmem:[%s2708_s21 + $0x30] ss:$0 sps:$4 sm:$0x77]  }
  0x14   : > { %v230_v7 = vshrl.u32 %v2715_v5, 16  ;;  %v232_v8 = vshll.u32 %v2715_v5, 16  ;;  %v239_v14 = vrot.slane %v237_v9, 1  ;;  %v245_v23 = vshll.u32 %v2730_v12, 16  ;;  %v2751_v30 = vld [vmem:[%s2708_s21 + $0x18] sm:$0xff]  }
  0x15   : > { %v263_v22 = vrot.slane %v261_v15, 1  ;;  %v271_v24 = vrot.slane %v269_v17, 1  ;;  %v273_v28 = vshrl.u32 %v2727_v11, 16  ;;  %v277_v29 = vshll.u32 %v2740_v20, 16  ;;  %v524_v49 = vld [vmem:[%s2708_s21] sm:$0xe] }
  0x16   : > { %v234_v13 = vrot.slane %v232_v8, 1  ;;  %v243_v32 = vor.u32 %v241_v19, %v239_v14  ;;  %v247_v33 = vrot.slane %v245_v23, 1  ;;  %v249_v38 = vshrl.u32 %v2730_v12, 16  ;;  %v2615_v8 = vld [vmem:[%s2708_s21 + $0x30] ss:$0 sps:$4 sm:$0x33]  }
  0x17   : > { %v267_v26 = vor.u32 %v265_v16, %v263_v22  ;;  %v275_v35 = vor.u32 %v273_v28, %v271_v24  ;;  %v279_v36 = vrot.slane %v277_v29, 1  ;;  %v253_v39 = vshll.u32 %v2751_v30, 16  ;;  %v2884_v23 = vld [vmem:[%s2708_s21 + $0x14] sm:$0xff]  }
  0x18   : > { %v235_v21 = vor.u32 %v234_v13, %v230_v7  ;;  %v248_v40 = vsel %vm228_vm1, %v243_v32, %v247_v33  ;;  %v251_v42 = vor.u32 %v249_v38, %v247_v33  ;;  %v281_v44 = vshrl.u32 %v2740_v20, 16  ;;  %v2624_v29 = vld [vmem:[%s3332_s1 + $0x58] sm:$0xff]  }
  0x19   : > { %v272_v31 = vsel %vm228_vm1, %v267_v26, %v271_v24  ;;  %v280_v41 = vsel %vm228_vm1, %v275_v35, %v279_v36  ;;  %v255_v43 = vrot.slane %v253_v39, 1  ;;  %v257_v46 = vshrl.u32 %v2751_v30, 16  ;;  %v2905_v35 = vld [vmem:[%s2708_s21 + $0x1c] sm:$0xff]   ;;  %v2625_v39 = vld [vmem:[%s3332_s1 + $0x68] sm:$0xff]  }
  0x1a   : > { %v240_v25 = vsel %vm228_vm1, %v235_v21, %v239_v14  ;;  %2314 = vmatmul.mubr.msk.bf16.vlgmr.msra.gmra.mrb[0].mxu1 %vm296_vm2, %v272_v31  ;;  %v283_v47 = vor.u32 %v281_v44, %v279_v36  ;;  %v2071_v50 = vcombine.low %v524_v49, %v2712_v4  ;;  %v537_v58 = vrot.slane %v2730_v12, 1  ;;  %v2620_v31 = vld [vmem:[%s3332_s1 + $0x60] sm:$0xff]  }
  0x1b   : > { %2298 = vmatmul.mubr.msk.bf16.vlgmr.msra.gmra.mrb[0].mxu0 %vm296_vm2, %v240_v25  ;;  %2326 = vmatpush3.bf16.msra.mxu1 %v2604_v27  ;;  %v256_v45 = vsel %vm228_vm1, %v251_v42, %v255_v43  ;;  %v259_v48 = vor.u32 %v257_v46, %v255_v43  ;;  %v539_v61 = vrot.slane %v2751_v30, 1  ;;  %v541_v63 = vrot.slane %v2724_v10, 1 }
  0x1c   : > { %2358 = vmatpush3.bf16.msra.mxu0 %v2603_v18  ;;  %2301 = vmatprep.mubr.msk.bf16.mxu0 %vm2657_vm0, %v2656_v1  ;;  %v534_v53 = vrot.slane %v2071_v50, 1  ;;  %v538_v60 = vsel %vm533_vm3, %v535_v54, %v537_v58  ;;  %v543_v2 = vrot.slane %v2727_v11, 1  ;;  %v545_v4 = vrot.slane %v2740_v20, 1 }
  0x1d   : > { %2359 = vmatprep.subr.bf16.mxu0 %v2656_v1  ;;  %2317 = vmatprep.mubr.msk.bf16.mxu1 %vm2657_vm0, %v2656_v1  ;;  %v264_v51 = vsel %vm228_vm1, %v259_v48, %v263_v22  ;;  %v540_v62 = vsel %vm533_vm3, %v537_v58, %v539_v61  ;;  %v542_v0 = vsel %vm533_vm3, %v539_v61, %v541_v63  ;;  %v2618_v22 = vld [vmem:[%s3332_s1 + $0x50] sm:$0xff]   ;;  %v907_v26 = vshrl.u32 %v2884_v23, 16 }
  0x1e   : > { %2327 = vmatprep.subr.bf16.mxu1 %v2656_v1  ;;  %v536_v57 = vsel %vm533_vm3, %v534_v53, %v535_v54  ;;  %v544_v3 = vsel %vm533_vm3, %v541_v63, %v543_v2  ;;  %v546_v7 = vsel %vm533_vm3, %v543_v2, %v545_v4  ;;  %v910_v27 = vshll.u32 %v2884_v23, 16  ;;  %v2939_v54 = vld [vmem:[%s2708_s21 + $0x2c] sm:$0xff]  }
  0x1f   : > { %2328 = vmatpush3.bf16.msra.mxu1 %v2609_v37  ;;  %v735_v28 = vrot.slane %v2884_v23, 1  ;;  %v909_v32 = vrot.slane %v907_v26, 1  ;;  %v916_v37 = vshrl.u32 %v2905_v35, 16  ;;  %v919_v38 = vshll.u32 %v2905_v35, 16  ;;  %v2632_v26 = vld [vmem:[%s3332_s1 + $0x80] sm:$0xff]  }
  0x20   : > { %2360 = vmatpush3.bf16.msra.mxu0 %v2608_v34  ;;  %2389 = vmatprep.subr.bf16.mxu1 %v2656_v1  ;;  %v912_v33 = vrot.slane %v910_v27, 2  ;;  %v741_v58 = vrot.slane %v2939_v54, 1  ;;  %v2633_v27 = vld [vmem:[%s2708_s21 + $0x18] sm:$0xff]  }
  0x21   : > { %2421 = vmatprep.subr.bf16.mxu0 %v2656_v1  ;;  %v918_v42 = vrot.slane %v916_v37, 1  ;;  %v921_v43 = vrot.slane %v919_v38, 2  ;;  %v2635_v37 = vld [vmem:[%s2708_s21 + $0x28] sm:$0xff]  }
  0x22   : > { %2318 = vmatmul.mubr.msk.bf16.gmra.mrb[4].mxu1 %vm296_vm2, %v280_v41  ;;  %v913_v36 = vor.u32 %v912_v33, %v909_v32  ;;  %v2634_v32 = vld [vmem:[%s2708_s21 + $0x20] sm:$0xff]  }
  0x23   : > { %2302 = vmatmul.mubr.msk.bf16.gmra.mrb[4].mxu0 %vm296_vm2, %v248_v40  ;;  %2321 = vmatprep.mubr.msk.bf16.mxu1 %vm2657_vm0, %v2656_v1  ;;  %v737_v40 = vrot.slane %v2905_v35, 1  ;;  %v922_v46 = vor.u32 %v921_v43, %v918_v42  ;;  %v2638_v42 = vld [vmem:[%s2708_s21 + $0x30] sm:$0xff]  }
  0x24   : > { %2305 = vmatprep.mubr.msk.bf16.mxu0 %vm2657_vm0, %v2656_v1 }
  0x25   : > { %v738_v44 = vsel %vm533_vm3, %v735_v28, %v737_v40  ;;  %v923_v50 = vsel %vm888_vm4, %v913_v36, %v922_v46 }
  0x2a   : > { %2322 = vmatmul.mubr.msk.bf16.gmra.mrb[8].mxu1 %vm296_vm2, %v283_v47 }
  0x2b   : > { %2306 = vmatmul.mubr.msk.bf16.gmra.mrb[8].mxu0 %vm296_vm2, %v256_v45  ;;  %2329 = vmatprep.mubr.msk.bf16.mxu1 %vm2657_vm0, %v2656_v1  ;;  %v2925_v45 = vld [vmem:[%s2708_s21 + $0x24] sm:$0xff]  }
  0x2c   : > { %2309 = vmatprep.mubr.msk.bf16.mxu0 %vm2657_vm0, %v2656_v1  ;;  %v925_v47 = vshrl.u32 %v2925_v45, 16  ;;  %v928_v48 = vshll.u32 %v2925_v45, 16  ;;  %v739_v49 = vrot.slane %v2925_v45, 1 }
  0x2e   : > { %v740_v53 = vsel %vm533_vm3, %v737_v40, %v739_v49  ;;  %v742_v63 = vsel %vm533_vm3, %v739_v49, %v741_v58  ;;  %v1104_v40 = vrot.slane %v2939_v54, 2  ;;  %v2639_v49 = vld [vmem:[%s2708_s21 + $0x38] ss:$0 sps:$4 sm:$0xff]  }
  0x32   : > { %2330 = vmatmul.mubr.msk.bf16.vlgmr.msra.gmra.mrb[12].mxu1 %vm296_vm2, %v2715_v5  ;;  %v681_v5 = vld [vmem:[%s2708_s21 + $0x4] sm:$0xe] }
  0x33   : > { %2310 = vmatmul.mubr.msk.bf16.gmra.mrb[12].mxu0 %vm296_vm2, %v264_v51  ;;  %2390 = vmatpush3.bf16.msra.mxu1 %v2610_v52  ;;  %v927_v51 = vrot.slane %v925_v47, 1  ;;  %v930_v52 = vrot.slane %v928_v48, 2  ;;  %v1441_v47 = vld [vmem:[%s2708_s21 + $0xc] sm:$0xf] }
  0x34   : > { %2361 = vmatprep.mubr.msk.bf16.mxu0 %vm2657_vm0, %v2656_v1  ;;  %2333 = vmatprep.mubr.msk.bf16.mxu1 %vm2657_vm0, %v2656_v1 }
  0x35   : > { %2391 = vmatprep.subr.bf16.mxu1 %v2656_v1 }
  0x37   : > { %2392 = vmatpush3.bf16.msra.mxu1 %v2613_v56  ;;  %v934_v56 = vshrl.u32 %v2939_v54, 16 }
  0x38   : > { %2453 = vmatprep.subr.bf16.mxu1 %v2656_v1 }
  0x3a   : > { %2334 = vmatmul.mubr.msk.bf16.gmra.mrb[16].mxu1 %vm296_vm2, %v2718_v6  ;;  %v2862_v6 = vld [vmem:[%s2708_s21 + $0x8] sm:$0xf] }
  0x3b   : > { %2362 = vmatmul.mubr.msk.bf16.vlgmr.msra.gmra.mrb[16].mxu0 %vm296_vm2, %v536_v57  ;;  %2337 = vmatprep.mubr.msk.bf16.mxu1 %vm2657_vm0, %v2656_v1  ;;  %v2085_v9 = vcombine.low %v681_v5, %v2862_v6  ;;  %v937_v57 = vshll.u32 %v2939_v54, 16 }
  0x3c   : > { %2422 = vmatpush3.bf16.msra.mxu0 %v2612_v55  ;;  %2365 = vmatprep.mubr.msk.bf16.mxu0 %vm2657_vm0, %v2656_v1  ;;  %v931_v55 = vor.u32 %v930_v52, %v927_v51  ;;  %v2641_v52 = vld [vmem:[%s2708_s21 + $0x10] sm:$0xff]  }
  0x3d   : > { %2423 = vmatprep.subr.bf16.mxu0 %v2656_v1  ;;  %v732_v15 = vrot.slane %v2085_v9, 1  ;;  %v939_v61 = vrot.slane %v937_v57, 2  ;;  %v1507_v57 = vshll.u32 %v2641_v52, 16 }
  0x40   : > { %2424 = vmatpush3.bf16.msra.mxu0 %v2614_v59  ;;  %v932_v59 = vsel %vm888_vm4, %v922_v46, %v931_v55  ;;  %v1440_v46 = vld [vmem:[%s2708_s21 + $0x8] sm:$0xc] }
  0x41   : > { %2485 = vmatprep.subr.bf16.mxu0 %v2656_v1  ;;  %v2153_v51 = vcombine.low %v1440_v46, %v1441_v47 }
  0x42   : > { %2338 = vmatmul.mubr.msk.bf16.gmra.mrb[20].mxu1 %vm296_vm2, %v2730_v12  ;;  %v893_v12 = vshll.u32 %v2085_v9, 16 }
  0x43   : > { %2366 = vmatmul.mubr.msk.bf16.gmra.mrb[20].mxu0 %vm296_vm2, %v538_v60  ;;  %2341 = vmatprep.mubr.msk.bf16.mxu1 %vm2657_vm0, %v2656_v1  ;;  %v936_v60 = vrot.slane %v934_v56, 1  ;;  %v1496_v54 = vshrl.u32 %v2153_v51, 16  ;;  %v1504_v56 = vshrl.u32 %v2641_v52, 16 }
  0x44   : > { %2369 = vmatprep.mubr.msk.bf16.mxu0 %vm2657_vm0, %v2656_v1  ;;  %v895_v18 = vrot.slane %v893_v12, 2 }
  0x45   : > { %v940_v2 = vor.u32 %v939_v61, %v936_v60  ;;  %v1506_v61 = vrot.slane %v1504_v56, 2 }
  0x4a   : > { %2342 = vmatmul.mubr.msk.bf16.gmra.mrb[24].mxu1 %vm296_vm2, %v2751_v30 }
  0x4b   : > { %2370 = vmatmul.mubr.msk.bf16.gmra.mrb[24].mxu0 %vm296_vm2, %v540_v62  ;;  %2345 = vmatprep.mubr.msk.bf16.mxu1 %vm2657_vm0, %v2656_v1  ;;  %v2952_v62 = vld [vmem:[%s2708_s21 + $0x34] ss:$0 sps:$4 sm:$0xff]  }
  0x4c   : > { %2373 = vmatprep.mubr.msk.bf16.mxu0 %vm2657_vm0, %v2656_v1 }
  0x52   : > { %2346 = vmatmul.mubr.msk.bf16.gmra.mrb[28].mxu1 %vm296_vm2, %v2724_v10  ;;  %v2868_v10 = vld [vmem:[%s2708_s21 + $0xc] sm:$0xff]  }
  0x53   : > { %2374 = vmatmul.mubr.msk.bf16.gmra.mrb[28].mxu0 %vm296_vm2, %v542_v0  ;;  %2349 = vmatprep.mubr.msk.bf16.mxu1 %vm2657_vm0, %v2656_v1  ;;  %v898_v13 = vshrl.u32 %v2868_v10, 16  ;;  %v901_v14 = vshll.u32 %v2868_v10, 16  ;;  %v733_v16 = vrot.slane %v2868_v10, 1  ;;  %v2626_v0 = vld [vmem:[%s2708_s21 + $0x34] ss:$0 sps:$4 sm:$0x77]  }
  0x54   : > { %2377 = vmatprep.mubr.msk.bf16.mxu0 %vm2657_vm0, %v2656_v1  ;;  %v743_v5 = vrot.slane %v2626_v0, 1  ;;  %v1691_v0 = vld [vmem:[%s2708_s21 + $0x8] sm:$0x8] }
  0x55   : > { %v900_v19 = vrot.slane %v898_v13, 1  ;;  %v903_v20 = vrot.slane %v901_v14, 2  ;;  %v734_v21 = vsel %vm533_vm3, %v732_v15, %v733_v16  ;;  %v736_v34 = vsel %vm533_vm3, %v733_v16, %v735_v28  ;;  %v1085_v13 = vld [vmem:[%s2708_s21 + $0x4] sm:$0xc] }
  0x56   : > { %v2119_v15 = vcombine.low %v1085_v13, %v2862_v6  ;;  %v2629_v6 = vld [vmem:[%s3332_s1 + $0x70] sm:$0xff]  }
  0x57   : > { %v904_v25 = vor.u32 %v903_v20, %v900_v19  ;;  %v2631_v19 = vld [vmem:[%s2708_s21 + $0x10] sm:$0xff]  }
  0x58   : > { %v1095_v16 = vrot.slane %v2119_v15, 2 }
  0x59   : > { %v914_v41 = vsel %vm888_vm4, %v904_v25, %v913_v36 }
  0x5a   : > { %2350 = vmatmul.mubr.msk.bf16.gmra.mrb[32].mxu1 %vm296_vm2, %v2727_v11  ;;  %v890_v11 = vshrl.u32 %v2085_v9, 16 }
  0x5b   : > { %2378 = vmatmul.mubr.msk.bf16.gmra.mrb[32].mxu0 %vm296_vm2, %v544_v3  ;;  %2353 = vmatprep.mubr.msk.bf16.mxu1 %vm2657_vm0, %v2656_v1  ;;  %v943_v3 = vshrl.u32 %v2952_v62, 16 }
  0x5c   : > { %2381 = vmatprep.mubr.msk.bf16.mxu0 %vm2657_vm0, %v2656_v1  ;;  %v892_v17 = vrot.slane %v890_v11, 1  ;;  %v744_v11 = vsel %vm533_vm3, %v741_v58, %v743_v5 }
  0x5e   : > { %v896_v24 = vor.u32 %v895_v18, %v892_v17  ;;  %v1096_v17 = vrot.slane %v2868_v10, 2  ;;  %v2630_v18 = vld [vmem:[%s2708_s21 + $0x8] sm:$0xfc]   ;;  %v1098_v10 = vrot.slane %v2884_v23, 2  ;;  %v1296_v23 = vrot.slane %v2633_v27, 2 }
  0x60   : > { %v905_v30 = vsel %vm888_vm4, %v896_v24, %v904_v25  ;;  %v1097_v20 = vsel %vm1094_vm5, %v1095_v16, %v1096_v17  ;;  %v2636_v24 = vld [vmem:[%s3332_s1 + $0x78] sm:$0xff]   ;;  %v1099_v28 = vsel %vm1094_vm5, %v1096_v17, %v1098_v10 }
  0x62   : > { %2354 = vmatmul.mubr.msk.bf16.gmra.mrb[36].mxu1 %vm296_vm2, %v2615_v8  ;;  %v945_v8 = vrot.slane %v943_v3, 1 }
  0x63   : > { %2382 = vmatmul.mubr.msk.bf16.gmra.mrb[36].mxu0 %vm296_vm2, %v546_v7  ;;  %2393 = vmatprep.mubr.msk.bf16.mxu1 %vm2657_vm0, %v2656_v1  ;;  %v941_v7 = vsel %vm888_vm4, %v931_v55, %v940_v2  ;;  %v1499_v55 = vshll.u32 %v2153_v51, 16 }
  0x64   : > { %2385 = vmatprep.mubr.msk.bf16.mxu0 %vm2657_vm0, %v2656_v1 }
  0x65   : > { %v1501_v60 = vrot.slane %v1499_v55, 3 }
  0x6a   : > { %2394 = vmatmul.mubr.msk.bf16.vlgmr.msra.gmra.mrb[40].mxu1 %vm296_vm2, %v734_v21  ;;  %v1293_v21 = vrot.slane %v2630_v18, 2 }
  0x6b   : > { %2386 = vmatmul.mubr.msk.bf16.gmra.mrb[40].mxu0 %vm296_vm2, %v545_v4  ;;  %2454 = vmatpush3.bf16.msra.mxu1 %v2618_v22  ;;  %v946_v4 = vshll.u32 %v2952_v62, 16  ;;  %v1294_v22 = vrot.slane %v2631_v19, 2 }
  0x6c   : > { %2425 = vmatprep.mubr.msk.bf16.mxu0 %vm2657_vm0, %v2656_v1  ;;  %2397 = vmatprep.mubr.msk.bf16.mxu1 %vm2657_vm0, %v2656_v1 }
  0x6d   : > { %2455 = vmatprep.subr.bf16.mxu1 %v2656_v1  ;;  %v948_v9 = vrot.slane %v946_v4, 2  ;;  %v1295_v25 = vsel %vm1094_vm5, %v1293_v21, %v1294_v22  ;;  %v3082_v21 = vld [vmem:[%s2708_s21 + $0x28] sm:$0xff]  }
  0x6f   : > { %2456 = vmatpush3.bf16.msra.mxu1 %v2624_v29  ;;  %v949_v12 = vor.u32 %v948_v9, %v945_v8  ;;  %v2637_v29 = vld [vmem:[%s3332_s1 + $0x88] sm:$0xff]  }
  0x70   : > { %2517 = vmatprep.subr.bf16.mxu1 %v2656_v1 }
  0x71   : > { %v950_v14 = vsel %vm888_vm4, %v940_v2, %v949_v12 }
  0x72   : > { %2398 = vmatmul.mubr.msk.bf16.gmra.mrb[44].mxu1 %vm296_vm2, %v736_v34  ;;  %v1298_v34 = vrot.slane %v2634_v32, 2 }
  0x73   : > { %2426 = vmatmul.mubr.msk.bf16.vlgmr.msra.gmra.mrb[44].mxu0 %vm296_vm2, %v905_v30  ;;  %2401 = vmatprep.mubr.msk.bf16.mxu1 %vm2657_vm0, %v2656_v1  ;;  %v1100_v30 = vrot.slane %v2905_v35, 2  ;;  %v1102_v35 = vrot.slane %v2925_v45, 2  ;;  %v1106_v45 = vrot.slane %v2952_v62, 2  ;;  %v1509_v62 = vrot.slane %v1507_v57, 3 }
  0x74   : > { %2486 = vmatpush3.bf16.msra.mxu0 %v2620_v31  ;;  %2429 = vmatprep.mubr.msk.bf16.mxu0 %vm2657_vm0, %v2656_v1  ;;  %v1297_v31 = vsel %vm1094_vm5, %v1294_v22, %v1296_v23  ;;  %v1299_v36 = vsel %vm1094_vm5, %v1296_v23, %v1298_v34 }
  0x75   : > { %2487 = vmatprep.subr.bf16.mxu0 %v2656_v1  ;;  %v1101_v33 = vsel %vm1094_vm5, %v1098_v10, %v1100_v30  ;;  %v1103_v38 = vsel %vm1094_vm5, %v1100_v30, %v1102_v35  ;;  %v1105_v43 = vsel %vm1094_vm5, %v1102_v35, %v1104_v40  ;;  %v1510_v3 = vor.u32 %v1509_v62, %v1506_v61 }
  0x78   : > { %2488 = vmatpush3.bf16.msra.mxu0 %v2625_v39  ;;  %v1300_v39 = vrot.slane %v2635_v37, 2 }
  0x79   : > { %2549 = vmatprep.subr.bf16.mxu0 %v2656_v1 }
  0x7a   : > { %2402 = vmatmul.mubr.msk.bf16.gmra.mrb[48].mxu1 %vm296_vm2, %v738_v44  ;;  %v1302_v44 = vrot.slane %v2638_v42, 2 }
  0x7b   : > { %2430 = vmatmul.mubr.msk.bf16.gmra.mrb[48].mxu0 %vm296_vm2, %v914_v41  ;;  %2405 = vmatprep.mubr.msk.bf16.mxu1 %vm2657_vm0, %v2656_v1  ;;  %v1301_v41 = vsel %vm1094_vm5, %v1298_v34, %v1300_v39 }
  0x7c   : > { %2433 = vmatprep.mubr.msk.bf16.mxu0 %vm2657_vm0, %v2656_v1  ;;  %v1303_v48 = vsel %vm1094_vm5, %v1300_v39, %v1302_v44 }
  0x82   : > { %2406 = vmatmul.mubr.msk.bf16.gmra.mrb[52].mxu1 %vm296_vm2, %v740_v53  ;;  %v1304_v53 = vrot.slane %v2639_v49, 2 }
  0x83   : > { %2434 = vmatmul.mubr.msk.bf16.gmra.mrb[52].mxu0 %vm296_vm2, %v923_v50  ;;  %2409 = vmatprep.mubr.msk.bf16.mxu1 %vm2657_vm0, %v2656_v1  ;;  %v1107_v50 = vsel %vm1094_vm5, %v1104_v40, %v1106_v45 }
  0x84   : > { %2437 = vmatprep.mubr.msk.bf16.mxu0 %vm2657_vm0, %v2656_v1  ;;  %v1305_v58 = vsel %vm1094_vm5, %v1302_v44, %v1304_v53 }
  0x8a   : > { %2410 = vmatmul.mubr.msk.bf16.gmra.mrb[56].mxu1 %vm296_vm2, %v742_v63  ;;  %v2642_v63 = vld [vmem:[%s2708_s21 + $0x18] sm:$0xff]  }
  0x8b   : > { %2438 = vmatmul.mubr.msk.bf16.gmra.mrb[56].mxu0 %vm296_vm2, %v932_v59  ;;  %2413 = vmatprep.mubr.msk.bf16.mxu1 %vm2657_vm0, %v2656_v1  ;;  %v1498_v59 = vrot.slane %v1496_v54, 2  ;;  %v1513_v4 = vshrl.u32 %v2642_v63, 16  ;;  %v1704_v22 = vrot.slane %v2642_v63, 3 }
  0x8c   : > { %2441 = vmatprep.mubr.msk.bf16.mxu0 %vm2657_vm0, %v2656_v1 }
  0x8d   : > { %v1502_v2 = vor.u32 %v1501_v60, %v1498_v59  ;;  %v1515_v9 = vrot.slane %v1513_v4, 2 }
  0x8f   : > { %v1511_v8 = vsel %vm1494_vm6, %v1502_v2, %v1510_v3 }
  0x92   : > { %2414 = vmatmul.mubr.msk.bf16.gmra.mrb[60].mxu1 %vm296_vm2, %v744_v11 }
  0x93   : > { %2442 = vmatmul.mubr.msk.bf16.gmra.mrb[60].mxu0 %vm296_vm2, %v941_v7  ;;  %2417 = vmatprep.mubr.msk.bf16.mxu1 %vm2657_vm0, %v2656_v1  ;;  %v2173_v7 = vcombine.low %v1691_v0, %v1441_v47  ;;  %v1708_v47 = vrot.slane %v3082_v21, 3 }
  0x94   : > { %2445 = vmatprep.mubr.msk.bf16.mxu0 %vm2657_vm0, %v2656_v1 }
  0x95   : > { %v1701_v13 = vrot.slane %v2173_v7, 3 }
  0x9a   : > { %2418 = vmatmul.mubr.msk.bf16.gmra.mrb[64].mxu1 %vm296_vm2, %v743_v5  ;;  %v1516_v5 = vshll.u32 %v2642_v63, 16 }
  0x9b   : > { %2446 = vmatmul.mubr.msk.bf16.gmra.mrb[64].mxu0 %vm296_vm2, %v950_v14  ;;  %2457 = vmatprep.mubr.msk.bf16.mxu1 %vm2657_vm0, %v2656_v1  ;;  %v1702_v14 = vrot.slane %v2641_v52, 3 }
  0x9c   : > { %2449 = vmatprep.mubr.msk.bf16.mxu0 %vm2657_vm0, %v2656_v1  ;;  %v1518_v11 = vrot.slane %v1516_v5, 3 }
  0x9d   : > { %v1703_v18 = vsel %vm1700_vm7, %v1701_v13, %v1702_v14 }
  0x9e   : > { %v1519_v15 = vor.u32 %v1518_v11, %v1515_v9 }
  0xa0   : > { %v1520_v19 = vsel %vm1494_vm6, %v1510_v3, %v1519_v15 }
  0xa2   : > { %2458 = vmatmul.mubr.msk.bf16.vlgmr.msra.gmra.mrb[68].mxu1 %vm296_vm2, %v1097_v20 }
  0xa3   : > { %2450 = vmatmul.mubr.msk.bf16.gmra.mrb[68].mxu0 %vm296_vm2, %v949_v12  ;;  %2518 = vmatpush3.bf16.msra.mxu1 %v2629_v6  ;;  %v3069_v12 = vld [vmem:[%s2708_s21 + $0x20] sm:$0xff]  }
  0xa4   : > { %2489 = vmatprep.mubr.msk.bf16.mxu0 %vm2657_vm0, %v2656_v1  ;;  %2461 = vmatprep.mubr.msk.bf16.mxu1 %vm2657_vm0, %v2656_v1  ;;  %v1522_v16 = vshrl.u32 %v3069_v12, 16  ;;  %v1525_v17 = vshll.u32 %v3069_v12, 16  ;;  %v1706_v30 = vrot.slane %v3069_v12, 3 }
  0xa5   : > { %2519 = vmatprep.subr.bf16.mxu1 %v2656_v1 }
  0xa6   : > { %v1524_v20 = vrot.slane %v1522_v16, 2  ;;  %v1527_v6 = vrot.slane %v1525_v17, 3  ;;  %v1709_v55 = vsel %vm1700_vm7, %v1706_v30, %v1708_v47 }
  0xa7   : > { %2520 = vmatpush3.bf16.msra.mxu1 %v2636_v24  ;;  %v1531_v24 = vshrl.u32 %v3082_v21, 16 }
  0xa8   : > { %v1528_v10 = vor.u32 %v1527_v6, %v1524_v20 }
  0xaa   : > { %2462 = vmatmul.mubr.msk.bf16.gmra.mrb[72].mxu1 %vm296_vm2, %v1099_v28  ;;  %v1529_v27 = vsel %vm1494_vm6, %v1519_v15, %v1528_v10  ;;  %v1533_v28 = vrot.slane %v1531_v24, 2 }
  0xab   : > { %2490 = vmatmul.mubr.msk.bf16.vlgmr.msra.gmra.mrb[72].mxu0 %vm296_vm2, %v1295_v25  ;;  %2465 = vmatprep.mubr.msk.bf16.mxu1 %vm2657_vm0, %v2656_v1  ;;  %v1534_v25 = vshll.u32 %v3082_v21, 16 }
  0xac   : > { %2550 = vmatpush3.bf16.msra.mxu0 %v2632_v26  ;;  %2493 = vmatprep.mubr.msk.bf16.mxu0 %vm2657_vm0, %v2656_v1  ;;  %v1705_v26 = vsel %vm1700_vm7, %v1702_v14, %v1704_v22 }
  0xad   : > { %2551 = vmatprep.subr.bf16.mxu0 %v2656_v1  ;;  %v1536_v23 = vrot.slane %v1534_v25, 3 }
  0xaf   : > { %v1537_v32 = vor.u32 %v1536_v23, %v1533_v28 }
  0xb0   : > { %2552 = vmatpush3.bf16.msra.mxu0 %v2637_v29  ;;  %v3095_v29 = vld [vmem:[%s2708_s21 + $0x30] sm:$0xff]  }
  0xb1   : > { %v1543_v34 = vshll.u32 %v3095_v29, 16  ;;  %v1538_v42 = vsel %vm1494_vm6, %v1528_v10, %v1537_v32  ;;  %v1710_v63 = vrot.slane %v3095_v29, 3 }
  0xb2   : > { %2466 = vmatmul.mubr.msk.bf16.gmra.mrb[76].mxu1 %vm296_vm2, %v1101_v33  ;;  %v1540_v33 = vshrl.u32 %v3095_v29, 16 }
  0xb3   : > { %2494 = vmatmul.mubr.msk.bf16.gmra.mrb[76].mxu0 %vm296_vm2, %v1297_v31  ;;  %2469 = vmatprep.mubr.msk.bf16.mxu1 %vm2657_vm0, %v2656_v1  ;;  %v1545_v44 = vrot.slane %v1543_v34, 3  ;;  %v1711_v7 = vsel %vm1700_vm7, %v1708_v47, %v1710_v63 }
  0xb4   : > { %2497 = vmatprep.mubr.msk.bf16.mxu0 %vm2657_vm0, %v2656_v1 }
  0xba   : > { %2470 = vmatmul.mubr.msk.bf16.gmra.mrb[80].mxu1 %vm296_vm2, %v1103_v38  ;;  %v1707_v38 = vsel %vm1700_vm7, %v1704_v22, %v1706_v30 }
  0xbb   : > { %2498 = vmatmul.mubr.msk.bf16.gmra.mrb[80].mxu0 %vm296_vm2, %v1299_v36  ;;  %2473 = vmatprep.mubr.msk.bf16.mxu1 %vm2657_vm0, %v2656_v1 }
  0xbc   : > { %2501 = vmatprep.mubr.msk.bf16.mxu0 %vm2657_vm0, %v2656_v1 }
  0xc2   : > { %2474 = vmatmul.mubr.msk.bf16.gmra.mrb[84].mxu1 %vm296_vm2, %v1105_v43  ;;  %v1542_v43 = vrot.slane %v1540_v33, 2 }
  0xc3   : > { %2502 = vmatmul.mubr.msk.bf16.gmra.mrb[84].mxu0 %vm296_vm2, %v1301_v41  ;;  %2477 = vmatprep.mubr.msk.bf16.mxu1 %vm2657_vm0, %v2656_v1 }
  0xc4   : > { %2505 = vmatprep.mubr.msk.bf16.mxu0 %vm2657_vm0, %v2656_v1  ;;  %v1546_v49 = vor.u32 %v1545_v44, %v1542_v43 }
  0xc6   : > { %v1547_v59 = vsel %vm1494_vm6, %v1537_v32, %v1546_v49 }
  0xca   : > { %2478 = vmatmul.mubr.msk.bf16.gmra.mrb[88].mxu1 %vm296_vm2, %v1107_v50 }
  0xcb   : > { %2506 = vmatmul.mubr.msk.bf16.gmra.mrb[88].mxu0 %vm296_vm2, %v1303_v48  ;;  %2481 = vmatprep.mubr.msk.bf16.mxu1 %vm2657_vm0, %v2656_v1 }
  0xcc   : > { %2509 = vmatprep.mubr.msk.bf16.mxu0 %vm2657_vm0, %v2656_v1 }
  0xd2   : > { %2482 = vmatmul.mubr.msk.bf16.gmra.mrb[92].mxu1 %vm296_vm2, %v1106_v45  ;;  %v3115_v45 = vld [vmem:[%s2708_s21 + $0x38] sm:$0x1f]  }
  0xd3   : > { %2510 = vmatmul.mubr.msk.bf16.gmra.mrb[92].mxu0 %vm296_vm2, %v1305_v58  ;;  %2521 = vmatprep.mubr.msk.bf16.mxu1 %vm2657_vm0, %v2656_v1  ;;  %v1549_v50 = vshrl.u32 %v3115_v45, 16  ;;  %v1552_v51 = vshll.u32 %v3115_v45, 16  ;;  %v1712_v14 = vrot.slane %v3115_v45, 3 }
  0xd4   : > { %2513 = vmatprep.mubr.msk.bf16.mxu0 %vm2657_vm0, %v2656_v1 }
  0xd5   : > { %v1551_v60 = vrot.slane %v1549_v50, 2  ;;  %v1554_v61 = vrot.slane %v1552_v51, 3 }
  0xd7   : > { %v1555_v2 = vor.u32 %v1554_v61, %v1551_v60 }
  0xd9   : > { %v1556_v12 = vsel %vm1494_vm6, %v1546_v49, %v1555_v2  ;;  %vm1973_vm6 = vcmask 254976  }
  0xda   : > { %2522 = vmatmul.mubr.msk.bf16.vlgmr.msra.gmra.mrb[96].mxu1 %vm296_vm2, %v1511_v8 }
  0xdb   : > { %2514 = vmatmul.mubr.msk.bf16.gmra.mrb[96].mxu0 %vm296_vm2, %v1304_v53  ;;  %2525 = vmatprep.mubr.msk.bf16.mxu1 %vm2657_vm0, %v2656_v1 }
  0xdc   : > { %2553 = vmatprep.mubr.msk.bf16.mxu0 %vm2657_vm0, %v2656_v1 }
  0xe2   : > { %2526 = vmatmul.mubr.msk.bf16.gmra.mrb[100].mxu1 %vm296_vm2, %v1520_v19  ;;  %v1713_v19 = vsel %vm1700_vm7, %v1710_v63, %v1712_v14 }
  0xe3   : > { %2554 = vmatmul.mubr.msk.bf16.vlgmr.msra.gmra.mrb[100].mxu0 %vm296_vm2, %v1703_v18  ;;  %2529 = vmatprep.mubr.msk.bf16.mxu1 %vm2657_vm0, %v2656_v1 }
  0xe4   : > { %2557 = vmatprep.mubr.msk.bf16.mxu0 %vm2657_vm0, %v2656_v1 }
  0xea   : > { %2530 = vmatmul.mubr.msk.bf16.gmra.mrb[104].mxu1 %vm296_vm2, %v1529_v27 }
  0xeb   : > { %2558 = vmatmul.mubr.msk.bf16.gmra.mrb[104].mxu0 %vm296_vm2, %v1705_v26  ;;  %2533 = vmatprep.mubr.msk.bf16.mxu1 %vm2657_vm0, %v2656_v1 }
  0xec   : > { %2561 = vmatprep.mubr.msk.bf16.mxu0 %vm2657_vm0, %v2656_v1 }
  0xed   : > { %v3108_v37 = vpop.f32.mrb[0].mxu1 }
  0xee   : > { %v3102_v31 = vpop.f32.mrb[0].mxu0  ;;  %v2315_v40 = vpop.f32.mrb[1].mxu1 }
  0xef   : > { %v2299_v35 = vpop.f32.mrb[1].mxu0  ;;  %v3111_v41 = vpop.f32.mrb[2].mxu1 }
  0xf0   : > { %v355_v36 = vpop.f32.mrb[2].mxu0  ;;  %v2316_v46 = vpop.f32.mrb[3].mxu1 }
  0xf1   : > { %v2300_v39 = vpop.f32.mrb[3].mxu0 }
  0xf2   : > { %2534 = vmatmul.mubr.msk.bf16.gmra.mrb[108].mxu1 %vm296_vm2, %v1538_v42 }
  0xf3   : > { %2562 = vmatmul.mubr.msk.bf16.gmra.mrb[108].mxu0 %vm296_vm2, %v1707_v38  ;;  %2537 = vmatprep.mubr.msk.bf16.mxu1 %vm2657_vm0, %v2656_v1 }
  0xf4   : > { %2565 = vmatprep.mubr.msk.bf16.mxu0 %vm2657_vm0, %v2656_v1 }
  0xf5   : > { %v3126_v54 = vpop.f32.mrb[4].mxu1 }
  0xf6   : > { %v360_v48 = vpop.f32.mrb[4].mxu0  ;;  %v2319_v57 = vpop.f32.mrb[5].mxu1 }
  0xf7   : > { %v2303_v52 = vpop.f32.mrb[5].mxu0  ;;  %v3129_v58 = vpop.f32.mrb[6].mxu1 }
  0xf8   : > { %v363_v53 = vpop.f32.mrb[6].mxu0  ;;  %v2320_v62 = vpop.f32.mrb[7].mxu1 }
  0xf9   : > { %v2304_v56 = vpop.f32.mrb[7].mxu0 }
  0xfa   : > { %2538 = vmatmul.mubr.msk.bf16.gmra.mrb[112].mxu1 %vm296_vm2, %v1547_v59 }
  0xfb   : > { %2566 = vmatmul.mubr.msk.bf16.gmra.mrb[112].mxu0 %vm296_vm2, %v1709_v55  ;;  %2541 = vmatprep.mubr.msk.bf16.mxu1 %vm2657_vm0, %v2656_v1 }
  0xfc   : > { %2569 = vmatprep.mubr.msk.bf16.mxu0 %vm2657_vm0, %v2656_v1 }
  0xfd   : > { %v3139_v5 = vpop.f32.mrb[8].mxu1 }
  0xfe   : > { %v368_v0 = vpop.f32.mrb[8].mxu0  ;;  %v2323_v9 = vpop.f32.mrb[9].mxu1 }
  0xff   : > { %v2307_v3 = vpop.f32.mrb[9].mxu0  ;;  %v403_v11 = vpop.f32.mrb[10].mxu1 }
 0x100   : > { %v371_v4 = vpop.f32.mrb[10].mxu0  ;;  %v2324_v13 = vpop.f32.mrb[11].mxu1 }
 0x101   : > { %v2308_v8 = vpop.f32.mrb[11].mxu0 }
 0x102   : > { %2542 = vmatmul.mubr.msk.bf16.gmra.mrb[116].mxu1 %vm296_vm2, %v1556_v12 }
 0x103   : > { %2570 = vmatmul.mubr.msk.bf16.gmra.mrb[116].mxu0 %vm296_vm2, %v1711_v7  ;;  %2545 = vmatprep.mubr.msk.bf16.mxu1 %vm2657_vm0, %v2656_v1 }
 0x104   : > { %2573 = vmatprep.mubr.msk.bf16.mxu0 %vm2657_vm0, %v2656_v1 }
 0x105   : > { %v470_v17 = vpop.f32.mrb[12].mxu1 }
 0x106   : > { %v376_v15 = vpop.f32.mrb[12].mxu0  ;;  %v471_v20 = vadd.f32 %v470_v17, %v3102_v31  ;;  %v2331_v6 = vpop.f32.mrb[13].mxu1 }
 0x107   : > { %v2311_v16 = vpop.f32.mrb[13].mxu0  ;;  %v473_v22 = vpop.f32.mrb[14].mxu1 }
 0x108   : > { %v379_v18 = vpop.f32.mrb[14].mxu0  ;;  %v474_v10 = vadd.f32 %v473_v22, %v355_v36  ;;  %v2332_v24 = vpop.f32.mrb[15].mxu1 }
 0x109   : > { %v2312_v21 = vpop.f32.mrb[15].mxu0 }
 0x10a   : > { %2546 = vmatmul.mubr.msk.bf16.gmra.mrb[120].mxu1 %vm296_vm2, %v1555_v2 }
 0x10b   : > { %2574 = vmatmul.mubr.msk.bf16.gmra.mrb[120].mxu0 %vm296_vm2, %v1713_v19 }
 0x10c   : > { %2577 = vmatprep.mubr.msk.bf16.mxu0 %vm2657_vm0, %v2656_v1 }
 0x10d   : > { %v478_v28 = vpop.f32.mrb[16].mxu1 }
 0x10e   : > { %v614_v25 = vpop.f32.mrb[16].mxu0  ;;  %v479_v29 = vadd.f32 %v478_v28, %v360_v48  ;;  %v2335_v30 = vpop.f32.mrb[17].mxu1 }
 0x10f   : > { %v3156_v26 = vadd.f32 %v614_v25, %v471_v20  ;;  %v2363_v27 = vpop.f32.mrb[17].mxu0  ;;  %v481_v33 = vpop.f32.mrb[18].mxu1 }
 0x110   : > { %v617_v23 = vpop.f32.mrb[18].mxu0  ;;  %v482_v34 = vadd.f32 %v481_v33, %v363_v53  ;;  %v2336_v35 = vpop.f32.mrb[19].mxu1 }
 0x111   : > { %v3158_v31 = vadd.f32 %v617_v23, %v474_v10  ;;  %v2364_v32 = vpop.f32.mrb[19].mxu0 }
 0x113   : > { %2578 = vmatmul.mubr.msk.bf16.gmra.mrb[124].mxu0 %vm296_vm2, %v1712_v14 }
 0x115   : > { %v486_v39 = vpop.f32.mrb[20].mxu1 }
 0x116   : > { %v622_v36 = vpop.f32.mrb[20].mxu0  ;;  %v487_v42 = vadd.f32 %v486_v39, %v368_v0  ;;  %v2339_v43 = vpop.f32.mrb[21].mxu1 }
 0x117   : > { %v3161_v1 = vadd.f32 %v622_v36, %v479_v29  ;;  %v2367_v38 = vpop.f32.mrb[21].mxu0  ;;  %v489_v46 = vpop.f32.mrb[22].mxu1 }
 0x118   : > { %v625_v40 = vpop.f32.mrb[22].mxu0  ;;  %v490_v47 = vadd.f32 %v489_v46, %v371_v4  ;;  %v2340_v48 = vpop.f32.mrb[23].mxu1 }
 0x119   : > { %v3163_v44 = vadd.f32 %v625_v40, %v482_v34  ;;  %v2368_v45 = vpop.f32.mrb[23].mxu0 }
 0x11d   : > { %v494_v52 = vpop.f32.mrb[24].mxu1 }
 0x11e   : > { %v630_v49 = vpop.f32.mrb[24].mxu0  ;;  %v495_v55 = vadd.f32 %v494_v52, %v376_v15  ;;  %v2343_v56 = vpop.f32.mrb[25].mxu1 }
 0x11f   : > { %v3165_v50 = vadd.f32 %v630_v49, %v487_v42  ;;  %v2371_v51 = vpop.f32.mrb[25].mxu0  ;;  %v497_v60 = vpop.f32.mrb[26].mxu1 }
 0x120   : > { %v633_v53 = vpop.f32.mrb[26].mxu0  ;;  %v498_v61 = vadd.f32 %v497_v60, %v379_v18  ;;  %v2344_v62 = vpop.f32.mrb[27].mxu1 }
 0x121   : > { %v3167_v57 = vadd.f32 %v633_v53, %v490_v47  ;;  %v2372_v59 = vpop.f32.mrb[27].mxu0 }
 0x125   : > { %v502_v3 = vpop.f32.mrb[28].mxu1 }
 0x126   : > { %v638_v63 = vpop.f32.mrb[28].mxu0  ;;  %v503_v7 = vadd.f32 %v502_v3, %v3108_v37  ;;  %v2347_v8 = vpop.f32.mrb[29].mxu1 }
 0x127   : > { %v3169_v0 = vadd.f32 %v638_v63, %v495_v55  ;;  %v2375_v2 = vpop.f32.mrb[29].mxu0  ;;  %v505_v12 = vpop.f32.mrb[30].mxu1 }
 0x128   : > { %v641_v4 = vpop.f32.mrb[30].mxu0  ;;  %v506_v13 = vadd.f32 %v505_v12, %v3111_v41  ;;  %v2348_v14 = vpop.f32.mrb[31].mxu1 }
 0x129   : > { %v3172_v9 = vadd.f32 %v641_v4, %v498_v61  ;;  %v2376_v11 = vpop.f32.mrb[31].mxu0 }
 0x12d   : > { %v510_v18 = vpop.f32.mrb[32].mxu1 }
 0x12e   : > { %v646_v15 = vpop.f32.mrb[32].mxu0  ;;  %v511_v20 = vadd.f32 %v510_v18, %v3126_v54  ;;  %v2351_v6 = vpop.f32.mrb[33].mxu1 }
 0x12f   : > { %v3175_v16 = vadd.f32 %v646_v15, %v503_v7  ;;  %v2379_v17 = vpop.f32.mrb[33].mxu0  ;;  %v513_v22 = vpop.f32.mrb[34].mxu1 }
 0x130   : > { %v649_v19 = vpop.f32.mrb[34].mxu0  ;;  %v514_v10 = vadd.f32 %v513_v22, %v3129_v58  ;;  %v2352_v24 = vpop.f32.mrb[35].mxu1 }
 0x131   : > { %v3178_v21 = vadd.f32 %v649_v19, %v506_v13  ;;  %v2380_v37 = vpop.f32.mrb[35].mxu0 }
 0x135   : > { %v518_v28 = vpop.f32.mrb[36].mxu1 }
 0x136   : > { %v654_v25 = vpop.f32.mrb[36].mxu0  ;;  %v519_v29 = vadd.f32 %v518_v28, %v3139_v5  ;;  %v2355_v54 = vpop.f32.mrb[37].mxu1 }
 0x137   : > { %v3181_v27 = vadd.f32 %v654_v25, %v511_v20  ;;  %v2383_v41 = vpop.f32.mrb[37].mxu0  ;;  %v521_v33 = vpop.f32.mrb[38].mxu1 }
 0x138   : > { %v657_v23 = vpop.f32.mrb[38].mxu0  ;;  %v2356_v34 = vpop.f32.mrb[39].mxu1 }
 0x139   : > { %v3184_v30 = vadd.f32 %v657_v23, %v514_v10  ;;  %v2384_v32 = vpop.f32.mrb[39].mxu0 }
 0x13d   : > { %v812_v58 = vpop.f32.mrb[40].mxu1 }
 0x13e   : > { %v662_v35 = vpop.f32.mrb[40].mxu0  ;;  %v866_v40 = vadd.f32 %v812_v58, %v3156_v26  ;;  %v2395_v42 = vpop.f32.mrb[41].mxu1 }
 0x13f   : > { %v3186_v36 = vadd.f32 %v662_v35, %v519_v29  ;;  %v2387_v38 = vpop.f32.mrb[41].mxu0  ;;  %v815_v45 = vpop.f32.mrb[42].mxu1 }
 0x140   : > { %v665_v39 = vpop.f32.mrb[42].mxu0  ;;  %v867_v46 = vadd.f32 %v815_v45, %v3158_v31  ;;  %v2396_v5 = vpop.f32.mrb[43].mxu1 }
 0x141   : > { %v2388_v43 = vpop.f32.mrb[43].mxu0 }
 0x145   : > { %v820_v51 = vpop.f32.mrb[44].mxu1 }
 0x146   : > { %v1018_v47 = vpop.f32.mrb[44].mxu0  ;;  %v868_v53 = vadd.f32 %v820_v51, %v3161_v1  ;;  %v2399_v55 = vpop.f32.mrb[45].mxu1 }
 0x147   : > { %v3190_v48 = vadd.f32 %v1018_v47, %v866_v40  ;;  %v2427_v49 = vpop.f32.mrb[45].mxu0  ;;  %v823_v60 = vpop.f32.mrb[46].mxu1 }
 0x148   : > { %v1021_v52 = vpop.f32.mrb[46].mxu0  ;;  %v869_v26 = vadd.f32 %v823_v60, %v3163_v44  ;;  %v2400_v61 = vpop.f32.mrb[47].mxu1 }
 0x149   : > { %v3193_v56 = vadd.f32 %v1021_v52, %v867_v46  ;;  %v2428_v59 = vpop.f32.mrb[47].mxu0 }
 0x14d   : > { %v828_v2 = vpop.f32.mrb[48].mxu1 }
 0x14e   : > { %v1026_v62 = vpop.f32.mrb[48].mxu0  ;;  %v870_v4 = vadd.f32 %v828_v2, %v3165_v50  ;;  %v2403_v7 = vpop.f32.mrb[49].mxu1 }
 0x14f   : > { %v3196_v63 = vadd.f32 %v1026_v62, %v868_v53  ;;  %v2431_v31 = vpop.f32.mrb[49].mxu0  ;;  %v831_v11 = vpop.f32.mrb[50].mxu1 }
 0x150   : > { %v1029_v3 = vpop.f32.mrb[50].mxu0  ;;  %v871_v12 = vadd.f32 %v831_v11, %v3167_v57  ;;  %v2404_v13 = vpop.f32.mrb[51].mxu1 }
 0x151   : > { %v3199_v8 = vadd.f32 %v1029_v3, %v869_v26  ;;  %v2432_v1 = vpop.f32.mrb[51].mxu0 }
 0x155   : > { %v836_v17 = vpop.f32.mrb[52].mxu1 }
 0x156   : > { %v1034_v14 = vpop.f32.mrb[52].mxu0  ;;  %v872_v19 = vadd.f32 %v836_v17, %v3169_v0  ;;  %v2407_v20 = vpop.f32.mrb[53].mxu1 }
 0x157   : > { %v3202_v15 = vadd.f32 %v1034_v14, %v870_v4  ;;  %v2435_v44 = vpop.f32.mrb[53].mxu0  ;;  %v839_v37 = vpop.f32.mrb[54].mxu1 }
 0x158   : > { %v1037_v18 = vpop.f32.mrb[54].mxu0  ;;  %v873_v22 = vadd.f32 %v839_v37, %v3172_v9  ;;  %v2408_v10 = vpop.f32.mrb[55].mxu1 }
 0x159   : > { %v3205_v6 = vadd.f32 %v1037_v18, %v871_v12  ;;  %v2436_v50 = vpop.f32.mrb[55].mxu0 }
 0x15d   : > { %v844_v41 = vpop.f32.mrb[56].mxu1 }
 0x15e   : > { %v1042_v24 = vpop.f32.mrb[56].mxu0  ;;  %v874_v23 = vadd.f32 %v844_v41, %v3175_v16  ;;  %v2411_v29 = vpop.f32.mrb[57].mxu1 }
 0x15f   : > { %v3208_v25 = vadd.f32 %v1042_v24, %v872_v19  ;;  %v2439_v57 = vpop.f32.mrb[57].mxu0  ;;  %v847_v54 = vpop.f32.mrb[58].mxu1 }
 0x160   : > { %v1045_v28 = vpop.f32.mrb[58].mxu0  ;;  %v875_v33 = vadd.f32 %v847_v54, %v3178_v21  ;;  %v2412_v34 = vpop.f32.mrb[59].mxu1 }
 0x161   : > { %v3211_v32 = vadd.f32 %v1045_v28, %v873_v22  ;;  %v2440_v0 = vpop.f32.mrb[59].mxu0 }
 0x165   : > { %v852_v58 = vpop.f32.mrb[60].mxu1 }
 0x166   : > { %v1050_v35 = vpop.f32.mrb[60].mxu0  ;;  %v876_v40 = vadd.f32 %v852_v58, %v3181_v27  ;;  %v2415_v42 = vpop.f32.mrb[61].mxu1 }
 0x167   : > { %v3214_v38 = vadd.f32 %v1050_v35, %v874_v23  ;;  %v2443_v9 = vpop.f32.mrb[61].mxu0  ;;  %v855_v45 = vpop.f32.mrb[62].mxu1 }
 0x168   : > { %v1053_v39 = vpop.f32.mrb[62].mxu0  ;;  %v877_v46 = vadd.f32 %v855_v45, %v3184_v30  ;;  %v2416_v5 = vpop.f32.mrb[63].mxu1 }
 0x169   : > { %v3217_v43 = vadd.f32 %v1053_v39, %v875_v33  ;;  %v2444_v16 = vpop.f32.mrb[63].mxu0 }
 0x16d   : > { %v860_v51 = vpop.f32.mrb[64].mxu1 }
 0x16e   : > { %v1058_v47 = vpop.f32.mrb[64].mxu0  ;;  %v878_v53 = vadd.f32 %v860_v51, %v3186_v36  ;;  %v2419_v27 = vpop.f32.mrb[65].mxu1 }
 0x16f   : > { %v3220_v49 = vadd.f32 %v1058_v47, %v876_v40  ;;  %v2447_v21 = vpop.f32.mrb[65].mxu0  ;;  %v863_v60 = vpop.f32.mrb[66].mxu1 }
 0x170   : > { %v1061_v52 = vpop.f32.mrb[66].mxu0  ;;  %v2420_v26 = vpop.f32.mrb[67].mxu1 }
 0x171   : > { %v3223_v55 = vadd.f32 %v1061_v52, %v877_v46  ;;  %v2448_v59 = vpop.f32.mrb[67].mxu0 }
 0x175   : > { %v1175_v30 = vpop.f32.mrb[68].mxu1 }
 0x176   : > { %v1066_v61 = vpop.f32.mrb[68].mxu0  ;;  %v1229_v3 = vadd.f32 %v1175_v30, %v3190_v48  ;;  %v2459_v4 = vpop.f32.mrb[69].mxu1 }
 0x177   : > { %v3225_v62 = vadd.f32 %v1066_v61, %v878_v53  ;;  %v2451_v31 = vpop.f32.mrb[69].mxu0  ;;  %v1178_v1 = vpop.f32.mrb[70].mxu1 }
 0x178   : > { %v1069_v2 = vpop.f32.mrb[70].mxu0  ;;  %v1230_v11 = vadd.f32 %v1178_v1, %v3193_v56  ;;  %v2460_v36 = vpop.f32.mrb[71].mxu1 }
 0x179   : > { %v2452_v7 = vpop.f32.mrb[71].mxu0 }
 0x17d   : > { %v1183_v44 = vpop.f32.mrb[72].mxu1 }
 0x17e   : > { %v1373_v12 = vpop.f32.mrb[72].mxu0  ;;  %v1231_v18 = vadd.f32 %v1183_v44, %v3196_v63  ;;  %v2463_v19 = vpop.f32.mrb[73].mxu1 }
 0x17f   : > { %v3229_v13 = vadd.f32 %v1373_v12, %v1229_v3  ;;  %v2491_v14 = vpop.f32.mrb[73].mxu0  ;;  %v1186_v37 = vpop.f32.mrb[74].mxu1 }
 0x180   : > { %v1376_v17 = vpop.f32.mrb[74].mxu0  ;;  %v1232_v48 = vadd.f32 %v1186_v37, %v3199_v8  ;;  %v2464_v22 = vpop.f32.mrb[75].mxu1 }
 0x181   : > { %v3232_v20 = vadd.f32 %v1376_v17, %v1230_v11  ;;  %v2492_v50 = vpop.f32.mrb[75].mxu0 }
 0x185   : > { %v1191_v57 = vpop.f32.mrb[76].mxu1 }
 0x186   : > { %v1381_v10 = vpop.f32.mrb[76].mxu0  ;;  %v1233_v28 = vadd.f32 %v1191_v57, %v3202_v15  ;;  %v2467_v23 = vpop.f32.mrb[77].mxu1 }
 0x187   : > { %v3235_v24 = vadd.f32 %v1381_v10, %v1231_v18  ;;  %v2495_v56 = vpop.f32.mrb[77].mxu0  ;;  %v1194_v0 = vpop.f32.mrb[78].mxu1 }
 0x188   : > { %v1384_v41 = vpop.f32.mrb[78].mxu0  ;;  %v1234_v54 = vadd.f32 %v1194_v0, %v3205_v6  ;;  %v2468_v33 = vpop.f32.mrb[79].mxu1 }
 0x189   : > { %v3238_v29 = vadd.f32 %v1384_v41, %v1232_v48  ;;  %v2496_v63 = vpop.f32.mrb[79].mxu0  ;;  %v3271_v33 = vld [vmem:[%s3333_s2] ss:$0 sm:$0xff] }
 0x18d   : > { %v1199_v9 = vpop.f32.mrb[80].mxu1 }
 0x18e   : > { %v1389_v34 = vpop.f32.mrb[80].mxu0  ;;  %v1235_v39 = vadd.f32 %v1199_v9, %v3208_v25  ;;  %v2471_v40 = vpop.f32.mrb[81].mxu1 }
 0x18f   : > { %v3241_v35 = vadd.f32 %v1389_v34, %v1233_v28  ;;  %v2499_v8 = vpop.f32.mrb[81].mxu0  ;;  %v1202_v16 = vpop.f32.mrb[82].mxu1 }
 0x190   : > { %v1392_v58 = vpop.f32.mrb[82].mxu0  ;;  %v1236_v45 = vadd.f32 %v1202_v16, %v3211_v32  ;;  %v2472_v46 = vpop.f32.mrb[83].mxu1 }
 0x191   : > { %v3244_v42 = vadd.f32 %v1392_v58, %v1234_v54  ;;  %v2500_v15 = vpop.f32.mrb[83].mxu0 }
 0x195   : > { %v1207_v21 = vpop.f32.mrb[84].mxu1 }
 0x196   : > { %v1397_v5 = vpop.f32.mrb[84].mxu0  ;;  %v1237_v52 = vadd.f32 %v1207_v21, %v3214_v38  ;;  %v2475_v53 = vpop.f32.mrb[85].mxu1 }
 0x197   : > { %v3247_v47 = vadd.f32 %v1397_v5, %v1235_v39  ;;  %v2503_v6 = vpop.f32.mrb[85].mxu0  ;;  %v1210_v27 = vpop.f32.mrb[86].mxu1 }
 0x198   : > { %v1400_v51 = vpop.f32.mrb[86].mxu0  ;;  %v1238_v60 = vadd.f32 %v1210_v27, %v3217_v43  ;;  %v2476_v26 = vpop.f32.mrb[87].mxu1 }
 0x199   : > { %v3250_v59 = vadd.f32 %v1400_v51, %v1236_v45  ;;  %v2504_v25 = vpop.f32.mrb[87].mxu0 }
 0x19d   : > { %v1215_v30 = vpop.f32.mrb[88].mxu1 }
 0x19e   : > { %v1405_v61 = vpop.f32.mrb[88].mxu0  ;;  %v1239_v3 = vadd.f32 %v1215_v30, %v3220_v49  ;;  %v2479_v4 = vpop.f32.mrb[89].mxu1 }
 0x19f   : > { %v3253_v31 = vadd.f32 %v1405_v61, %v1237_v52  ;;  %v2507_v32 = vpop.f32.mrb[89].mxu0  ;;  %v1218_v1 = vpop.f32.mrb[90].mxu1 }
 0x1a0   : > { %v1408_v2 = vpop.f32.mrb[90].mxu0  ;;  %v1240_v11 = vadd.f32 %v1218_v1, %v3223_v55  ;;  %v2480_v36 = vpop.f32.mrb[91].mxu1 }
 0x1a1   : > { %v3256_v7 = vadd.f32 %v1408_v2, %v1238_v60  ;;  %v2508_v38 = vpop.f32.mrb[91].mxu0 }
 0x1a5   : > { %v1223_v44 = vpop.f32.mrb[92].mxu1 }
 0x1a6   : > { %v1413_v12 = vpop.f32.mrb[92].mxu0  ;;  %v1241_v18 = vadd.f32 %v1223_v44, %v3225_v62  ;;  %v2483_v49 = vpop.f32.mrb[93].mxu1 }
 0x1a7   : > { %v3259_v14 = vadd.f32 %v1413_v12, %v1239_v3  ;;  %v2511_v43 = vpop.f32.mrb[93].mxu0  ;;  %v1226_v37 = vpop.f32.mrb[94].mxu1 }
 0x1a8   : > { %v1416_v17 = vpop.f32.mrb[94].mxu0  ;;  %v2484_v48 = vpop.f32.mrb[95].mxu1 }
 0x1a9   : > { %v3262_v19 = vadd.f32 %v1416_v17, %v1240_v11  ;;  %v2512_v50 = vpop.f32.mrb[95].mxu0 }
 0x1ad   : > { %v1624_v55 = vpop.f32.mrb[96].mxu1 }
 0x1ae   : > { %v1421_v22 = vpop.f32.mrb[96].mxu0  ;;  %v1678_v41 = vadd.f32 %v1624_v55, %v3229_v13  ;;  %v2523_v28 = vpop.f32.mrb[97].mxu1 }
 0x1af   : > { %v3264_v10 = vadd.f32 %v1421_v22, %v1241_v18  ;;  %v2515_v56 = vpop.f32.mrb[97].mxu0  ;;  %v1627_v63 = vpop.f32.mrb[98].mxu1 }
 0x1b0   : > { %v1424_v57 = vpop.f32.mrb[98].mxu0  ;;  %v1679_v62 = vadd.f32 %v1627_v63, %v3232_v20  ;;  %v2524_v0 = vpop.f32.mrb[99].mxu1 }
 0x1b1   : > { %v2516_v23 = vpop.f32.mrb[99].mxu0 }
 0x1b5   : > { %v1632_v9 = vpop.f32.mrb[100].mxu1 }
 0x1b6   : > { %v1781_v54 = vpop.f32.mrb[100].mxu0  ;;  %v1680_v39 = vadd.f32 %v1632_v9, %v3235_v24  ;;  %v2527_v40 = vpop.f32.mrb[101].mxu1 }
 0x1b7   : > { %v1835_v34 = vadd.f32 %v1781_v54, %v1678_v41  ;;  %v2555_v8 = vpop.f32.mrb[101].mxu0  ;;  %v1635_v20 = vpop.f32.mrb[102].mxu1 }
 0x1b8   : > { %v1784_v58 = vpop.f32.mrb[102].mxu0  ;;  %v1681_v46 = vadd.f32 %v1635_v20, %v3238_v29  ;;  %v2528_v6 = vpop.f32.mrb[103].mxu1 }
 0x1b9   : > { %v1855_v13 = vadd.f32 %v3271_v33, %v1835_v34  ;;  %v1836_v15 = vadd.f32 %v1784_v58, %v1679_v62  ;;  %v2556_v16 = vpop.f32.mrb[103].mxu0 }
 0x1bb   : > { %vm1868_vm8 = vcmp.ge.f32.partialorder %v1855_v13, 0.0  ;;  %v1881_v45 = vmul.f32 0.1, %v1855_v13  ;;  %v1856_v5 = vadd.f32 %v3271_v33, %v1836_v15 }
 0x1bd   : > { %v1894_v24 = vsel %vm1868_vm8, %v1855_v13, %v1881_v45  ;;  %vm1869_vm10 = vcmp.ge.f32.partialorder %v1856_v5, 0.0  ;;  %v1882_v21 = vmul.f32 0.1, %v1856_v5  ;;  %v1640_v60 = vpop.f32.mrb[104].mxu1 }
 0x1be   : > { %v2199_v51 = vpack.c.bf16 %v1894_v24, %v1894_v24  ;;  %v1789_v52 = vpop.f32.mrb[104].mxu0  ;;  %v1682_v61 = vadd.f32 %v1640_v60, %v3241_v35  ;;  %v2531_v30 = vpop.f32.mrb[105].mxu1 }
 0x1bf   : > { %v1895_v53 = vsel %vm1869_vm10, %v1856_v5, %v1882_v21  ;;  %v1837_v25 = vadd.f32 %v1789_v52, %v1680_v39  ;;  %v2559_v27 = vpop.f32.mrb[105].mxu0  ;;  %v1643_v4 = vpop.f32.mrb[106].mxu1 }
 0x1c0   : > { %1961 = vst.msk [vmem:[%s3281_s7] sm:$0xf] %vm1960_vm9, %v2199_v51  ;;  %v2200_v29 = vpack.c.bf16 %v1895_v53, %v1895_v53  ;;  %v1792_v26 = vpop.f32.mrb[106].mxu0  ;;  %v1683_v1 = vadd.f32 %v1643_v4, %v3244_v42  ;;  %v2532_v36 = vpop.f32.mrb[107].mxu1 }
 0x1c1   : > { %v1857_v32 = vadd.f32 %v3271_v33, %v1837_v25  ;;  %v1838_v2 = vadd.f32 %v1792_v26, %v1681_v46  ;;  %v2560_v3 = vpop.f32.mrb[107].mxu0 }
 0x1c2   : > { %1962 = vst.msk [vmem:[%s3281_s7 + $0x4] sm:$0xf] %vm1960_vm9, %v2200_v29 }
 0x1c3   : > { %vm1870_vm11 = vcmp.ge.f32.partialorder %v1857_v32, 0.0  ;;  %v1883_v38 = vmul.f32 0.1, %v1857_v32  ;;  %v1858_v11 = vadd.f32 %v3271_v33, %v1838_v2 }
 0x1c5   : > { %v1896_v12 = vsel %vm1870_vm11, %v1857_v32, %v1883_v38  ;;  %vm1871_vm12 = vcmp.ge.f32.partialorder %v1858_v11, 0.0  ;;  %v1884_v35 = vmul.f32 0.1, %v1858_v11  ;;  %v1648_v37 = vpop.f32.mrb[108].mxu1 }
 0x1c6   : > { %v2201_v43 = vpack.c.bf16 %v1896_v12, %v1896_v12  ;;  %v1797_v44 = vpop.f32.mrb[108].mxu0  ;;  %v1684_v22 = vadd.f32 %v1648_v37, %v3247_v47  ;;  %v2535_v56 = vpop.f32.mrb[109].mxu1 }
 0x1c7   : > { %v1897_v17 = vsel %vm1871_vm12, %v1858_v11, %v1884_v35  ;;  %v1839_v18 = vadd.f32 %v1797_v44, %v1682_v61  ;;  %v2563_v50 = vpop.f32.mrb[109].mxu0  ;;  %v1651_v41 = vpop.f32.mrb[110].mxu1 }
 0x1c8   : > { %1963 = vst.msk [vmem:[%s3281_s7 + $0x8] sm:$0xf] %vm1960_vm9, %v2201_v43  ;;  %v2202_v49 = vpack.c.bf16 %v1897_v17, %v1897_v17  ;;  %v1800_v48 = vpop.f32.mrb[110].mxu0  ;;  %v1685_v23 = vadd.f32 %v1651_v41, %v3250_v59  ;;  %v2536_v62 = vpop.f32.mrb[111].mxu1 }
 0x1c9   : > { %v1859_v42 = vadd.f32 %v3271_v33, %v1839_v18  ;;  %v1840_v55 = vadd.f32 %v1800_v48, %v1683_v1  ;;  %v2564_v57 = vpop.f32.mrb[111].mxu0 }
 0x1ca   : > { %1964 = vst.msk [vmem:[%s3281_s7 + $0xc] sm:$0xf] %vm1960_vm9, %v2202_v49 }
 0x1cb   : > { %vm1872_vm13 = vcmp.ge.f32.partialorder %v1859_v42, 0.0  ;;  %v1885_v28 = vmul.f32 0.1, %v1859_v42  ;;  %v1860_v63 = vadd.f32 %v3271_v33, %v1840_v55 }
 0x1cd   : > { %v1898_v0 = vsel %vm1872_vm13, %v1859_v42, %v1885_v28  ;;  %vm1873_vm14 = vcmp.ge.f32.partialorder %v1860_v63, 0.0  ;;  %v1886_v47 = vmul.f32 0.1, %v1860_v63  ;;  %v1656_v13 = vpop.f32.mrb[112].mxu1 }
 0x1ce   : > { %v2203_v54 = vpack.c.bf16 %v1898_v0, %v1898_v0  ;;  %v1805_v34 = vpop.f32.mrb[112].mxu0  ;;  %v1686_v15 = vadd.f32 %v1656_v13, %v3253_v31  ;;  %v2539_v16 = vpop.f32.mrb[113].mxu1 }
 0x1cf   : > { %v1899_v8 = vsel %vm1873_vm14, %v1860_v63, %v1886_v47  ;;  %v1841_v9 = vadd.f32 %v1805_v34, %v1684_v22  ;;  %v2567_v58 = vpop.f32.mrb[113].mxu0  ;;  %v1659_v46 = vpop.f32.mrb[114].mxu1 }
 0x1d0   : > { %1965 = vst.msk [vmem:[%s3281_s7 + $0x10] sm:$0xf] %vm1960_vm9, %v2203_v54  ;;  %v2204_v39 = vpack.c.bf16 %v1899_v8, %v1899_v8  ;;  %v1808_v40 = vpop.f32.mrb[114].mxu0  ;;  %v1687_v6 = vadd.f32 %v1659_v46, %v3256_v7  ;;  %v2540_v21 = vpop.f32.mrb[115].mxu1 }
 0x1d1   : > { %v1861_v59 = vadd.f32 %v3271_v33, %v1841_v9  ;;  %v1842_v20 = vadd.f32 %v1808_v40, %v1685_v23  ;;  %v2568_v45 = vpop.f32.mrb[115].mxu0 }
 0x1d2   : > { %1966 = vst.msk [vmem:[%s3281_s7 + $0x14] sm:$0xf] %vm1960_vm9, %v2204_v39 }
 0x1d3   : > { %vm1874_vm15 = vcmp.ge.f32.partialorder %v1861_v59, 0.0  ;;  %v1887_v5 = vmul.f32 0.1, %v1861_v59  ;;  %v1862_v24 = vadd.f32 %v3271_v33, %v1842_v20 }
 0x1d5   : > { %v1900_v51 = vsel %vm1874_vm15, %v1861_v59, %v1887_v5  ;;  %vm1875_vm0 = vcmp.ge.f32.partialorder %v1862_v24, 0.0  ;;  %v1888_v31 = vmul.f32 0.1, %v1862_v24  ;;  %v1664_v26 = vpop.f32.mrb[116].mxu1 }
 0x1d6   : > { %v2205_v52 = vpack.c.bf16 %v1900_v51, %v1900_v51  ;;  %v1813_v53 = vpop.f32.mrb[116].mxu0  ;;  %v1688_v32 = vadd.f32 %v1664_v26, %v3259_v14  ;;  %v2543_v30 = vpop.f32.mrb[117].mxu1 }
 0x1d7   : > { %v1901_v25 = vsel %vm1875_vm0, %v1862_v24, %v1888_v31  ;;  %v1843_v27 = vadd.f32 %v1813_v53, %v1686_v15  ;;  %v2571_v29 = vpop.f32.mrb[117].mxu0  ;;  %v1667_v4 = vpop.f32.mrb[118].mxu1 }
 0x1d8   : > { %1967 = vst.msk [vmem:[%s3281_s7 + $0x18] sm:$0xf] %vm1960_vm9, %v2205_v52  ;;  %v2206_v60 = vpack.c.bf16 %v1901_v25, %v1901_v25  ;;  %v1816_v61 = vpop.f32.mrb[118].mxu0  ;;  %v1689_v1 = vadd.f32 %v1667_v4, %v3262_v19  ;;  %v2544_v36 = vpop.f32.mrb[119].mxu1 }
 0x1d9   : > { %v1863_v7 = vadd.f32 %v3271_v33, %v1843_v27  ;;  %v1844_v2 = vadd.f32 %v1816_v61, %v1687_v6  ;;  %v2572_v3 = vpop.f32.mrb[119].mxu0 }
 0x1da   : > { %1968 = vst.msk [vmem:[%s3281_s7 + $0x1c] sm:$0xf] %vm1960_vm9, %v2206_v60 }
 0x1db   : > { %vm1876_vm1 = vcmp.ge.f32.partialorder %v1863_v7, 0.0  ;;  %v1889_v38 = vmul.f32 0.1, %v1863_v7  ;;  %v1864_v11 = vadd.f32 %v3271_v33, %v1844_v2 }
 0x1dd   : > { %v1902_v12 = vsel %vm1876_vm1, %v1863_v7, %v1889_v38  ;;  %vm1877_vm2 = vcmp.ge.f32.partialorder %v1864_v11, 0.0  ;;  %v1890_v14 = vmul.f32 0.1, %v1864_v11  ;;  %v1672_v49 = vpop.f32.mrb[120].mxu1 }
 0x1de   : > { %v2207_v35 = vpack.c.bf16 %v1902_v12, %v1902_v12  ;;  %v1821_v43 = vpop.f32.mrb[120].mxu0  ;;  %v1690_v48 = vadd.f32 %v1672_v49, %v3264_v10  ;;  %v2547_v56 = vpop.f32.mrb[121].mxu1 }
 0x1df   : > { %v1903_v44 = vsel %vm1877_vm2, %v1864_v11, %v1890_v14  ;;  %v1845_v17 = vadd.f32 %v1821_v43, %v1688_v32  ;;  %v2575_v18 = vpop.f32.mrb[121].mxu0  ;;  %v1675_v55 = vpop.f32.mrb[122].mxu1 }
 0x1e0   : > { %1969 = vst.msk [vmem:[%s3281_s7 + $0x20] sm:$0xf] %vm1960_vm9, %v2207_v35  ;;  %v2208_v50 = vpack.c.bf16 %v1903_v44, %v1903_v44  ;;  %v1824_v37 = vpop.f32.mrb[122].mxu0  ;;  %v2548_v28 = vpop.f32.mrb[123].mxu1 }
 0x1e1   : > { %v1865_v19 = vadd.f32 %v3271_v33, %v1845_v17  ;;  %v1846_v22 = vadd.f32 %v1824_v37, %v1689_v1  ;;  %v2576_v42 = vpop.f32.mrb[123].mxu0 }
 0x1e2   : > { %1970 = vst.msk [vmem:[%s3281_s7 + $0x24] sm:$0xf] %vm1960_vm9, %v2208_v50 }
 0x1e3   : > { %vm1878_vm3 = vcmp.ge.f32.partialorder %v1865_v19, 0.0  ;;  %v1891_v57 = vmul.f32 0.1, %v1865_v19  ;;  %v1866_v41 = vadd.f32 %v3271_v33, %v1846_v22 }
 0x1e5   : > { %v1904_v23 = vsel %vm1878_vm3, %v1865_v19, %v1891_v57  ;;  %vm1879_vm4 = vcmp.ge.f32.partialorder %v1866_v41, 0.0  ;;  %v1892_v63 = vmul.f32 0.1, %v1866_v41 }
 0x1e6   : > { %v2209_v62 = vpack.c.bf16 %v1904_v23, %v1904_v23  ;;  %v1829_v10 = vpop.f32.mrb[124].mxu0 }
 0x1e7   : > { %v1905_v0 = vsel %vm1879_vm4, %v1866_v41, %v1892_v63  ;;  %v1847_v47 = vadd.f32 %v1829_v10, %v1690_v48  ;;  %v2579_v54 = vpop.f32.mrb[125].mxu0 }
 0x1e8   : > { %1971 = vst.msk [vmem:[%s3281_s7 + $0x28] sm:$0xf] %vm1960_vm9, %v2209_v62  ;;  %v2210_v34 = vpack.c.bf16 %v1905_v0, %v1905_v0  ;;  %v1832_v8 = vpop.f32.mrb[126].mxu0 }
 0x1e9   : > { %v1867_v9 = vadd.f32 %v3271_v33, %v1847_v47  ;;  %v2580_v58 = vpop.f32.mrb[127].mxu0 }
 0x1ea   : > { %1972 = vst.msk [vmem:[%s3281_s7 + $0x2c] sm:$0xf] %vm1960_vm9, %v2210_v34 }
 0x1eb   : > { %vm1880_vm5 = vcmp.ge.f32.partialorder %v1867_v9, 0.0  ;;  %v1893_v39 = vmul.f32 0.1, %v1867_v9 }
 0x1ed   : > { %v1906_v13 = vsel %vm1880_vm5, %v1867_v9, %v1893_v39 }
 0x1ee   : > { %v2211_v40 = vpack.c.bf16 %v1906_v13, %v1906_v13 }
 0x1f0   : > { %1974 = vst.msk [vmem:[%s3281_s7 + $0x30] sm:$0x3] %vm1973_vm6, %v2211_v40 }
 0x1f1 PF: > { %s13_s12 = sadd.s32 1, %s2654_s12  }
 0x1f2   : > { %p10_p4 = scmp.ge.s32.totalorder %s13_s12, 4  }
 0x1f4   :  { %12 = sbr.rel (!%p10_p4) target bundleno = 1 (0x1), region = 70 }

// kernel: baseline_forward.42
= control target key start
LH: loop header
LB: loop body
LE: loop exit
PB: predicated region body
PF: predicated region fallthrough
CT: control target
= control target key end

     0   :  { %s262_s6 = smov 0   ;;  %s283_s0 = inlined_call_operand.vmem [shape: bf16[2,64,128], index: 0, kind: input, shape index: {}]   ;;  %s284_s1 = inlined_call_operand.vmem [shape: f32[2,1,128], index: 1, kind: output, shape index: {}]  }
   0x1 LB: > { %s203_s7 = sadd.s32 4294967295, %s250_s6   ;;  %p207_p0 = scmp.ge.s32.totalorder %s250_s6, 1  ;;  %s250_s6 = sphi %s262_s6, %s11_s6  }
   0x2   : > { %p87_p1 = scmp.lt.s32.totalorder %s250_s6, 3 }
   0x4   : > { %p88_p2 = pnand %p207_p0, %p87_p1 }
   0x5   : > { %p105_p3 = scmp.lt.s32.totalorder (!%p88_p2), %s203_s7, 1 }
   0x6   : > { %91 = sbr.rel (%p88_p2) target bundleno = 213 (0xd5), region = 24 }
   0xd   : > { %s286_s7 = smov (!%p105_p3, %s203_s7), 1 }
   0xe   : > { %s212_s8 = sshll.u32 %s286_s7, 5  ;;  %s112_s14 = scalar_lea.vmem %s284_s1, %s286_s7 }
   0xf   : > { %s109_s11 = scalar_lea.vmem %s283_s0, %s212_s8 }
  0x10   : > { %v214_v0 = vld [vmem:[%s109_s11] sm:$0xff]   ;;  %v229_v1 = vld [vmem:[%s109_s11 + $0x8] sm:$0xff]   ;;  %v230_v2 = vld [vmem:[%s109_s11 + $0x10] sm:$0xff]  }
  0x11   : > { %v215_v3 = vunpack.c.l.bf16 %v214_v0  ;;  %v216_v4 = vunpack.c.h.bf16 %v214_v0  ;;  %v219_v5 = vunpack.c.l.bf16 %v229_v1  ;;  %v220_v6 = vunpack.c.h.bf16 %v229_v1  ;;  %v231_v7 = vld [vmem:[%s109_s11 + $0x18] sm:$0xff]  }
  0x12   : > { %v223_v8 = vunpack.c.l.bf16 %v230_v2  ;;  %v224_v9 = vunpack.c.h.bf16 %v230_v2  ;;  %v227_v10 = vunpack.c.l.bf16 %v231_v7  ;;  %v228_v11 = vunpack.c.h.bf16 %v231_v7 }
  0x14   : > { %v129_v12 = vmax.f32 %v215_v3, %v223_v8  ;;  %v130_v13 = vmax.f32 %v216_v4, %v224_v9  ;;  %v131_v14 = vmax.f32 %v219_v5, %v227_v10  ;;  %v132_v15 = vmax.f32 %v220_v6, %v228_v11 }
  0x16   : > { %v133_v16 = vmax.f32 %v129_v12, %v130_v13  ;;  %v134_v17 = vmax.f32 %v131_v14, %v132_v15 }
  0x18   : > { %v135_v18 = vmax.f32 %v133_v16, %v134_v17 }
  0x1a   : > { %v136_v19 = vrot.slane %v135_v18, 4 }
  0x1c   : > { %v137_v20 = vmax.f32 %v135_v18, %v136_v19 }
  0x1e   : > { %v138_v21 = vrot.slane %v137_v20, 2 }
  0x20   : > { %v139_v22 = vmax.f32 %v137_v20, %v138_v21 }
  0x22   : > { %v140_v23 = vrot.slane %v139_v22, 1 }
  0x24   : > { %v141_v24 = vmax.f32 %v139_v22, %v140_v23 }
  0x26   : > { %v142_v25 = vmul.f32 %v141_v24, %v141_v24 }
  0x28   : > { %143 = vadd.xlane.f32.xlu0 %v142_v25 }
  0xb5   : > { %v144_v26 = vpop.xlane.xlu0 %143 }
  0xb6   : > { %240 = vrsqrt.f32 %v144_v26  ;;  %vm147_vm0 = vcmp.eq.f32.partialorder %v144_v26, inf  ;;  %v150_v29 = vand.u32 2147483648, %v144_v26  ;;  %vm149_vm1 = vcmp.eq.f32.partialorder %v144_v26, 0.0 }
  0xc0   : > { %v241_v27 = vpop.eup %240 }
  0xc1   : > { %v146_v28 = vmul.f32 %v241_v27, %v144_v26 }
  0xc3   : > { %v148_v30 = vsel %vm147_vm0, %v144_v26, %v146_v28 }
  0xc4   : > { %v151_v31 = vsel %vm149_vm1, %v150_v29, %v148_v30 }
  0xc5   : > { %v152_v32 = vmax.f32 %v151_v31, 1e-12 }
  0xc7   : > { %242 = vrcp.f32 %v152_v32 }
  0xd1   : > { %v243_v33 = vpop.eup %242 }
  0xd2   : > { %v154_v34 = vmul.f32 %v243_v33, %v141_v24 }
  0xd4   : > { %155 = vst [vmem:[%s112_s14] sm:$0x1] %v154_v34 }
  0xd5 PF: > { %s11_s6 = sadd.s32 1, %s250_s6  }
  0xd6   : > { %p8_p4 = scmp.ge.s32.totalorder %s11_s6, 4  }
  0xd8   :  { %10 = sbr.rel (!%p8_p4) target bundleno = 1 (0x1), region = 54 }

// kernel: baseline_forward.43
= control target key start
LH: loop header
LB: loop body
LE: loop exit
PB: predicated region body
PF: predicated region fallthrough
CT: control target
= control target key end

     0   :  { %s264_s6 = smov 0   ;;  %s285_s0 = inlined_call_operand.vmem [shape: bf16[2,64,128], index: 0, kind: input, shape index: {}]   ;;  %s286_s1 = inlined_call_operand.vmem [shape: f32[2,1,128], index: 1, kind: output, shape index: {}]  }
   0x1 LB: > { %s205_s7 = sadd.s32 4294967295, %s252_s6   ;;  %p209_p0 = scmp.ge.s32.totalorder %s252_s6, 1  ;;  %s252_s6 = sphi %s264_s6, %s11_s6  }
   0x2   : > { %p87_p1 = scmp.lt.s32.totalorder %s252_s6, 3 }
   0x4   : > { %p88_p2 = pnand %p209_p0, %p87_p1 }
   0x5   : > { %p105_p3 = scmp.lt.s32.totalorder (!%p88_p2), %s205_s7, 1 }
   0x6   : > { %91 = sbr.rel (%p88_p2) target bundleno = 222 (0xde), region = 24 }
   0xd   : > { %s288_s7 = smov (!%p105_p3, %s205_s7), 1 }
   0xe   : > { %s214_s8 = sshll.u32 %s288_s7, 5  ;;  %s112_s14 = scalar_lea.vmem %s286_s1, %s288_s7 }
   0xf   : > { %s109_s11 = scalar_lea.vmem %s285_s0, %s214_s8 }
  0x10   : > { %v216_v0 = vld [vmem:[%s109_s11] sm:$0xff]   ;;  %v231_v1 = vld [vmem:[%s109_s11 + $0x8] sm:$0xff]   ;;  %v232_v5 = vld [vmem:[%s109_s11 + $0x10] sm:$0xff]  }
  0x11   : > { %v217_v2 = vunpack.c.l.bf16 %v216_v0  ;;  %v218_v3 = vunpack.c.h.bf16 %v216_v0  ;;  %v221_v4 = vunpack.c.l.bf16 %v231_v1  ;;  %v222_v6 = vunpack.c.h.bf16 %v231_v1  ;;  %v233_v10 = vld [vmem:[%s109_s11 + $0x18] sm:$0xff]  }
  0x12   : > { %v225_v8 = vunpack.c.l.bf16 %v232_v5  ;;  %v226_v11 = vunpack.c.h.bf16 %v232_v5  ;;  %v229_v13 = vunpack.c.l.bf16 %v233_v10  ;;  %v230_v15 = vunpack.c.h.bf16 %v233_v10 }
  0x13   : > { %v129_v7 = vadd.f32 %v218_v3, %v217_v2 }
  0x15   : > { %v130_v9 = vadd.f32 %v221_v4, %v129_v7 }
  0x17   : > { %v131_v12 = vadd.f32 %v222_v6, %v130_v9 }
  0x19   : > { %v132_v14 = vadd.f32 %v225_v8, %v131_v12 }
  0x1b   : > { %v133_v16 = vadd.f32 %v226_v11, %v132_v14 }
  0x1d   : > { %v134_v17 = vadd.f32 %v229_v13, %v133_v16 }
  0x1f   : > { %v135_v18 = vadd.f32 %v230_v15, %v134_v17 }
  0x21   : > { %v136_v19 = vrot.slane %v135_v18, 4 }
  0x23   : > { %v137_v20 = vadd.f32 %v136_v19, %v135_v18 }
  0x25   : > { %v138_v21 = vrot.slane %v137_v20, 2 }
  0x27   : > { %v139_v22 = vadd.f32 %v138_v21, %v137_v20 }
  0x29   : > { %v140_v23 = vrot.slane %v139_v22, 1 }
  0x2b   : > { %v141_v24 = vadd.f32 %v140_v23, %v139_v22 }
  0x2d   : > { %v143_v25 = vmul.f32 0.015625, %v141_v24 }
  0x2f   : > { %v144_v26 = vmul.f32 %v143_v25, %v143_v25 }
  0x31   : > { %145 = vadd.xlane.f32.xlu0 %v144_v26 }
  0xbe   : > { %v146_v27 = vpop.xlane.xlu0 %145 }
  0xbf   : > { %242 = vrsqrt.f32 %v146_v27  ;;  %vm149_vm0 = vcmp.eq.f32.partialorder %v146_v27, inf  ;;  %v152_v30 = vand.u32 2147483648, %v146_v27  ;;  %vm151_vm1 = vcmp.eq.f32.partialorder %v146_v27, 0.0 }
  0xc9   : > { %v243_v28 = vpop.eup %242 }
  0xca   : > { %v148_v29 = vmul.f32 %v243_v28, %v146_v27 }
  0xcc   : > { %v150_v31 = vsel %vm149_vm0, %v146_v27, %v148_v29 }
  0xcd   : > { %v153_v32 = vsel %vm151_vm1, %v152_v30, %v150_v31 }
  0xce   : > { %v154_v33 = vmax.f32 %v153_v32, 1e-12 }
  0xd0   : > { %244 = vrcp.f32 %v154_v33 }
  0xda   : > { %v245_v34 = vpop.eup %244 }
  0xdb   : > { %v156_v35 = vmul.f32 %v245_v34, %v143_v25 }
  0xdd   : > { %157 = vst [vmem:[%s112_s14] sm:$0x1] %v156_v35 }
  0xde PF: > { %s11_s6 = sadd.s32 1, %s252_s6  }
  0xdf   : > { %p8_p4 = scmp.ge.s32.totalorder %s11_s6, 4  }
  0xe1   :  { %10 = sbr.rel (!%p8_p4) target bundleno = 1 (0x1), region = 54 }

// kernel: baseline_forward.44
= control target key start
LH: loop header
LB: loop body
LE: loop exit
PB: predicated region body
PF: predicated region fallthrough
CT: control target
= control target key end

     0   :  { %s251_s6 = smov 0   ;;  %s272_s0 = inlined_call_operand.vmem [shape: f32[2,64,128], index: 0, kind: input, shape index: {}]   ;;  %s273_s1 = inlined_call_operand.vmem [shape: f32[2,1,128], index: 1, kind: output, shape index: {}]  }
   0x1 LB: > { %s211_s7 = sadd.s32 4294967295, %s239_s6   ;;  %p215_p0 = scmp.ge.s32.totalorder %s239_s6, 1  ;;  %s239_s6 = sphi %s251_s6, %s11_s6  }
   0x2   : > { %p87_p1 = scmp.lt.s32.totalorder %s239_s6, 3 }
   0x4   : > { %p88_p2 = pnand %p215_p0, %p87_p1 }
   0x5   : > { %p105_p3 = scmp.lt.s32.totalorder (!%p88_p2), %s211_s7, 1 }
   0x6   : > { %91 = sbr.rel (%p88_p2) target bundleno = 222 (0xde), region = 24 }
   0xd   : > { %s275_s7 = smov (!%p105_p3, %s211_s7), 1 }
   0xe   : > { %s220_s8 = sshll.u32 %s275_s7, 6  ;;  %s112_s14 = scalar_lea.vmem %s273_s1, %s275_s7 }
   0xf   : > { %s109_s11 = scalar_lea.vmem %s272_s0, %s220_s8 }
  0x10   : > { %v113_v0 = vld [vmem:[%s109_s11] sm:$0xff]  ;;  %v114_v1 = vld [vmem:[%s109_s11 + $0x8] sm:$0xff]  ;;  %v115_v2 = vld [vmem:[%s109_s11 + $0x10] sm:$0xff] }
  0x11   : > { %v117_v3 = vld [vmem:[%s109_s11 + $0x20] sm:$0xff]  ;;  %v118_v4 = vld [vmem:[%s109_s11 + $0x28] sm:$0xff]  ;;  %v134_v5 = vadd.f32 %v114_v1, %v113_v0  ;;  %v116_v6 = vld [vmem:[%s109_s11 + $0x18] sm:$0xff] }
  0x12   : > { %v119_v7 = vld [vmem:[%s109_s11 + $0x30] sm:$0xff]  ;;  %v120_v8 = vld [vmem:[%s109_s11 + $0x38] sm:$0xff]  ;;  %v121_v9 = vmax.f32 %v113_v0, %v117_v3  ;;  %v122_v10 = vmax.f32 %v114_v1, %v118_v4 }
  0x13   : > { %v123_v11 = vmax.f32 %v115_v2, %v119_v7  ;;  %v124_v12 = vmax.f32 %v116_v6, %v120_v8  ;;  %v135_v13 = vadd.f32 %v134_v5, %v115_v2 }
  0x14   : > { %v125_v14 = vmax.f32 %v121_v9, %v122_v10 }
  0x15   : > { %v126_v15 = vmax.f32 %v123_v11, %v124_v12  ;;  %v136_v16 = vadd.f32 %v135_v13, %v116_v6 }
  0x17   : > { %v127_v17 = vmax.f32 %v125_v14, %v126_v15  ;;  %v137_v18 = vadd.f32 %v136_v16, %v117_v3 }
  0x19   : > { %v128_v19 = vrot.slane %v127_v17, 4  ;;  %v138_v20 = vadd.f32 %v137_v18, %v118_v4 }
  0x1b   : > { %v129_v21 = vmax.f32 %v127_v17, %v128_v19  ;;  %v139_v22 = vadd.f32 %v138_v20, %v119_v7 }
  0x1d   : > { %v130_v23 = vrot.slane %v129_v21, 2  ;;  %v140_v24 = vadd.f32 %v139_v22, %v120_v8 }
  0x1f   : > { %v141_v25 = vrot.slane %v140_v24, 4  ;;  %v131_v26 = vmax.f32 %v129_v21, %v130_v23 }
  0x21   : > { %v142_v27 = vadd.f32 %v141_v25, %v140_v24  ;;  %v132_v29 = vrot.slane %v131_v26, 1 }
  0x23   : > { %v143_v28 = vrot.slane %v142_v27, 2  ;;  %v133_v32 = vmax.f32 %v131_v26, %v132_v29 }
  0x25   : > { %v144_v30 = vadd.f32 %v143_v28, %v142_v27 }
  0x27   : > { %v145_v31 = vrot.slane %v144_v30, 1 }
  0x29   : > { %v146_v33 = vadd.f32 %v145_v31, %v144_v30 }
  0x2b   : > { %v148_v34 = vmul.f32 0.015625, %v146_v33 }
  0x2d   : > { %v149_v35 = vadd.f32 %v148_v34, %v133_v32 }
  0x2f   : > { %v150_v36 = vmul.f32 %v149_v35, %v149_v35 }
  0x31   : > { %151 = vadd.xlane.f32.xlu0 %v150_v36 }
  0xbe   : > { %v152_v37 = vpop.xlane.xlu0 %151 }
  0xbf   : > { %229 = vrsqrt.f32 %v152_v37  ;;  %vm155_vm0 = vcmp.eq.f32.partialorder %v152_v37, inf  ;;  %v158_v40 = vand.u32 2147483648, %v152_v37  ;;  %vm157_vm1 = vcmp.eq.f32.partialorder %v152_v37, 0.0 }
  0xc9   : > { %v230_v38 = vpop.eup %229 }
  0xca   : > { %v154_v39 = vmul.f32 %v230_v38, %v152_v37 }
  0xcc   : > { %v156_v41 = vsel %vm155_vm0, %v152_v37, %v154_v39 }
  0xcd   : > { %v159_v42 = vsel %vm157_vm1, %v158_v40, %v156_v41 }
  0xce   : > { %v160_v43 = vmax.f32 %v159_v42, 1e-12 }
  0xd0   : > { %231 = vrcp.f32 %v160_v43 }
  0xda   : > { %v232_v44 = vpop.eup %231 }
  0xdb   : > { %v162_v45 = vmul.f32 %v232_v44, %v149_v35 }
  0xdd   : > { %163 = vst [vmem:[%s112_s14] sm:$0x1] %v162_v45 }
  0xde PF: > { %s11_s6 = sadd.s32 1, %s239_s6  }
  0xdf   : > { %p8_p4 = scmp.ge.s32.totalorder %s11_s6, 4  }
  0xe1   :  { %10 = sbr.rel (!%p8_p4) target bundleno = 1 (0x1), region = 54 }

// kernel: baseline_forward.45
= control target key start
LH: loop header
LB: loop body
LE: loop exit
PB: predicated region body
PF: predicated region fallthrough
CT: control target
= control target key end

     0   :  { %s222_s0 = inlined_call_operand.vmem [shape: f32[2,128], index: 0, kind: input, shape index: {}]   ;;  %s223_s1 = inlined_call_operand.vmem [shape: f32[2,128], index: 1, kind: input, shape index: {}]   ;;  %s224_s2 = inlined_call_operand.vmem [shape: f32[2,128], index: 2, kind: input, shape index: {}]   ;;  %s225_s3 = inlined_call_operand.vmem [shape: f32[1,128], index: 3, kind: input, shape index: {}]   ;;  %s226_s4 = inlined_call_operand.vmem [shape: f32[1,128], index: 4, kind: input, shape index: {}]   ;;  %s227_s5 = inlined_call_operand.vmem [shape: f32[1,128], index: 5, kind: input, shape index: {}]   ;;  %s228_s6 = inlined_call_operand.vmem [shape: f32[1,128], index: 6, kind: input, shape index: {}]   ;;  %s229_s7 = inlined_call_operand.vmem [shape: f32[1,128], index: 7, kind: input, shape index: {}]   ;;  %s230_s8 = inlined_call_operand.vmem [shape: f32[1,128], index: 8, kind: input, shape index: {}]   ;;  %s231_s9 = inlined_call_operand.hbm [shape: f32[2,256], index: 9, kind: output, shape index: {}]  }
   0x1   :  { %v33_v0 = vld [vmem:[%s222_s0] sm:$0x3] }
   0x2   :  { %v101_v1 = vld [vmem:[%s225_s3] ss:$0 sm:$0xff] }
   0x3   :  { %v102_v2 = vld [vmem:[%s226_s4] ss:$0 sm:$0xff]  ;;  %v41_v3 = vmul.f32 %v101_v1, %v33_v0 }
   0x4   :  { %v50_v4 = vld [vmem:[%s223_s1] sm:$0x3] }
   0x5   :  { %v103_v5 = vld [vmem:[%s227_s5] ss:$0 sm:$0xff]  ;;  %v49_v11 = vadd.f32 %v102_v2, %v41_v3 }
   0x6   :  { %v104_v6 = vld [vmem:[%s228_s6] ss:$0 sm:$0xff]  ;;  %v58_v7 = vmul.f32 %v103_v5, %v50_v4 }
   0x7   :  { %v67_v8 = vld [vmem:[%s224_s2] sm:$0x3] }
   0x8   :  { %v105_v9 = vld [vmem:[%s229_s7] ss:$0 sm:$0xff] }
   0x9   :  { %v106_v10 = vld [vmem:[%s230_s8] ss:$0 sm:$0xff]  ;;  %v75_v12 = vmul.f32 %v105_v9, %v67_v8 }
   0xa   :  { %14 = vsyncpa [#allocation3], 0  ;;  %v66_v13 = vadd.f32 %v104_v6, %v58_v7  ;;  %s132_s1 = smov [#allocation2]  }
   0xb   :  { %s93_s5 = sshll.u32 %s132_s1, 4  ;;  %v83_v14 = vadd.f32 %v106_v10, %v75_v12  ;;  %s94_s5 = int_to_ptr.vmem [resolvable:$true] %s93_s5 }
   0xc   :  { %v84_v15 = vadd.f32 %v66_v13, %v49_v11  ;;  %s108_s2 = scalar_lea.vmem %s94_s5, 64  ;;  %p113_p1 = scmp.lt.s32.totalorder %s94_s5, %s94_s5 }
   0xd   :  { %86 = vst [vmem:[#allocation2 + $0x2] sm:$0x3] %v83_v14  ;;  %p109_p0 = scmp.ne.s32.totalorder %s94_s5, %s108_s2  ;;  %p114_p2 = scmp.lt.s32.totalorder %s108_s2, %s108_s2 }
   0xe   :  { %85 = vst [vmem:[#allocation2] sm:$0x3] %v84_v15 }
   0xf   :  { %p115_p3 = por %p114_p2, %p113_p1 }
  0x11   :  { %p116_p4 = pnand %p115_p3, %p109_p0 }
  0x13   :  { %119 = shalt.err (!%p116_p4)
}
  0x14   :  { %s120_s8 = scalar_lea.hbm %s231_s9, 64 }
  0x15   :  { %p121_p5 = scmp.ne.s32.totalorder %s231_s9, %s120_s8  ;;  %p124_p6 = scmp.lt.u32.totalorder %s120_s8, %s231_s9 }
  0x17   :  { %p126_p7 = pnand %p124_p6, %p121_p5 }
  0x19   :  { %129 = shalt.err (!%p126_p7)
}
  0x1a   :  { %96 = dma.vmem_to_hbm [thread:$0]  %s94_s5, 64, %s231_s9, [#allocation3]  }
  0x1b   :  { %130 = dma.done.wait [#allocation3], 64  }
  0x1c   :  { %131 = vsyncadd [#allocation3], 4294967232 }
  0x1d   :  { %100 = vsyncpa [#allocation3], 1 }

</bundles_post_ra>
